<compile_context>
chip_gen: v6e
topology: v6e:2x2x1
jax: 0.10.0
libtpu: 0.0.40
codegen_flags: <defaults>
</compile_context>

<pallas_src>
import jax
import jax.numpy as jnp
from jax import lax
from jax.experimental import pallas as pl
from jax.experimental.pallas import tpu as pltpu

# ----------------------------- problem sizes --------------------------------
N_ENT = 256          # sizes[0] == sizes[2]  (number of entities)
N_REL = 16           # sizes[1]              (number of relations)
RANK = 32            # rank  -> embedding width 2*rank = 64
TWO_R = 2 * RANK
IMG_DIM = 64         # visual feature dim
LING_DIM = 128       # linguistic feature dim
FEAT_DIM = IMG_DIM + LING_DIM
BATCH = 128          # query batch size (amortizes fixed launch/DMA overhead)
SCALE = 0.1

OUT_W = N_ENT + 4 * RANK          # 384 = 3*128, lane-dense output slab width


# ------------------------- single fused forward kernel -----------------------
def _fused_forward_kernel(x_ref, ag_ref, feats_ref, mats_ref, emb0_ref,
                          rel_emb_ref, out_ref):
    # ---- (1) fused multimodal embedding: one (N,192)@(192,64) MXU pass ----
    fused_raw = jnp.dot(feats_ref[...], mats_ref[...],
                        preferred_element_type=jnp.float32)          # (N, 2R)
    # scalars pre-folded on host: ag[0] = alpha*scale, ag[1] = gamma*scale^2
    emb = emb0_ref[...] * ag_ref[0] + fused_raw * ag_ref[1]          # (N, 2R)

    # ---- (2) gather lhs+rhs with ONE fused one-hot matmul, rel separately ----
    xv = x_ref[...]                                                  # (B, 3) i32
    heads = xv[:, 0:1]
    rels = xv[:, 1:2]
    tails = xv[:, 2:3]
    ht = jnp.concatenate([heads, tails], axis=0)                     # (2B, 1)
    ent_iota = lax.broadcasted_iota(jnp.int32, (2 * BATCH, N_ENT), 1)
    rel_iota = lax.broadcasted_iota(jnp.int32, (BATCH, N_REL), 1)
    oh_ent = (ent_iota == ht).astype(jnp.float32)                    # (2B, N)
    oh_rel = (rel_iota == rels).astype(jnp.float32)                  # (B, N_REL)
    gathered = jnp.dot(oh_ent, emb,
                       preferred_element_type=jnp.float32)           # (2B, 2R)
    lhs = gathered[:BATCH]                                           # (B, 2R)
    rhs = gathered[BATCH:]                                           # (B, 2R)
    rel = jnp.dot(oh_rel, rel_emb_ref[...],
                  preferred_element_type=jnp.float32)                # (B, 2R)

    l0, l1 = lhs[:, :RANK], lhs[:, RANK:]
    r0, r1 = rel[:, :RANK], rel[:, RANK:]

    # ---- (3) complex-bilinear scores: [a|b] @ emb^T, single contraction ----
    a = l0 * r0 - l1 * r1
    b = l0 * r1 + l1 * r0
    ab = jnp.concatenate([a, b], axis=1)                             # (B, 2R)
    scores = lax.dot_general(
        ab, emb, dimension_numbers=(((1,), (1,)), ((), ())),
        preferred_element_type=jnp.float32)                          # (B, N)

    # ---- (4) complex-modulus norms ----
    lhs_n = jnp.sqrt(l0 * l0 + l1 * l1)
    rel_n = jnp.sqrt(r0 * r0 + r1 * r1)
    rhs_n = jnp.sqrt(rhs[:, :RANK] ** 2 + rhs[:, RANK:] ** 2)

    # ---- (5) one lane-dense output slab: [scores | lhs_n | rel_n | rhs_n | pad]
    out_ref[:, :N_ENT] = scores
    # reuse rhs_n as the 32-lane filler (sliced away in the wrapper) instead of
    # materializing a zeros tile.
    out_ref[:, N_ENT:] = jnp.concatenate([lhs_n, rel_n, rhs_n, rhs_n], axis=1)


def fused_forward(x, ag, feats, mats, emb_ent, emb_rel):
    smem_spec = pl.BlockSpec(memory_space=pltpu.MemorySpace.SMEM)
    # grid=(1,): the whole problem fits in VMEM; a grid would only add per-step
    # overhead at this size.
    return pl.pallas_call(
        _fused_forward_kernel,
        out_shape=jax.ShapeDtypeStruct((BATCH, OUT_W), jnp.float32),
        grid_spec=pltpu.PrefetchScalarGridSpec(
            num_scalar_prefetch=0,
            grid=(1,),
            in_specs=[
                pl.BlockSpec((BATCH, 3), lambda i: (0, 0)),          # x (int32)
                smem_spec,                                           # alpha'/gamma'
                pl.BlockSpec((N_ENT, FEAT_DIM), lambda i: (0, 0)),   # [img|ling]
                pl.BlockSpec((FEAT_DIM, TWO_R), lambda i: (0, 0)),   # stacked mats
                pl.BlockSpec((N_ENT, TWO_R), lambda i: (0, 0)),      # entity emb
                pl.BlockSpec((N_REL, TWO_R), lambda i: (0, 0)),      # relation emb
            ],
            out_specs=pl.BlockSpec((BATCH, OUT_W), lambda i: (0, 0)),
        ),
        compiler_params=pltpu.CompilerParams(
            dimension_semantics=("arbitrary",)),
    )(x, ag, feats, mats, emb_ent, emb_rel)


# ------------------------------ model wrapper --------------------------------
def init_params(key):
    k = jax.random.split(key, 6)
    # synthetic stand-ins for matrix_wn_visual.npy / matrix_wn_ling.npy
    img_vec = jax.random.normal(k[0], (N_ENT, IMG_DIM), jnp.float32)
    ling_vec = jax.random.normal(k[1], (N_ENT, LING_DIM), jnp.float32)
    # xavier_uniform_ for projection matrices
    lim_img = (6.0 / (IMG_DIM + TWO_R)) ** 0.5
    lim_ling = (6.0 / (LING_DIM + TWO_R)) ** 0.5
    mats_img = jax.random.uniform(k[2], (IMG_DIM, TWO_R), jnp.float32,
                                  -lim_img, lim_img)
    mats_ling = jax.random.uniform(k[3], (LING_DIM, TWO_R), jnp.float32,
                                   -lim_ling, lim_ling)
    # nn.Embedding default init is N(0, 1), then scaled by init_size=0.001
    emb_ent = jax.random.normal(k[4], (N_ENT, TWO_R), jnp.float32) * 1e-3
    emb_rel = jax.random.normal(k[5], (N_REL, TWO_R), jnp.float32) * 1e-3
    params = dict(img_vec=img_vec, ling_vec=ling_vec, mats_img=mats_img,
                  mats_ling=mats_ling, emb_ent=emb_ent, emb_rel=emb_rel,
                  alpha=jnp.float32(0.5), gamma=jnp.float32(0.5))
    # one-time concatenations so the kernel sees a single K=192 contraction
    params["feats"] = jnp.concatenate([img_vec, ling_vec], axis=1)    # (N, 192)
    params["mats"] = jnp.concatenate([mats_img, mats_ling], axis=0)   # (192, 2R)
    return params


@jax.jit
def model_wn_forward(params, x):
    """x: int32 (B, 3) with columns [head, relation, tail]."""
    # fold the SCALE constants into the scalars on the host side (free)
    ag = jnp.stack([params["alpha"] * SCALE,
                    params["gamma"] * (SCALE * SCALE)]).astype(jnp.float32)
    slab = fused_forward(x, ag, params["feats"], params["mats"],
                         params["emb_ent"], params["emb_rel"])
    scores = slab[:, :N_ENT]
    lhs_n = slab[:, N_ENT:N_ENT + RANK]
    rel_n = slab[:, N_ENT + RANK:N_ENT + 2 * RANK]
    rhs_n = slab[:, N_ENT + 2 * RANK:N_ENT + 3 * RANK]
    return scores, (lhs_n, rel_n, rhs_n)


# ------------------------------- reference -----------------------------------
def reference_forward(params, x):
    img_emb = params["img_vec"] @ params["mats_img"]
    ling_emb = params["ling_vec"] @ params["mats_ling"]
    fused = (img_emb + ling_emb) * SCALE
    embedding = (params["emb_ent"] * params["alpha"]
                 + fused * params["gamma"]) * SCALE
    lhs = embedding[x[:, 0]]
    rel = params["emb_rel"][x[:, 1]]
    rhs = embedding[x[:, 2]]
    l0, l1 = lhs[:, :RANK], lhs[:, RANK:]
    r0, r1 = rel[:, :RANK], rel[:, RANK:]
    e0, e1 = embedding[:, :RANK], embedding[:, RANK:]
    scores = (l0 * r0 - l1 * r1) @ e0.T + (l0 * r1 + l1 * r0) @ e1.T
    return scores, (jnp.sqrt(l0 ** 2 + l1 ** 2),
                    jnp.sqrt(r0 ** 2 + r1 ** 2),
                    jnp.sqrt(rhs[:, :RANK] ** 2 + rhs[:, RANK:] ** 2))


# --------------------------------- main ---------------------------------------
if __name__ == "__main__":
    key = jax.random.PRNGKey(0)
    pkey, qkey = jax.random.split(key)
    params = init_params(pkey)

    kh, kr, kt = jax.random.split(qkey, 3)
    heads = jax.random.randint(kh, (BATCH,), 0, N_ENT)
    rels = jax.random.randint(kr, (BATCH,), 0, N_REL)
    tails = jax.random.randint(kt, (BATCH,), 0, N_ENT)
    x = jnp.stack([heads, rels, tails], axis=1).astype(jnp.int32)

    scores, (n_lhs, n_rel, n_rhs) = model_wn_forward(params, x)
    jax.block_until_ready(scores)

    ref_scores, (rn_lhs, rn_rel, rn_rhs) = reference_forward(params, x)
    assert scores.shape == (BATCH, N_ENT)
    assert n_lhs.shape == (BATCH, RANK)
    assert jnp.allclose(scores, ref_scores, atol=1e-5, rtol=1e-5)
    assert jnp.allclose(n_lhs, rn_lhs, atol=1e-6)
    assert jnp.allclose(n_rel, rn_rel, atol=1e-6)
    assert jnp.allclose(n_rhs, rn_rhs, atol=1e-6)

    print("KERNEL_OK")
</pallas_src>

<mosaic_0001>
module attributes {stable_mosaic.version = 11 : i64} {
  func.func @_fused_forward_kernel(%arg0: i32, %arg1: memref<128x3xi32, #tpu.memory_space<vmem>>, %arg2: memref<2xf32, #tpu.memory_space<smem>>, %arg3: memref<256x192xf32, #tpu.memory_space<vmem>>, %arg4: memref<192x64xf32, #tpu.memory_space<vmem>>, %arg5: memref<256x64xf32, #tpu.memory_space<vmem>>, %arg6: memref<16x64xf32, #tpu.memory_space<vmem>>, %arg7: memref<128x384xf32, #tpu.memory_space<vmem>>) attributes {dimension_semantics = [#tpu.dimension_semantics<arbitrary>], iteration_bounds = array<i64: 1>, scalar_prefetch = 0 : i64, scratch_operands = 0 : i64, tpu.core_type = #tpu.core_type<tc>, window_params = [{pipeline_mode = #tpu.pipeline_mode<synchronous>, transform_indices = @transform_0, window_bounds = array<i64: 128, 3>}, {transform_indices = @transform_1, window_bounds = array<i64: 2>}, {pipeline_mode = #tpu.pipeline_mode<synchronous>, transform_indices = @transform_2, window_bounds = array<i64: 256, 192>}, {pipeline_mode = #tpu.pipeline_mode<synchronous>, transform_indices = @transform_3, window_bounds = array<i64: 192, 64>}, {pipeline_mode = #tpu.pipeline_mode<synchronous>, transform_indices = @transform_4, window_bounds = array<i64: 256, 64>}, {pipeline_mode = #tpu.pipeline_mode<synchronous>, transform_indices = @transform_5, window_bounds = array<i64: 16, 64>}, {pipeline_mode = #tpu.pipeline_mode<synchronous>, transform_indices = @transform_6, window_bounds = array<i64: 128, 384>}]} {
    %c0 = arith.constant 0 : index
    %c0_0 = arith.constant 0 : index
    %0 = vector.load %arg3[%c0, %c0_0] : memref<256x192xf32, #tpu.memory_space<vmem>>, vector<256x192xf32>
    %c0_1 = arith.constant 0 : index
    %c0_2 = arith.constant 0 : index
    %1 = vector.load %arg4[%c0_1, %c0_2] : memref<192x64xf32, #tpu.memory_space<vmem>>, vector<192x64xf32>
    %cst = arith.constant dense<0.000000e+00> : vector<256x64xf32>
    %2 = tpu.matmul %0, %1, %cst {dimension_numbers = #tpu.dot_dimension_numbers<[1], [0], [0], [1], [0, 0, 1, 1], [], []>} : vector<256x192xf32>, vector<192x64xf32>, vector<256x64xf32> -> vector<256x64xf32>
    %c0_3 = arith.constant 0 : index
    %c0_4 = arith.constant 0 : index
    %3 = vector.load %arg5[%c0_3, %c0_4] : memref<256x64xf32, #tpu.memory_space<vmem>>, vector<256x64xf32>
    %c0_5 = arith.constant 0 : index
    %4 = memref.load %arg2[%c0_5] : memref<2xf32, #tpu.memory_space<smem>>
    %5 = vector.broadcast %4 : f32 to vector<256x64xf32>
    %6 = arith.mulf %3, %5 : vector<256x64xf32>
    %c1 = arith.constant 1 : index
    %7 = memref.load %arg2[%c1] : memref<2xf32, #tpu.memory_space<smem>>
    %8 = vector.broadcast %7 : f32 to vector<256x64xf32>
    %9 = arith.mulf %2, %8 : vector<256x64xf32>
    %10 = arith.addf %6, %9 : vector<256x64xf32>
    %c0_6 = arith.constant 0 : index
    %c0_7 = arith.constant 0 : index
    %11 = vector.load %arg1[%c0_6, %c0_7] : memref<128x3xi32, #tpu.memory_space<vmem>>, vector<128x3xi32>
    %12 = vector.extract_strided_slice %11 {offsets = [0, 0], sizes = [128, 1], strides = [1, 1]} : vector<128x3xi32> to vector<128x1xi32>
    %13 = vector.extract_strided_slice %11 {offsets = [0, 1], sizes = [128, 1], strides = [1, 1]} : vector<128x3xi32> to vector<128x1xi32>
    %14 = vector.extract_strided_slice %11 {offsets = [0, 2], sizes = [128, 1], strides = [1, 1]} : vector<128x3xi32> to vector<128x1xi32>
    %15 = tpu.concatenate %12, %14 in 0 : vector<128x1xi32>, vector<128x1xi32> -> vector<256x1xi32>
    %16 = tpu.iota {dimensions = array<i32: 1>} : vector<256x256xi32>
    %17 = tpu.iota {dimensions = array<i32: 1>} : vector<128x16xi32>
    %18 = vector.broadcast %15 : vector<256x1xi32> to vector<256x256xi32>
    %19 = arith.cmpi eq, %16, %18 : vector<256x256xi32>
    %20 = arith.extui %19 : vector<256x256xi1> to vector<256x256xi32>
    %21 = arith.sitofp %20 : vector<256x256xi32> to vector<256x256xf32>
    %22 = vector.broadcast %13 : vector<128x1xi32> to vector<128x16xi32>
    %23 = arith.cmpi eq, %17, %22 : vector<128x16xi32>
    %24 = arith.extui %23 : vector<128x16xi1> to vector<128x16xi32>
    %25 = arith.sitofp %24 : vector<128x16xi32> to vector<128x16xf32>
    %cst_8 = arith.constant dense<0.000000e+00> : vector<256x64xf32>
    %26 = tpu.matmul %21, %10, %cst_8 {dimension_numbers = #tpu.dot_dimension_numbers<[1], [0], [0], [1], [0, 0, 1, 1], [], []>} : vector<256x256xf32>, vector<256x64xf32>, vector<256x64xf32> -> vector<256x64xf32>
    %27 = vector.extract_strided_slice %26 {offsets = [0, 0], sizes = [128, 64], strides = [1, 1]} : vector<256x64xf32> to vector<128x64xf32>
    %28 = vector.extract_strided_slice %26 {offsets = [128, 0], sizes = [128, 64], strides = [1, 1]} : vector<256x64xf32> to vector<128x64xf32>
    %c0_9 = arith.constant 0 : index
    %c0_10 = arith.constant 0 : index
    %29 = vector.load %arg6[%c0_9, %c0_10] : memref<16x64xf32, #tpu.memory_space<vmem>>, vector<16x64xf32>
    %cst_11 = arith.constant dense<0.000000e+00> : vector<128x64xf32>
    %30 = tpu.matmul %25, %29, %cst_11 {dimension_numbers = #tpu.dot_dimension_numbers<[1], [0], [0], [1], [0, 0, 1, 1], [], []>} : vector<128x16xf32>, vector<16x64xf32>, vector<128x64xf32> -> vector<128x64xf32>
    %31 = vector.extract_strided_slice %27 {offsets = [0, 0], sizes = [128, 32], strides = [1, 1]} : vector<128x64xf32> to vector<128x32xf32>
    %32 = vector.extract_strided_slice %27 {offsets = [0, 32], sizes = [128, 32], strides = [1, 1]} : vector<128x64xf32> to vector<128x32xf32>
    %33 = vector.extract_strided_slice %30 {offsets = [0, 0], sizes = [128, 32], strides = [1, 1]} : vector<128x64xf32> to vector<128x32xf32>
    %34 = vector.extract_strided_slice %30 {offsets = [0, 32], sizes = [128, 32], strides = [1, 1]} : vector<128x64xf32> to vector<128x32xf32>
    %35 = arith.mulf %31, %33 : vector<128x32xf32>
    %36 = arith.mulf %32, %34 : vector<128x32xf32>
    %37 = arith.subf %35, %36 : vector<128x32xf32>
    %38 = arith.mulf %31, %34 : vector<128x32xf32>
    %39 = arith.mulf %32, %33 : vector<128x32xf32>
    %40 = arith.addf %38, %39 : vector<128x32xf32>
    %41 = tpu.concatenate %37, %40 in 1 : vector<128x32xf32>, vector<128x32xf32> -> vector<128x64xf32>
    %cst_12 = arith.constant dense<0.000000e+00> : vector<128x256xf32>
    %42 = tpu.matmul %41, %10, %cst_12 {dimension_numbers = #tpu.dot_dimension_numbers<[1], [1], [0], [0], [0, 0, 1, 0], [], []>} : vector<128x64xf32>, vector<256x64xf32>, vector<128x256xf32> -> vector<128x256xf32>
    %43 = arith.mulf %31, %31 : vector<128x32xf32>
    %44 = arith.mulf %32, %32 : vector<128x32xf32>
    %45 = arith.addf %43, %44 : vector<128x32xf32>
    %46 = math.sqrt %45 : vector<128x32xf32>
    %47 = arith.mulf %33, %33 : vector<128x32xf32>
    %48 = arith.mulf %34, %34 : vector<128x32xf32>
    %49 = arith.addf %47, %48 : vector<128x32xf32>
    %50 = math.sqrt %49 : vector<128x32xf32>
    %51 = vector.extract_strided_slice %28 {offsets = [0, 0], sizes = [128, 32], strides = [1, 1]} : vector<128x64xf32> to vector<128x32xf32>
    %52 = arith.mulf %51, %51 : vector<128x32xf32>
    %53 = vector.extract_strided_slice %28 {offsets = [0, 32], sizes = [128, 32], strides = [1, 1]} : vector<128x64xf32> to vector<128x32xf32>
    %54 = arith.mulf %53, %53 : vector<128x32xf32>
    %55 = arith.addf %52, %54 : vector<128x32xf32>
    %56 = math.sqrt %55 : vector<128x32xf32>
    %c0_13 = arith.constant 0 : index
    %c0_14 = arith.constant 0 : index
    %57 = vector.load %arg7[%c0_13, %c0_14] : memref<128x384xf32, #tpu.memory_space<vmem>>, vector<128x256xf32>
    tpu.vector_store %arg7[%c0_13, %c0_14], %42 {strides = array<i32>} : memref<128x384xf32, #tpu.memory_space<vmem>>, vector<128x256xf32>,
    %58 = tpu.concatenate %46, %50, %56, %56 in 1 : vector<128x32xf32>, vector<128x32xf32>, vector<128x32xf32>, vector<128x32xf32> -> vector<128x128xf32>
    %c0_15 = arith.constant 0 : index
    %c256 = arith.constant 256 : index
    %59 = vector.load %arg7[%c0_15, %c256] : memref<128x384xf32, #tpu.memory_space<vmem>>, vector<128x128xf32>
    tpu.vector_store %arg7[%c0_15, %c256], %58 {strides = array<i32>} : memref<128x384xf32, #tpu.memory_space<vmem>>, vector<128x128xf32>,
    return
  }
  func.func @transform_0(%arg0: i32) -> (i32, i32) {
    %c0_i32 = arith.constant 0 : i32
    %c0_i32_0 = arith.constant 0 : i32
    %c0_i32_1 = arith.constant 0 : i32
    return %c0_i32, %c0_i32_0 : i32, i32
  }
  func.func @transform_1(%arg0: i32) -> i32 {
    %c0_i32 = arith.constant 0 : i32
    %c0_i32_0 = arith.constant 0 : i32
    return %c0_i32 : i32
  }
  func.func @transform_2(%arg0: i32) -> (i32, i32) {
    %c0_i32 = arith.constant 0 : i32
    %c0_i32_0 = arith.constant 0 : i32
    %c0_i32_1 = arith.constant 0 : i32
    return %c0_i32, %c0_i32_0 : i32, i32
  }
  func.func @transform_3(%arg0: i32) -> (i32, i32) {
    %c0_i32 = arith.constant 0 : i32
    %c0_i32_0 = arith.constant 0 : i32
    %c0_i32_1 = arith.constant 0 : i32
    return %c0_i32, %c0_i32_0 : i32, i32
  }
  func.func @transform_4(%arg0: i32) -> (i32, i32) {
    %c0_i32 = arith.constant 0 : i32
    %c0_i32_0 = arith.constant 0 : i32
    %c0_i32_1 = arith.constant 0 : i32
    return %c0_i32, %c0_i32_0 : i32, i32
  }
  func.func @transform_5(%arg0: i32) -> (i32, i32) {
    %c0_i32 = arith.constant 0 : i32
    %c0_i32_0 = arith.constant 0 : i32
    %c0_i32_1 = arith.constant 0 : i32
    return %c0_i32, %c0_i32_0 : i32, i32
  }
  func.func @transform_6(%arg0: i32) -> (i32, i32) {
    %c0_i32 = arith.constant 0 : i32
    %c0_i32_0 = arith.constant 0 : i32
    %c0_i32_1 = arith.constant 0 : i32
    return %c0_i32, %c0_i32_0 : i32, i32
  }
}

</mosaic_0001>

<bundles_post_ra>
// kernel: model_wn_forward.1
= control target key start
LH: loop header
LB: loop body
LE: loop exit
PB: predicated region body
PF: predicated region fallthrough
CT: control target
= control target key end

     0   :  { %11 = vsyncpa [#allocation3], 0  ;;  %s6235_s0 = inlined_call_operand.vmem [shape: s32[128,3], index: 0, kind: input, shape index: {}]   ;;  %s6236_s1 = inlined_call_operand.vmem [shape: f32[2], index: 1, kind: input, shape index: {}]   ;;  %s6237_s2 = inlined_call_operand.vmem [shape: f32[256,192], index: 2, kind: input, shape index: {}]   ;;  %s6238_s3 = inlined_call_operand.vmem [shape: f32[192,64], index: 3, kind: input, shape index: {}]   ;;  %s6239_s4 = inlined_call_operand.vmem [shape: f32[256,64], index: 4, kind: input, shape index: {}]   ;;  %s6240_s5 = inlined_call_operand.vmem [shape: f32[16,64], index: 5, kind: input, shape index: {}]   ;;  %s6241_s6 = inlined_call_operand.vmem [shape: f32[128,384], index: 6, kind: output, shape index: {}]  }
   0x1   :  { %s20_s23 = sshll.u32 %s6236_s1, 4  ;;  %s21_s23 = int_to_ptr.vmem [resolvable:$true] %s20_s23 }
   0x2   :  { %s3569_s24 = scalar_lea.vmem %s21_s23, 16  ;;  %p3574_p1 = scmp.lt.s32.totalorder %s21_s23, %s21_s23 }
   0x3   :  { %p3570_p0 = scmp.ne.s32.totalorder %s21_s23, %s3569_s24  ;;  %p3575_p2 = scmp.lt.s32.totalorder %s3569_s24, %s3569_s24 }
   0x5   :  { %p3576_p3 = por %p3575_p2, %p3574_p1 }
   0x7   :  { %p3577_p4 = pnand %p3576_p3, %p3570_p0 }
   0x9   :  { %3580 = shalt.err (!%p3577_p4)
}
   0xa   :  { %s3583_s25 = smov [#allocation2]  }
   0xb   :  { %23 = dma.vmem_to_smem %s21_s23, 16, %s3583_s25, [#allocation3]  }
   0xc   :  { %3581 = dma.done.wait [#allocation3], 16  }
   0xd   :  { %3582 = vsyncadd [#allocation3], 4294967280 }
   0xe   :  { %35 = sfence }
   0xf   :  { %v115_v0 = vld [vmem:[%s6238_s3 + $0x78] sm:$0xff]  ;;  %v6244_v1 = vmov 0.0   ;;  %v114_v2 = vld [vmem:[%s6238_s3 + $0x70] sm:$0xff]  ;;  %v113_v3 = vld [vmem:[%s6238_s3 + $0x68] sm:$0xff]  ;;  %vm124_vm0 = vcmask 523264   ;;  %v3585_v28 = vmov 0  }
  0x10   :  { %221 = vmatprep.subr.mxu0 %v6244_v1  ;;  %3393 = vmatprep.subr.mxu1 %v6244_v1  ;;  %v112_v4 = vld [vmem:[%s6238_s3 + $0x60] sm:$0xff]  ;;  %v111_v5 = vld [vmem:[%s6238_s3 + $0x58] sm:$0xff]  ;;  %v37_v6 = vld [vmem:[%s6237_s2 + $0x8] sm:$0xff]  ;;  %v3586_v41 = vmov 1   ;;  %s3587_s17 = smov 126   ;;  %s3590_s12 = smov 96  }
  0x11   :  { %222 = vmatpush1.msra.mxu0 %v115_v0  ;;  %v110_v7 = vld [vmem:[%s6238_s3 + $0x50] sm:$0xff]  ;;  %3042 = vmatprep.mubr.msk.f32.mxu0 %vm124_vm0, %v37_v6  ;;  %v109_v8 = vld [vmem:[%s6238_s3 + $0x48] sm:$0xff]  ;;  %v108_v9 = vld [vmem:[%s6238_s3 + $0x40] sm:$0xff]  ;;  %s3591_s13 = smov 64  }
  0x12   :  { %223 = vmatprep.subr.mxu0 %v6244_v1  ;;  %v107_v10 = vld [vmem:[%s6238_s3 + $0x38] sm:$0xff]  ;;  %v106_v11 = vld [vmem:[%s6238_s3 + $0x30] sm:$0xff]  ;;  %v105_v12 = vld [vmem:[%s6238_s3 + $0x28] sm:$0xff]  ;;  %3467 = vset.pattern.permute.xlu1 %v3585_v28 }
  0x13   :  { %224 = vmatpush1.msra.mxu0 %v114_v2  ;;  %v104_v13 = vld [vmem:[%s6238_s3 + $0x20] sm:$0xff]  ;;  %v103_v14 = vld [vmem:[%s6238_s3 + $0x18] sm:$0xff]  ;;  %v102_v15 = vld [vmem:[%s6238_s3 + $0x10] sm:$0xff]  ;;  %3466 = vset.pattern.permute.xlu0 %v3585_v28 }
  0x14   :  { %225 = vmatprep.subr.mxu0 %v6244_v1  ;;  %v101_v16 = vld [vmem:[%s6238_s3 + $0x8] sm:$0xff]  ;;  %v100_v17 = vld [vmem:[%s6238_s3] sm:$0xff]  ;;  %v123_v18 = vld [vmem:[%s6238_s3 + $0xb8] sm:$0xff] }
  0x15   :  { %226 = vmatpush1.msra.mxu0 %v113_v3  ;;  %v122_v19 = vld [vmem:[%s6238_s3 + $0xb0] sm:$0xff]  ;;  %v121_v20 = vld [vmem:[%s6238_s3 + $0xa8] sm:$0xff]  ;;  %v120_v21 = vld [vmem:[%s6238_s3 + $0xa0] sm:$0xff] }
  0x16   :  { %227 = vmatprep.subr.mxu0 %v6244_v1  ;;  %v119_v22 = vld [vmem:[%s6238_s3 + $0x98] sm:$0xff]  ;;  %v118_v23 = vld [vmem:[%s6238_s3 + $0x90] sm:$0xff]  ;;  %v117_v24 = vld [vmem:[%s6238_s3 + $0x88] sm:$0xff] }
  0x17   :  { %228 = vmatpush1.msra.mxu0 %v112_v4  ;;  %v116_v25 = vld [vmem:[%s6238_s3 + $0x80] sm:$0xff]  ;;  %v3733_v26 = vld [vmem:[%s6235_s0 + $0x10] sm:$0xff]  ;;  %v39_v30 = vld [vmem:[%s6237_s2 + $0x18] sm:$0xff] }
  0x18   :  { %229 = vmatprep.subr.mxu0 %v6244_v1  ;;  %v36_v27 = vld [vmem:[%s6237_s2] sm:$0xff]  ;;  %636 = vperm.xlu1 %3467, %v3733_v26   ;;  %v3753_v31 = vld [vmem:[%s6235_s0 + $0x18] sm:$0xff]  ;;  %v38_v32 = vld [vmem:[%s6237_s2 + $0x10] sm:$0xff] }
  0x19   :  { %230 = vmatpush1.msra.mxu0 %v111_v5  ;;  %v3742_v29 = vld [vmem:[%s6235_s0] sm:$0xff]  ;;  %v3763_v33 = vld [vmem:[%s6235_s0 + $0x8] sm:$0xff]  ;;  %v43_v38 = vld [vmem:[%s6237_s2 + $0x38] sm:$0xff] }
  0x1a   :  { %231 = vmatprep.subr.mxu0 %v6244_v1  ;;  %630 = vperm.xlu0 %3466, %v3742_v29   ;;  %v41_v34 = vld [vmem:[%s6237_s2 + $0x28] sm:$0xff]  ;;  %v40_v36 = vld [vmem:[%s6237_s2 + $0x20] sm:$0xff]  ;;  %v42_v39 = vld [vmem:[%s6237_s2 + $0x30] sm:$0xff] }
  0x1b   :  { %232 = vmatpush1.msra.mxu0 %v110_v7  ;;  %v3773_v35 = vld [vmem:[%s6235_s0 + $0x28] sm:$0xff]  ;;  %v3783_v37 = vld [vmem:[%s6235_s0 + $0x20] sm:$0xff]  ;;  %v47_v43 = vld [vmem:[%s6237_s2 + $0x58] sm:$0xff] }
  0x1c   :  { %233 = vmatprep.subr.mxu0 %v6244_v1  ;;  %639 = vperm.xlu1 %3467, %v3753_v31   ;;  %v45_v40 = vld [vmem:[%s6237_s2 + $0x48] sm:$0xff]  ;;  %v44_v42 = vld [vmem:[%s6237_s2 + $0x40] sm:$0xff]  ;;  %v46_v44 = vld [vmem:[%s6237_s2 + $0x50] sm:$0xff] }
  0x1d   :  { %234 = vmatpush1.msra.mxu0 %v109_v8  ;;  %v49_v45 = vld [vmem:[%s6237_s2 + $0x68] sm:$0xff]  ;;  %v48_v46 = vld [vmem:[%s6237_s2 + $0x60] sm:$0xff]  ;;  %v51_v47 = vld [vmem:[%s6237_s2 + $0x78] sm:$0xff] }
  0x1e   :  { %235 = vmatprep.subr.mxu0 %v6244_v1  ;;  %633 = vperm.xlu0 %3466, %v3763_v33   ;;  %v50_v48 = vld [vmem:[%s6237_s2 + $0x70] sm:$0xff]  ;;  %v53_v49 = vld [vmem:[%s6237_s2 + $0x88] sm:$0xff]  ;;  %v52_v50 = vld [vmem:[%s6237_s2 + $0x80] sm:$0xff] }
  0x1f   :  { %236 = vmatpush1.msra.mxu0 %v108_v9  ;;  %v55_v51 = vld [vmem:[%s6237_s2 + $0x98] sm:$0xff]  ;;  %v54_v52 = vld [vmem:[%s6237_s2 + $0x90] sm:$0xff]  ;;  %v57_v53 = vld [vmem:[%s6237_s2 + $0xa8] sm:$0xff] }
  0x20   :  { %237 = vmatprep.subr.mxu0 %v6244_v1  ;;  %645 = vperm.xlu1 %3467, %v3773_v35   ;;  %v3850_v54 = vld [vmem:[%s6235_s0 + $0x30] sm:$0xff]  ;;  %v56_v55 = vld [vmem:[%s6237_s2 + $0xa0] sm:$0xff]  ;;  %v59_v56 = vld [vmem:[%s6237_s2 + $0xb8] sm:$0xff] }
  0x21   :  { %238 = vmatpush1.msra.mxu0 %v107_v10  ;;  %v3863_v57 = vld [vmem:[%s6235_s0 + $0x40] sm:$0xff]  ;;  %v3868_v58 = vld [vmem:[%s6235_s0 + $0x38] sm:$0xff]  ;;  %v58_v59 = vld [vmem:[%s6237_s2 + $0xb0] sm:$0xff] }
  0x22   :  { %239 = vmatprep.subr.mxu0 %v6244_v1  ;;  %642 = vperm.xlu0 %3466, %v3783_v37   ;;  %v61_v60 = vld [vmem:[%s6237_s2 + $0xc8] sm:$0xff]  ;;  %v3882_v61 = vld [vmem:[%s6235_s0 + $0x50] sm:$0xff]  ;;  %v60_v63 = vld [vmem:[%s6237_s2 + $0xc0] sm:$0xff] }
  0x23   :  { %240 = vmatpush1.msra.mxu0 %v106_v11  ;;  %v3887_v62 = vld [vmem:[%s6235_s0 + $0x48] sm:$0xff]  ;;  %v63_v0 = vld [vmem:[%s6237_s2 + $0xd8] sm:$0xff]  ;;  %v3901_v2 = vld [vmem:[%s6235_s0 + $0x60] sm:$0xff] }
  0x24   :  { %241 = vmatprep.subr.mxu0 %v6244_v1  ;;  %3469 = vset.pattern.permute.xlu1 %v3586_v41  ;;  %v3906_v3 = vld [vmem:[%s6235_s0 + $0x58] sm:$0xff]  ;;  %v62_v4 = vld [vmem:[%s6237_s2 + $0xd0] sm:$0xff]  ;;  %v65_v5 = vld [vmem:[%s6237_s2 + $0xe8] sm:$0xff] }
  0x25   :  { %242 = vmatpush1.msra.mxu0 %v105_v12  ;;  %921 = vperm.xlu1 %3469, %v3763_v33   ;;  %v3920_v6 = vld [vmem:[%s6235_s0 + $0x70] sm:$0xff]  ;;  %v3925_v7 = vld [vmem:[%s6235_s0 + $0x68] sm:$0xff]  ;;  %v64_v8 = vld [vmem:[%s6237_s2 + $0xe0] sm:$0xff] }
  0x26   :  { %243 = vmatprep.subr.mxu0 %v6244_v1  ;;  %3468 = vset.pattern.permute.xlu0 %v3586_v41  ;;  %v67_v9 = vld [vmem:[%s6237_s2 + $0xf8] sm:$0xff]  ;;  %v66_v11 = vld [vmem:[%s6237_s2 + $0xf0] sm:$0xff]  ;;  %v69_v12 = vld [vmem:[%s6237_s2 + $0x108] sm:$0xff] }
  0x27   :  { %244 = vmatpush1.msra.mxu0 %v104_v13  ;;  %918 = vperm.xlu0 %3468, %v3742_v29   ;;  %v3939_v10 = vld [vmem:[%s6235_s0 + $0x78] sm:$0xff]  ;;  %v68_v13 = vld [vmem:[%s6237_s2 + $0x100] sm:$0xff] }
  0x28   :  { %245 = vmatprep.subr.mxu0 %v6244_v1 }
  0x29   :  { %246 = vmatpush1.msra.mxu0 %v103_v14  ;;  %924 = vperm.xlu1 %3469, %v3733_v26   ;;  %v71_v14 = vld [vmem:[%s6237_s2 + $0x118] sm:$0xff] }
  0x2a   :  { %247 = vmatprep.subr.mxu0 %v6244_v1 }
  0x2b   :  { %248 = vmatpush1.msra.mxu0 %v102_v15  ;;  %927 = vperm.xlu0 %3468, %v3753_v31   ;;  %v70_v15 = vld [vmem:[%s6237_s2 + $0x110] sm:$0xff] }
  0x2c   :  { %249 = vmatprep.subr.mxu0 %v6244_v1 }
  0x2d   :  { %250 = vmatpush1.msra.mxu0 %v101_v16  ;;  %930 = vperm.xlu1 %3469, %v3783_v37   ;;  %v73_v16 = vld [vmem:[%s6237_s2 + $0x128] sm:$0xff] }
  0x2e   :  { %251 = vmatprep.subr.mxu0 %v6244_v1 }
  0x2f   :  { %252 = vmatpush1.msra.mxu0 %v100_v17  ;;  %933 = vperm.xlu0 %3468, %v3773_v35   ;;  %v72_v17 = vld [vmem:[%s6237_s2 + $0x120] sm:$0xff] }
  0x30   :  { %269 = vmatprep.subr.mxu0 %v6244_v1 }
  0x31   :  { %270 = vmatpush2.msra.mxu0 %v123_v18  ;;  %936 = vperm.xlu1 %3469, %v3850_v54   ;;  %v75_v18 = vld [vmem:[%s6237_s2 + $0x138] sm:$0xff] }
  0x32   :  { %271 = vmatprep.subr.mxu0 %v6244_v1 }
  0x33   :  { %272 = vmatpush2.msra.mxu0 %v122_v19  ;;  %939 = vperm.xlu0 %3468, %v3868_v58   ;;  %v74_v19 = vld [vmem:[%s6237_s2 + $0x130] sm:$0xff] }
  0x34   :  { %273 = vmatprep.subr.mxu0 %v6244_v1 }
  0x35   :  { %274 = vmatpush2.msra.mxu0 %v121_v20  ;;  %942 = vperm.xlu1 %3469, %v3863_v57   ;;  %v77_v20 = vld [vmem:[%s6237_s2 + $0x148] sm:$0xff] }
  0x36   :  { %275 = vmatprep.subr.mxu0 %v6244_v1 }
  0x37   :  { %276 = vmatpush2.msra.mxu0 %v120_v21  ;;  %945 = vperm.xlu0 %3468, %v3887_v62   ;;  %v76_v21 = vld [vmem:[%s6237_s2 + $0x140] sm:$0xff] }
  0x38   :  { %277 = vmatprep.subr.mxu0 %v6244_v1 }
  0x39   :  { %278 = vmatpush2.msra.mxu0 %v119_v22  ;;  %948 = vperm.xlu1 %3469, %v3882_v61   ;;  %v79_v22 = vld [vmem:[%s6237_s2 + $0x158] sm:$0xff] }
  0x3a   :  { %279 = vmatprep.subr.mxu0 %v6244_v1 }
  0x3b   :  { %280 = vmatpush2.msra.mxu0 %v118_v23  ;;  %951 = vperm.xlu0 %3468, %v3906_v3   ;;  %v78_v23 = vld [vmem:[%s6237_s2 + $0x150] sm:$0xff] }
  0x3c   :  { %281 = vmatprep.subr.mxu0 %v6244_v1 }
  0x3d   :  { %282 = vmatpush2.msra.mxu0 %v117_v24  ;;  %954 = vperm.xlu1 %3469, %v3901_v2   ;;  %v81_v24 = vld [vmem:[%s6237_s2 + $0x168] sm:$0xff] }
  0x3e   :  { %283 = vmatprep.subr.mxu0 %v6244_v1 }
  0x3f   :  { %284 = vmatpush2.msra.mxu0 %v116_v25  ;;  %957 = vperm.xlu0 %3468, %v3925_v7   ;;  %v80_v25 = vld [vmem:[%s6237_s2 + $0x160] sm:$0xff] }
  0x40   :  { %286 = vmatmul.mubr.f32.vlgmr.msra.gmra.mxu0 %v36_v27  ;;  %1013 = vmatprep.subr.mxu0 %v6244_v1  ;;  %v83_v27 = vld [vmem:[%s6237_s2 + $0x178] sm:$0xff] }
  0x41   :  { %3043 = vmatprep.mubr.msk.f32.mxu0 %vm124_vm0, %v39_v30  ;;  %960 = vperm.xlu1 %3469, %v3920_v6   ;;  %v84_v30 = vld [vmem:[%s6237_s2 + $0x180] sm:$0xff] }
  0x43   :  { %963 = vperm.xlu0 %3468, %v3939_v10  }
  0x44   :  { %291 = vmatmul.mubr.f32.gmra.mxu0 %v38_v32  ;;  %v89_v32 = vld [vmem:[%s6237_s2 + $0x1a8] sm:$0xff] }
  0x45   :  { %3044 = vmatprep.mubr.msk.f32.mxu0 %vm124_vm0, %v41_v34  ;;  %3470 = vset.pattern.permute.xlu1 %v3585_v28  ;;  %v91_v34 = vld [vmem:[%s6237_s2 + $0x1b8] sm:$0xff] }
  0x46   :  { %648 = vperm.xlu1 %3470, %v3850_v54  }
  0x47   :  { %3471 = vset.pattern.permute.xlu0 %v3585_v28  ;;  %v82_v28 = vld [vmem:[%s6237_s2 + $0x170] sm:$0xff] }
  0x48   :  { %296 = vmatmul.mubr.f32.gmra.mxu0 %v40_v36  ;;  %651 = vperm.xlu0 %3471, %v3868_v58   ;;  %v93_v36 = vld [vmem:[%s6237_s2 + $0x1c8] sm:$0xff] }
  0x49   :  { %3045 = vmatprep.mubr.msk.f32.mxu0 %vm124_vm0, %v43_v38  ;;  %v95_v38 = vld [vmem:[%s6237_s2 + $0x1d8] sm:$0xff] }
  0x4a   :  { %654 = vperm.xlu1 %3470, %v3863_v57  }
  0x4c   :  { %301 = vmatmul.mubr.f32.gmra.mxu0 %v42_v39  ;;  %660 = vperm.xlu0 %3471, %v3882_v61   ;;  %v94_v39 = vld [vmem:[%s6237_s2 + $0x1d0] sm:$0xff] }
  0x4d   :  { %3046 = vmatprep.mubr.msk.f32.mxu0 %vm124_vm0, %v45_v40  ;;  %v97_v40 = vld [vmem:[%s6237_s2 + $0x1e8] sm:$0xff] }
  0x4e   :  { %657 = vperm.xlu1 %3470, %v3887_v62  }
  0x50   :  { %306 = vmatmul.mubr.f32.gmra.mxu0 %v44_v42  ;;  %666 = vperm.xlu0 %3471, %v3901_v2   ;;  %v96_v42 = vld [vmem:[%s6237_s2 + $0x1e0] sm:$0xff] }
  0x51   :  { %3047 = vmatprep.mubr.msk.f32.mxu0 %vm124_vm0, %v47_v43  ;;  %v99_v43 = vld [vmem:[%s6237_s2 + $0x1f8] sm:$0xff] }
  0x52   :  { %663 = vperm.xlu1 %3470, %v3906_v3  }
  0x54   :  { %311 = vmatmul.mubr.f32.gmra.mxu0 %v46_v44  ;;  %672 = vperm.xlu0 %3471, %v3920_v6   ;;  %v98_v44 = vld [vmem:[%s6237_s2 + $0x1f0] sm:$0xff] }
  0x55   :  { %3048 = vmatprep.mubr.msk.f32.mxu0 %vm124_vm0, %v49_v45 }
  0x56   :  { %669 = vperm.xlu1 %3470, %v3925_v7  }
  0x58   :  { %316 = vmatmul.mubr.f32.gmra.mxu0 %v48_v46  ;;  %594 = vrot.lane.b32.xlu0 %v3742_v29, %s3587_s17  ;;  %v85_v29 = vld [vmem:[%s6237_s2 + $0x188] sm:$0xff] }
  0x59   :  { %3049 = vmatprep.mubr.msk.f32.mxu0 %vm124_vm0, %v51_v47 }
  0x5a   :  { %675 = vperm.xlu1 %3470, %v3939_v10  }
  0x5c   :  { %321 = vmatmul.mubr.f32.gmra.mxu0 %v50_v48  ;;  %598 = vrot.lane.b32.xlu0 %v3733_v26, %s3587_s17  ;;  %v87_v26 = vld [vmem:[%s6237_s2 + $0x198] sm:$0xff] }
  0x5d   :  { %3050 = vmatprep.mubr.msk.f32.mxu0 %vm124_vm0, %v53_v49 }
  0x5e   :  { %596 = vrot.lane.b32.xlu1 %v3763_v33, %s3587_s17  ;;  %v88_v33 = vld [vmem:[%s6237_s2 + $0x1a0] sm:$0xff] }
  0x60   :  { %326 = vmatmul.mubr.f32.gmra.mxu0 %v52_v50  ;;  %602 = vrot.lane.b32.xlu0 %v3783_v37, %s3587_s17  ;;  %v92_v37 = vld [vmem:[%s6237_s2 + $0x1c0] sm:$0xff] }
  0x61   :  { %3051 = vmatprep.mubr.msk.f32.mxu0 %vm124_vm0, %v55_v51 }
  0x62   :  { %600 = vrot.lane.b32.xlu1 %v3753_v31, %s3587_s17  ;;  %v86_v31 = vld [vmem:[%s6237_s2 + $0x190] sm:$0xff] }
  0x64   :  { %331 = vmatmul.mubr.f32.gmra.mxu0 %v54_v52  ;;  %606 = vrot.lane.b32.xlu0 %v3850_v54, %s3587_s17 }
  0x65   :  { %3052 = vmatprep.mubr.msk.f32.mxu0 %vm124_vm0, %v57_v53 }
  0x66   :  { %604 = vrot.lane.b32.xlu1 %v3773_v35, %s3587_s17  ;;  %v90_v35 = vld [vmem:[%s6237_s2 + $0x1b0] sm:$0xff]  ;;  %s478_s2 = sld [smem:[#allocation2]] }
  0x68   :  { %336 = vmatmul.mubr.f32.gmra.mxu0 %v56_v55  ;;  %610 = vrot.lane.b32.xlu0 %v3863_v57, %s3587_s17 }
  0x69   :  { %3053 = vmatprep.mubr.msk.f32.mxu0 %vm124_vm0, %v59_v56 }
  0x6a   :  { %608 = vrot.lane.b32.xlu1 %v3868_v58, %s3587_s17 }
  0x6c   :  { %341 = vmatmul.mubr.f32.gmra.mxu0 %v58_v59  ;;  %614 = vrot.lane.b32.xlu0 %v3882_v61, %s3587_s17 }
  0x6d   :  { %3054 = vmatprep.mubr.msk.f32.mxu0 %vm124_vm0, %v61_v60 }
  0x6e   :  { %612 = vrot.lane.b32.xlu1 %v3887_v62, %s3587_s17 }
  0x70   :  { %346 = vmatmul.mubr.f32.gmra.mxu0 %v60_v63  ;;  %618 = vrot.lane.b32.xlu0 %v3901_v2, %s3587_s17 }
  0x71   :  { %3055 = vmatprep.mubr.msk.f32.mxu0 %vm124_vm0, %v63_v0 }
  0x72   :  { %616 = vrot.lane.b32.xlu1 %v3906_v3, %s3587_s17 }
  0x74   :  { %351 = vmatmul.mubr.f32.gmra.mxu0 %v62_v4  ;;  %622 = vrot.lane.b32.xlu0 %v3920_v6, %s3587_s17 }
  0x75   :  { %3056 = vmatprep.mubr.msk.f32.mxu0 %vm124_vm0, %v65_v5 }
  0x76   :  { %620 = vrot.lane.b32.xlu1 %v3925_v7, %s3587_s17 }
  0x78   :  { %356 = vmatmul.mubr.f32.gmra.mxu0 %v64_v8  ;;  %624 = vrot.lane.b32.xlu0 %v3939_v10, %s3587_s17  ;;  %s3074_s17 = sld [smem:[#allocation2 + $0x1]] }
  0x79   :  { %3057 = vmatprep.mubr.msk.f32.mxu0 %vm124_vm0, %v67_v9 }
  0x7c   :  { %361 = vmatmul.mubr.f32.gmra.mxu0 %v66_v11 }
  0x7d   :  { %3058 = vmatprep.mubr.msk.f32.mxu0 %vm124_vm0, %v69_v12 }
  0x80   :  { %366 = vmatmul.mubr.f32.gmra.mxu0 %v68_v13 }
  0x81   :  { %3059 = vmatprep.mubr.msk.f32.mxu0 %vm124_vm0, %v71_v14 }
  0x84   :  { %371 = vmatmul.mubr.f32.gmra.mxu0 %v70_v15 }
  0x85   :  { %3060 = vmatprep.mubr.msk.f32.mxu0 %vm124_vm0, %v73_v16 }
  0x88   :  { %376 = vmatmul.mubr.f32.gmra.mxu0 %v72_v17 }
  0x89   :  { %3061 = vmatprep.mubr.msk.f32.mxu0 %vm124_vm0, %v75_v18 }
  0x8c   :  { %381 = vmatmul.mubr.f32.gmra.mxu0 %v74_v19 }
  0x8d   :  { %3062 = vmatprep.mubr.msk.f32.mxu0 %vm124_vm0, %v77_v20 }
  0x90   :  { %386 = vmatmul.mubr.f32.gmra.mxu0 %v76_v21 }
  0x91   :  { %3063 = vmatprep.mubr.msk.f32.mxu0 %vm124_vm0, %v79_v22 }
  0x93   :  { %v4102_v45 = vpop.permute.xlu1 %636 }
  0x94   :  { %391 = vmatmul.mubr.f32.gmra.mxu0 %v78_v23 }
  0x95   :  { %3064 = vmatprep.mubr.msk.f32.mxu0 %vm124_vm0, %v81_v24  ;;  %v4106_v47 = vpop.permute.xlu0 %630 }
  0x97   :  { %v4104_v46 = vpop.permute.xlu1 %639 }
  0x98   :  { %396 = vmatmul.mubr.f32.gmra.mxu0 %v80_v25 }
  0x99   :  { %3065 = vmatprep.mubr.msk.f32.mxu0 %vm124_vm0, %v83_v27  ;;  %v4110_v49 = vpop.permute.xlu0 %633 }
  0x9b   :  { %v4108_v48 = vpop.permute.xlu1 %645 }
  0x9c   :  { %401 = vmatmul.mubr.f32.gmra.mxu0 %v82_v28 }
  0x9d   :  { %3066 = vmatprep.mubr.msk.f32.mxu0 %vm124_vm0, %v85_v29  ;;  %v4114_v51 = vpop.permute.xlu0 %642  ;;  %v626_v29 = vlaneseq }
  0xa0   :  { %406 = vmatmul.mubr.f32.gmra.mxu0 %v84_v30  ;;  %v4112_v50 = vpop.permute.xlu1 %921 }
  0xa1   :  { %3067 = vmatprep.mubr.msk.f32.mxu0 %vm124_vm0, %v87_v26 }
  0xa2   :  { %v4118_v53 = vpop.permute.xlu0 %918 }
  0xa4   :  { %411 = vmatmul.mubr.f32.gmra.mxu0 %v86_v31  ;;  %v4116_v52 = vpop.permute.xlu1 %924 }
  0xa5   :  { %3068 = vmatprep.mubr.msk.f32.mxu0 %vm124_vm0, %v89_v32  ;;  %v4180_v32 = vand.u32 127, %v626_v29 }
  0xa6   :  { %v4122_v55 = vpop.permute.xlu0 %927 }
  0xa7   :  { %vm725_vm3 = vcmp.eq.s32.totalorder %v4180_v32, %v4106_v47  ;;  %vm727_vm8 = vcmp.eq.s32.totalorder %v4180_v32, %v4110_v49  ;;  %vm729_vm10 = vcmp.eq.s32.totalorder %v4180_v32, %v4102_v45  ;;  %vm731_vm15 = vcmp.eq.s32.totalorder %v4180_v32, %v4104_v46 }
  0xa8   :  { %416 = vmatmul.mubr.f32.gmra.mxu0 %v88_v33  ;;  %v4120_v54 = vpop.permute.xlu1 %930 }
  0xa9   :  { %3069 = vmatprep.mubr.msk.f32.mxu0 %vm124_vm0, %v91_v34 }
  0xaa   :  { %v4126_v57 = vpop.permute.xlu0 %933 }
  0xac   :  { %421 = vmatmul.mubr.f32.gmra.mxu0 %v90_v35  ;;  %v4124_v56 = vpop.permute.xlu1 %936 }
  0xad   :  { %3070 = vmatprep.mubr.msk.f32.mxu0 %vm124_vm0, %v93_v36  ;;  %v4185_v36 = vadd.s32 128, %v4180_v32 }
  0xae   :  { %v4130_v59 = vpop.permute.xlu0 %939 }
  0xaf   :  { %vm726_vm1 = vcmp.eq.s32.totalorder %v4185_v36, %v4106_v47  ;;  %v6295_v47 = vmov 1.0   ;;  %vm728_vm5 = vcmp.eq.s32.totalorder %v4185_v36, %v4110_v49  ;;  %vm730_vm6 = vcmp.eq.s32.totalorder %v4185_v36, %v4102_v45 }
  0xb0   :  { %426 = vmatmul.mubr.f32.gmra.mxu0 %v92_v37  ;;  %v4128_v58 = vpop.permute.xlu1 %942  ;;  %vm732_vm12 = vcmp.eq.s32.totalorder %v4185_v36, %v4104_v46 }
  0xb1   :  { %3071 = vmatprep.mubr.msk.f32.mxu0 %vm124_vm0, %v95_v38  ;;  %6277 = vst [vmem:[#allocation5_spill] sm:$0xff] %v4128_v58  ;;  %v473_v58 = vld [vmem:[%s6239_s4 + $0xd8] sm:$0xff] }
  0xb2   :  { %v4134_v61 = vpop.permute.xlu0 %945 }
  0xb3   :  { %6279 = vst [vmem:[#allocation7_spill] sm:$0xff] %v4134_v61  ;;  %v474_v61 = vld [vmem:[%s6239_s4 + $0xe0] sm:$0xff] }
  0xb4   :  { %431 = vmatmul.mubr.f32.gmra.mxu0 %v94_v39  ;;  %v4132_v60 = vpop.permute.xlu1 %948  ;;  %v6242_v39 = vmov 1.0  }
  0xb5   :  { %3072 = vmatprep.mubr.msk.f32.mxu0 %vm124_vm0, %v97_v40  ;;  %6278 = vst [vmem:[#allocation6_spill] sm:$0xff] %v4132_v60  ;;  %v477_v60 = vld [vmem:[%s6239_s4 + $0xf8] sm:$0xff] }
  0xb6   :  { %v4138_v63 = vpop.permute.xlu0 %951 }
  0xb7   :  { %6281 = vst [vmem:[#allocation9_spill] sm:$0xff] %v4138_v63 }
  0xb8   :  { %436 = vmatmul.mubr.f32.gmra.mxu0 %v96_v42  ;;  %v4136_v62 = vpop.permute.xlu1 %954 }
  0xb9   :  { %3073 = vmatprep.mubr.msk.f32.mxu0 %vm124_vm0, %v99_v43  ;;  %6280 = vst [vmem:[#allocation8_spill] sm:$0xff] %v4136_v62 }
  0xba   :  { %v4142_v2 = vpop.permute.xlu0 %957 }
  0xbb   :  { %6283 = vst [vmem:[#allocation11_spill] sm:$0xff] %v4142_v2 }
  0xbc   :  { %441 = vmatmul.mubr.f32.gmra.mxu0 %v98_v44  ;;  %v4140_v0 = vpop.permute.xlu1 %960 }
  0xbd   :  { %6282 = vst [vmem:[#allocation10_spill] sm:$0xff] %v4140_v0  ;;  %3155 = vmatprep.mubr.msk.f32.mxu0 %vm726_vm1, %v6242_v39  ;;  %vm734_vm1 = vcmp.eq.s32.totalorder %v4185_v36, %v4114_v51 }
  0xbe   :  { %v4146_v4 = vpop.permute.xlu0 %963 }
  0xbf   :  { %6284 = vst [vmem:[#allocation12_spill] sm:$0xff] %v4146_v4 }
  0xc1   :  { %v4144_v3 = vpop.permute.xlu1 %648 }
  0xc2   :  { %vm738_vm2 = vcmp.eq.s32.totalorder %v4185_v36, %v4144_v3  ;;  %vm737_vm4 = vcmp.eq.s32.totalorder %v4180_v32, %v4144_v3  ;;  %v1238_v3 = vld [vmem:[%s6240_s5] sm:$0xff] }
  0xc3   :  { %v4150_v6 = vpop.permute.xlu0 %651  ;;  %3167 = vmatprep.mubr.msk.f32.mxu1 %vm738_vm2, %v6242_v39 }
  0xc4   :  { %vm740_vm7 = vcmp.eq.s32.totalorder %v4185_v36, %v4150_v6  ;;  %vm739_vm9 = vcmp.eq.s32.totalorder %v4180_v32, %v4150_v6 }
  0xc5   :  { %v4148_v5 = vpop.permute.xlu1 %654 }
  0xc6   :  { %vm742_vm11 = vcmp.eq.s32.totalorder %v4185_v36, %v4148_v5  ;;  %vm741_vm13 = vcmp.eq.s32.totalorder %v4180_v32, %v4148_v5 }
  0xc7   :  { %v4154_v8 = vpop.permute.xlu0 %660 }
  0xc9   :  { %v4152_v7 = vpop.permute.xlu1 %657 }
  0xca   :  { %vm744_vm14 = vcmp.eq.s32.totalorder %v4185_v36, %v4152_v7  ;;  %vm743_vm2 = vcmp.eq.s32.totalorder %v4180_v32, %v4152_v7  ;;  %v6299_v7 = vld [vmem:[#allocation7_spill] sm:$0xff] }
  0xcb   :  { %v4160_v11 = vpop.permute.xlu0 %666 }
  0xcd   :  { %v4156_v9 = vpop.permute.xlu1 %663 }
  0xcf   :  { %v4166_v15 = vpop.permute.xlu0 %672 }
  0xd1   :  { %v4164_v14 = vpop.permute.xlu1 %669 }
  0xd3   :  { %v595_v19 = vpop.permute.xlu0 %594 }
  0xd4   :  { %678 = vperm.xlu1 %3470, %v595_v19  }
  0xd5   :  { %v4170_v18 = vpop.permute.xlu1 %675 }
  0xd6   :  { %6285 = vst [vmem:[#allocation13_spill] sm:$0xff] %v4170_v18 }
  0xd7   :  { %v599_v25 = vpop.permute.xlu0 %598 }
  0xd8   :  { %684 = vperm.xlu0 %3471, %v599_v25  }
  0xd9   :  { %v597_v22 = vpop.permute.xlu1 %596 }
  0xda   :  { %681 = vperm.xlu1 %3470, %v597_v22  }
  0xdb   :  { %v603_v33 = vpop.permute.xlu0 %602 }
  0xdc   :  { %690 = vperm.xlu0 %3471, %v603_v33  }
  0xdd   :  { %v601_v30 = vpop.permute.xlu1 %600 }
  0xde   :  { %687 = vperm.xlu1 %3470, %v601_v30  }
  0xdf   :  { %v607_v42 = vpop.permute.xlu0 %606 }
  0xe0   :  { %3472 = vset.pattern.permute.xlu0 %v3586_v41 }
  0xe1   :  { %v605_v37 = vpop.permute.xlu1 %604 }
  0xe2   :  { %693 = vperm.xlu1 %3470, %v605_v37  }
  0xe3   :  { %v611_v19 = vpop.permute.xlu0 %610 }
  0xe5   :  { %v609_v41 = vpop.permute.xlu1 %608 }
  0xe6   :  { %696 = vperm.xlu1 %3470, %v607_v42  }
  0xe7   :  { %v615_v29 = vpop.permute.xlu0 %614 }
  0xea   :  { %699 = vperm.xlu1 %3470, %v609_v41   ;;  %v460_v41 = vld [vmem:[%s6239_s4 + $0x70] sm:$0xff] }
  0xeb   :  { %v619_v42 = vpop.permute.xlu0 %618 }
  0xee   :  { %702 = vperm.xlu1 %3470, %v611_v19  }
 0x100   :  { %v4158_v10 = vpop.f32.mrf.mxu0 }
 0x102   :  { %v289_v12 = vpop.f32.mrf.mxu0 }
 0x104   :  { %v4162_v13 = vpop.f32.mrf.mxu0 }
 0x106   :  { %v294_v16 = vpop.f32.mrf.mxu0 }
 0x108   :  { %v4168_v17 = vpop.f32.mrf.mxu0 }
 0x10a   :  { %v299_v20 = vpop.f32.mrf.mxu0 }
 0x10c   :  { %v4172_v21 = vpop.f32.mrf.mxu0 }
 0x10e   :  { %v304_v23 = vpop.f32.mrf.mxu0 }
 0x10f   :  { %v613_v23 = vpop.permute.xlu1 %612 }
 0x110   :  { %v4174_v24 = vpop.f32.mrf.mxu0  ;;  %705 = vperm.xlu1 %3470, %v613_v23   ;;  %v459_v23 = vld [vmem:[%s6239_s4 + $0x68] sm:$0xff] }
 0x112   :  { %v309_v27 = vpop.f32.mrf.mxu0 }
 0x113   :  { %v617_v33 = vpop.permute.xlu1 %616 }
 0x114   :  { %v4176_v28 = vpop.f32.mrf.mxu0  ;;  %708 = vperm.xlu1 %3470, %v615_v29  }
 0x116   :  { %v314_v26 = vpop.f32.mrf.mxu0 }
 0x117   :  { %v621_v29 = vpop.permute.xlu1 %620 }
 0x118   :  { %v4178_v31 = vpop.f32.mrf.mxu0  ;;  %711 = vperm.xlu1 %3470, %v617_v33  }
 0x11a   :  { %v319_v34 = vpop.f32.mrf.mxu0 }
 0x11c   :  { %v4182_v35 = vpop.f32.mrf.mxu0  ;;  %714 = vperm.xlu1 %3470, %v619_v42   ;;  %v458_v42 = vld [vmem:[%s6239_s4 + $0x60] sm:$0xff] }
 0x11e   :  { %v324_v38 = vpop.f32.mrf.mxu0 }
 0x11f   :  { %v461_v38 = vld [vmem:[%s6239_s4 + $0x78] sm:$0xff] }
 0x120   :  { %v4193_v40 = vpop.f32.mrf.mxu0  ;;  %717 = vperm.xlu1 %3470, %v621_v29  }
 0x122   :  { %v329_v43 = vpop.f32.mrf.mxu0 }
 0x123   :  { %v4201_v43 = vstv %s478_s2 }
 0x124   :  { %v4196_v44 = vpop.f32.mrf.mxu0  ;;  %v495_v19 = vmul.f32 %v4201_v43, %v461_v38 }
 0x126   :  { %v334_v12 = vpop.f32.mrf.mxu0 }
 0x128   :  { %v337_v16 = vpop.f32.mrf.mxu0 }
 0x12a   :  { %v339_v20 = vpop.f32.mrf.mxu0 }
 0x12b   :  { %v4207_v20 = vstv %s3074_s17 }
 0x12c   :  { %v342_v22 = vpop.f32.mrf.mxu0 }
 0x12e   :  { %v344_v25 = vpop.f32.mrf.mxu0 }
 0x130   :  { %v347_v27 = vpop.f32.mrf.mxu0 }
 0x132   :  { %v349_v30 = vpop.f32.mrf.mxu0 }
 0x133   :  { %v494_v30 = vmul.f32 %v4201_v43, %v460_v41  ;;  %v457_v41 = vld [vmem:[%s6239_s4 + $0x58] sm:$0xff] }
 0x134   :  { %v352_v26 = vpop.f32.mrf.mxu0 }
 0x135   :  { %v527_v39 = vmul.f32 %v4207_v20, %v352_v26  ;;  %v456_v26 = vld [vmem:[%s6239_s4 + $0x50] sm:$0xff] }
 0x136   :  { %v354_v34 = vpop.f32.mrf.mxu0 }
 0x138   :  { %v357_v37 = vpop.f32.mrf.mxu0 }
 0x139   :  { %v528_v33 = vmul.f32 %v4207_v20, %v357_v37  ;;  %v492_v37 = vmul.f32 %v4201_v43, %v458_v42  ;;  %v525_v42 = vmul.f32 %v4207_v20, %v342_v22  ;;  %v524_v22 = vmul.f32 %v4207_v20, %v337_v16 }
 0x13a   :  { %v359_v12 = vpop.f32.mrf.mxu0  ;;  %v523_v16 = vmul.f32 %v4207_v20, %v4196_v44  ;;  %v522_v44 = vmul.f32 %v4207_v20, %v4193_v40  ;;  %v521_v40 = vmul.f32 %v4207_v20, %v4182_v35  ;;  %v520_v35 = vmul.f32 %v4207_v20, %v4178_v31 }
 0x13b   :  { %v493_v12 = vmul.f32 %v4201_v43, %v459_v23  ;;  %v4229_v29 = vadd.f32 %v528_v33, %v494_v30  ;;  %v6286_v23 = vmov 0.0   ;;  %v455_v30 = vld [vmem:[%s6239_s4 + $0x48] sm:$0xff]  ;;  %v519_v31 = vmul.f32 %v4207_v20, %v4176_v28 }
 0x13c   :  { %v362_v25 = vpop.f32.mrf.mxu0  ;;  %v518_v28 = vmul.f32 %v4207_v20, %v4174_v24  ;;  %v517_v24 = vmul.f32 %v4207_v20, %v4172_v21  ;;  %v516_v21 = vmul.f32 %v4207_v20, %v4168_v17  ;;  %v515_v17 = vmul.f32 %v4207_v20, %v4162_v13 }
 0x13d   :  { %v529_v34 = vmul.f32 %v4207_v20, %v362_v25  ;;  %v526_v25 = vmul.f32 %v4207_v20, %v347_v27  ;;  %v4240_v27 = vadd.f32 %v527_v39, %v493_v12  ;;  %v454_v12 = vld [vmem:[%s6239_s4 + $0x40] sm:$0xff] }
 0x13e   :  { %v364_v38 = vpop.f32.mrf.mxu0 }
 0x13f   :  { %v4220_v1 = vadd.f32 %v529_v34, %v495_v19  ;;  %v491_v34 = vmul.f32 %v4201_v43, %v457_v41  ;;  %v490_v38 = vmul.f32 %v4201_v43, %v456_v26  ;;  %v4253_v39 = vadd.f32 %v526_v25, %v492_v37  ;;  %v453_v25 = vld [vmem:[%s6239_s4 + $0x38] sm:$0xff] }
 0x140   :  { %v4225_v4 = vpop.f32.mrf.mxu0 }
 0x141   :  { %1014 = vmatpush1.msra.mxu0 %v4220_v1  ;;  %3425 = vmatpush1.msra.mxu1 %v4220_v1  ;;  %v4265_v37 = vadd.f32 %v525_v42, %v491_v34  ;;  %v4279_v34 = vadd.f32 %v524_v22, %v490_v38  ;;  %v452_v42 = vld [vmem:[%s6239_s4 + $0x30] sm:$0xff]  ;;  %v451_v22 = vld [vmem:[%s6239_s4 + $0x28] sm:$0xff] }
 0x142   :  { %v369_v19 = vpop.f32.mrf.mxu0  ;;  %1015 = vmatprep.subr.mxu0 %v6286_v23  ;;  %3394 = vmatprep.subr.mxu1 %v6286_v23 }
 0x143   :  { %1016 = vmatpush1.msra.mxu0 %v4229_v29  ;;  %3426 = vmatpush1.msra.mxu1 %v4229_v29  ;;  %v489_v19 = vmul.f32 %v4201_v43, %v455_v30  ;;  %v488_v30 = vmul.f32 %v4201_v43, %v454_v12  ;;  %v487_v12 = vmul.f32 %v4201_v43, %v453_v25 }
 0x144   :  { %v4247_v33 = vpop.f32.mrf.mxu0  ;;  %1017 = vmatprep.subr.mxu0 %v6286_v23  ;;  %3395 = vmatprep.subr.mxu1 %v6286_v23  ;;  %v486_v25 = vmul.f32 %v4201_v43, %v452_v42  ;;  %v485_v42 = vmul.f32 %v4201_v43, %v451_v22 }
 0x145   :  { %1018 = vmatpush1.msra.mxu0 %v4240_v27  ;;  %3427 = vmatpush1.msra.mxu1 %v4240_v27  ;;  %v4291_v38 = vadd.f32 %v523_v16, %v489_v19  ;;  %v4305_v19 = vadd.f32 %v522_v44, %v488_v30  ;;  %v450_v16 = vld [vmem:[%s6239_s4 + $0x20] sm:$0xff]  ;;  %v4317_v30 = vadd.f32 %v521_v40, %v487_v12  ;;  %v449_v44 = vld [vmem:[%s6239_s4 + $0x18] sm:$0xff]  ;;  %v448_v40 = vld [vmem:[%s6239_s4 + $0x10] sm:$0xff] }
 0x146   :  { %v374_v41 = vpop.f32.mrf.mxu0  ;;  %1019 = vmatprep.subr.mxu0 %v6286_v23  ;;  %3396 = vmatprep.subr.mxu1 %v6286_v23  ;;  %v484_v22 = vmul.f32 %v4201_v43, %v450_v16  ;;  %v4331_v12 = vadd.f32 %v520_v35, %v486_v25  ;;  %v483_v16 = vmul.f32 %v4201_v43, %v449_v44  ;;  %v447_v35 = vld [vmem:[%s6239_s4 + $0x8] sm:$0xff] }
 0x147   :  { %1020 = vmatpush1.msra.mxu0 %v4253_v39  ;;  %3428 = vmatpush1.msra.mxu1 %v4253_v39  ;;  %6287 = vst [vmem:[#allocation14_spill] sm:$0xff] %v4317_v30  ;;  %v4343_v25 = vadd.f32 %v519_v31, %v485_v42  ;;  %v482_v44 = vmul.f32 %v4201_v43, %v448_v40  ;;  %v446_v31 = vld [vmem:[%s6239_s4] sm:$0xff] }
 0x148   :  { %v4272_v26 = vpop.f32.mrf.mxu0  ;;  %1021 = vmatprep.subr.mxu0 %v6286_v23  ;;  %3397 = vmatprep.subr.mxu1 %v6286_v23  ;;  %6288 = vst [vmem:[#allocation15_spill] sm:$0xff] %v4331_v12  ;;  %v4357_v42 = vadd.f32 %v518_v28, %v484_v22  ;;  %v481_v40 = vmul.f32 %v4201_v43, %v447_v35 }
 0x149   :  { %1022 = vmatpush1.msra.mxu0 %v4265_v37  ;;  %3429 = vmatpush1.msra.mxu1 %v4265_v37  ;;  %6289 = vst [vmem:[#allocation16_spill] sm:$0xff] %v4343_v25  ;;  %v4369_v22 = vadd.f32 %v517_v24, %v483_v16  ;;  %v514_v35 = vmul.f32 %v4207_v20, %v4158_v10  ;;  %v623_v10 = vpop.permute.xlu0 %622 }
 0x14a   :  { %v379_v41 = vpop.f32.mrf.mxu0  ;;  %1023 = vmatprep.subr.mxu0 %v6286_v23  ;;  %3398 = vmatprep.subr.mxu1 %v6286_v23  ;;  %6290 = vst [vmem:[#allocation17_spill] sm:$0xff] %v4357_v42  ;;  %v4386_v16 = vadd.f32 %v515_v17, %v481_v40 }
 0x14b   :  { %1024 = vmatpush1.msra.mxu0 %v4279_v34  ;;  %3430 = vmatpush1.msra.mxu1 %v4279_v34  ;;  %6291 = vst [vmem:[#allocation18_spill] sm:$0xff] %v4369_v22 }
 0x14c   :  { %v4298_v41 = vpop.f32.mrf.mxu0  ;;  %1025 = vmatprep.subr.mxu0 %v6286_v23  ;;  %3399 = vmatprep.subr.mxu1 %v6286_v23  ;;  %6293 = vst [vmem:[#allocation20_spill] sm:$0xff] %v4386_v16 }
 0x14d   :  { %1026 = vmatpush1.msra.mxu0 %v4291_v38  ;;  %3431 = vmatpush1.msra.mxu1 %v4291_v38  ;;  %v625_v17 = vpop.permute.xlu0 %624 }
 0x14e   :  { %v384_v0 = vpop.f32.mrf.mxu0  ;;  %1027 = vmatprep.subr.mxu0 %v6286_v23  ;;  %3400 = vmatprep.subr.mxu1 %v6286_v23 }
 0x14f   :  { %1028 = vmatpush1.msra.mxu0 %v4305_v19  ;;  %3432 = vmatpush1.msra.mxu1 %v4305_v19  ;;  %v4689_v45 = vpop.permute.xlu1 %678 }
 0x150   :  { %v4324_v0 = vpop.f32.mrf.mxu0  ;;  %1029 = vmatprep.subr.mxu0 %v6286_v23  ;;  %3401 = vmatprep.subr.mxu1 %v6286_v23 }
 0x151   :  { %1030 = vmatpush1.msra.mxu0 %v4317_v30  ;;  %3433 = vmatpush1.msra.mxu1 %v4317_v30 }
 0x152   :  { %v389_v2 = vpop.f32.mrf.mxu0  ;;  %1031 = vmatprep.subr.mxu0 %v6286_v23  ;;  %3402 = vmatprep.subr.mxu1 %v6286_v23 }
 0x153   :  { %1032 = vmatpush1.msra.mxu0 %v4331_v12  ;;  %3434 = vmatpush1.msra.mxu1 %v4331_v12 }
 0x154   :  { %v4350_v2 = vpop.f32.mrf.mxu0  ;;  %1033 = vmatprep.subr.mxu0 %v6286_v23  ;;  %3403 = vmatprep.subr.mxu1 %v6286_v23 }
 0x155   :  { %1034 = vmatpush1.msra.mxu0 %v4343_v25  ;;  %3435 = vmatpush1.msra.mxu1 %v4343_v25  ;;  %v4380_v25 = vadd.f32 %v516_v21, %v482_v44  ;;  %v4714_v49 = vpop.permute.xlu1 %681 }
 0x156   :  { %v394_v62 = vpop.f32.mrf.mxu0  ;;  %1035 = vmatprep.subr.mxu0 %v6286_v23  ;;  %3404 = vmatprep.subr.mxu1 %v6286_v23 }
 0x157   :  { %1036 = vmatpush1.msra.mxu0 %v4357_v42  ;;  %3436 = vmatpush1.msra.mxu1 %v4357_v42  ;;  %v480_v62 = vmul.f32 %v4201_v43, %v446_v31  ;;  %6292 = vst [vmem:[#allocation19_spill] sm:$0xff] %v4380_v25 }
 0x158   :  { %v4373_v28 = vpop.f32.mrf.mxu0  ;;  %1037 = vmatprep.subr.mxu0 %v6286_v23  ;;  %3405 = vmatprep.subr.mxu1 %v6286_v23 }
 0x159   :  { %1038 = vmatpush1.msra.mxu0 %v4369_v22  ;;  %3437 = vmatpush1.msra.mxu1 %v4369_v22  ;;  %v4394_v44 = vadd.f32 %v514_v35, %v480_v62 }
 0x15a   :  { %v399_v13 = vpop.f32.mrf.mxu0  ;;  %1039 = vmatprep.subr.mxu0 %v6286_v23  ;;  %3406 = vmatprep.subr.mxu1 %v6286_v23 }
 0x15b   :  { %1040 = vmatpush1.msra.mxu0 %v4380_v25  ;;  %3438 = vmatpush1.msra.mxu1 %v4380_v25  ;;  %6294 = vst [vmem:[#allocation21_spill] sm:$0xff] %v4394_v44 }
 0x15c   :  { %v4390_v24 = vpop.f32.mrf.mxu0  ;;  %1041 = vmatprep.subr.mxu0 %v6286_v23  ;;  %3407 = vmatprep.subr.mxu1 %v6286_v23 }
 0x15d   :  { %1042 = vmatpush1.msra.mxu0 %v4386_v16  ;;  %3439 = vmatpush1.msra.mxu1 %v4386_v16 }
 0x15e   :  { %v404_v21 = vpop.f32.mrf.mxu0  ;;  %1043 = vmatprep.subr.mxu0 %v6286_v23  ;;  %3408 = vmatprep.subr.mxu1 %v6286_v23 }
 0x15f   :  { %1044 = vmatpush1.msra.mxu0 %v4394_v44  ;;  %3440 = vmatpush1.msra.mxu1 %v4394_v44 }
 0x160   :  { %v4402_v31 = vpop.f32.mrf.mxu0  ;;  %1045 = vmatprep.subr.mxu0 %v6286_v23  ;;  %3409 = vmatprep.subr.mxu1 %v6286_v23 }
 0x161   :  { %720 = vperm.xlu1 %3470, %v623_v10   ;;  %v476_v10 = vld [vmem:[%s6239_s4 + $0xf0] sm:$0xff] }
 0x162   :  { %v409_v40 = vpop.f32.mrf.mxu0 }
 0x164   :  { %v412_v62 = vpop.f32.mrf.mxu0 }
 0x165   :  { %723 = vperm.xlu1 %3470, %v625_v17   ;;  %v511_v17 = vmul.f32 %v4201_v43, %v477_v60 }
 0x166   :  { %v414_v35 = vpop.f32.mrf.mxu0 }
 0x168   :  { %v417_v13 = vpop.f32.mrf.mxu0 }
 0x16a   :  { %v419_v21 = vpop.f32.mrf.mxu0 }
 0x16c   :  { %v422_v16 = vpop.f32.mrf.mxu0 }
 0x16e   :  { %v424_v25 = vpop.f32.mrf.mxu0 }
 0x16f   :  { %v475_v25 = vld [vmem:[%s6239_s4 + $0xe8] sm:$0xff] }
 0x170   :  { %v427_v22 = vpop.f32.mrf.mxu0 }
 0x172   :  { %v429_v42 = vpop.f32.mrf.mxu0 }
 0x173   :  { %v510_v42 = vmul.f32 %v4201_v43, %v476_v10  ;;  %v508_v10 = vmul.f32 %v4201_v43, %v474_v61  ;;  %v541_v61 = vmul.f32 %v4207_v20, %v422_v16  ;;  %v470_v16 = vld [vmem:[%s6239_s4 + $0xc0] sm:$0xff] }
 0x174   :  { %v432_v63 = vpop.f32.mrf.mxu0 }
 0x175   :  { %v543_v60 = vmul.f32 %v4207_v20, %v432_v63  ;;  %v472_v63 = vld [vmem:[%s6239_s4 + $0xd0] sm:$0xff] }
 0x176   :  { %v434_v44 = vpop.f32.mrf.mxu0 }
 0x178   :  { %v437_v12 = vpop.f32.mrf.mxu0 }
 0x179   :  { %v544_v44 = vmul.f32 %v4207_v20, %v437_v12  ;;  %v542_v12 = vmul.f32 %v4207_v20, %v427_v22  ;;  %v471_v22 = vld [vmem:[%s6239_s4 + $0xc8] sm:$0xff] }
 0x17a   :  { %v439_v40 = vpop.f32.mrf.mxu0 }
 0x17b   :  { %v509_v40 = vmul.f32 %v4201_v43, %v475_v25  ;;  %v506_v25 = vmul.f32 %v4201_v43, %v472_v63 }
 0x17c   :  { %v442_v35 = vpop.f32.mrf.mxu0 }
 0x17d   :  { %v545_v21 = vmul.f32 %v4207_v20, %v442_v35  ;;  %v4431_v35 = vadd.f32 %v544_v44, %v510_v42  ;;  %v4453_v42 = vadd.f32 %v542_v12, %v508_v10  ;;  %v505_v44 = vmul.f32 %v4201_v43, %v471_v22  ;;  %v468_v12 = vld [vmem:[%s6239_s4 + $0xb0] sm:$0xff] }
 0x17e   :  { %v444_v30 = vpop.f32.mrf.mxu0  ;;  %v538_v10 = vmul.f32 %v4207_v20, %v4402_v31  ;;  %v502_v22 = vmul.f32 %v4201_v43, %v468_v12 }
 0x17f   :  { %v4424_v18 = vadd.f32 %v545_v21, %v511_v17  ;;  %v507_v30 = vmul.f32 %v4201_v43, %v473_v58  ;;  %v4442_v17 = vadd.f32 %v543_v60, %v509_v40  ;;  %v540_v58 = vmul.f32 %v4207_v20, %v417_v13  ;;  %v469_v13 = vld [vmem:[%s6239_s4 + $0xb8] sm:$0xff] }
 0x180   :  { %v539_v21 = vmul.f32 %v4207_v20, %v412_v62  ;;  %v504_v60 = vmul.f32 %v4201_v43, %v470_v16  ;;  %v503_v63 = vmul.f32 %v4201_v43, %v469_v13 }
 0x181   :  { %1046 = vmatpush2.msra.mxu0 %v4424_v18  ;;  %3441 = vmatpush2.msra.mxu1 %v4424_v18  ;;  %v4464_v40 = vadd.f32 %v541_v61, %v507_v30  ;;  %v4476_v62 = vadd.f32 %v540_v58, %v506_v25  ;;  %v537_v30 = vmul.f32 %v4207_v20, %v4390_v24  ;;  %v467_v61 = vld [vmem:[%s6239_s4 + $0xa8] sm:$0xff]  ;;  %v466_v58 = vld [vmem:[%s6239_s4 + $0xa0] sm:$0xff] }
 0x182   :  { %1047 = vmatprep.subr.mxu0 %v6286_v23  ;;  %3410 = vmatprep.subr.mxu1 %v6286_v23  ;;  %v4488_v31 = vadd.f32 %v539_v21, %v505_v44  ;;  %v536_v25 = vmul.f32 %v4207_v20, %v4373_v28  ;;  %v4500_v24 = vadd.f32 %v538_v10, %v504_v60  ;;  %v465_v21 = vld [vmem:[%s6239_s4 + $0x98] sm:$0xff]  ;;  %v464_v10 = vld [vmem:[%s6239_s4 + $0x90] sm:$0xff] }
 0x183   :  { %1048 = vmatpush2.msra.mxu0 %v4431_v35  ;;  %3442 = vmatpush2.msra.mxu1 %v4431_v35  ;;  %v501_v16 = vmul.f32 %v4201_v43, %v467_v61  ;;  %v535_v44 = vmul.f32 %v4207_v20, %v4350_v2  ;;  %v4512_v28 = vadd.f32 %v537_v30, %v503_v63  ;;  %v463_v30 = vld [vmem:[%s6239_s4 + $0x88] sm:$0xff] }
 0x184   :  { %1049 = vmatprep.subr.mxu0 %v6286_v23  ;;  %3411 = vmatprep.subr.mxu1 %v6286_v23  ;;  %v500_v13 = vmul.f32 %v4201_v43, %v466_v58  ;;  %v534_v60 = vmul.f32 %v4207_v20, %v4324_v0  ;;  %v4524_v2 = vadd.f32 %v536_v25, %v502_v22  ;;  %v462_v25 = vld [vmem:[%s6239_s4 + $0x80] sm:$0xff] }
 0x185   :  { %1050 = vmatpush2.msra.mxu0 %v4442_v17  ;;  %3443 = vmatpush2.msra.mxu1 %v4442_v17  ;;  %v499_v12 = vmul.f32 %v4201_v43, %v465_v21  ;;  %v533_v63 = vmul.f32 %v4207_v20, %v4298_v41  ;;  %v4536_v0 = vadd.f32 %v535_v44, %v501_v16 }
 0x186   :  { %1051 = vmatprep.subr.mxu0 %v6286_v23  ;;  %3412 = vmatprep.subr.mxu1 %v6286_v23  ;;  %v498_v61 = vmul.f32 %v4201_v43, %v464_v10  ;;  %v532_v22 = vmul.f32 %v4207_v20, %v4272_v26  ;;  %v4548_v41 = vadd.f32 %v534_v60, %v500_v13  ;;  %v6310_v60 = vld [vmem:[#allocation19_spill] sm:$0xff]  ;;  %v6312_v10 = vld [vmem:[#allocation21_spill] sm:$0xff] }
 0x187   :  { %1052 = vmatpush2.msra.mxu0 %v4453_v42  ;;  %3444 = vmatpush2.msra.mxu1 %v4453_v42  ;;  %v497_v58 = vmul.f32 %v4201_v43, %v463_v30  ;;  %v531_v16 = vmul.f32 %v4207_v20, %v4247_v33  ;;  %v4560_v26 = vadd.f32 %v533_v63, %v499_v12 }
 0x188   :  { %1053 = vmatprep.subr.mxu0 %v6286_v23  ;;  %3413 = vmatprep.subr.mxu1 %v6286_v23  ;;  %v496_v44 = vmul.f32 %v4201_v43, %v462_v25  ;;  %v530_v21 = vmul.f32 %v4207_v20, %v4225_v4  ;;  %v4569_v13 = vadd.f32 %v532_v22, %v498_v61  ;;  %v1239_v43 = vld [vmem:[%s6240_s5 + $0x8] sm:$0xff]  ;;  %v6303_v20 = vld [vmem:[#allocation8_spill] sm:$0xff]  ;;  %s3589_s5 = smov 32  }
 0x189   :  { %1054 = vmatpush2.msra.mxu0 %v4464_v40  ;;  %3445 = vmatpush2.msra.mxu1 %v4464_v40  ;;  %v4575_v33 = vadd.f32 %v531_v16, %v497_v58 }
 0x18a   :  { %1055 = vmatprep.subr.mxu0 %v6286_v23  ;;  %3414 = vmatprep.subr.mxu1 %v6286_v23  ;;  %v4581_v4 = vadd.f32 %v530_v21, %v496_v44 }
 0x18b   :  { %1056 = vmatpush2.msra.mxu0 %v4476_v62  ;;  %3446 = vmatpush2.msra.mxu1 %v4476_v62 }
 0x18c   :  { %1057 = vmatprep.subr.mxu0 %v6286_v23  ;;  %3415 = vmatprep.subr.mxu1 %v6286_v23 }
 0x18d   :  { %1058 = vmatpush2.msra.mxu0 %v4488_v31  ;;  %3447 = vmatpush2.msra.mxu1 %v4488_v31 }
 0x18e   :  { %1059 = vmatprep.subr.mxu0 %v6286_v23  ;;  %3416 = vmatprep.subr.mxu1 %v6286_v23 }
 0x18f   :  { %1060 = vmatpush2.msra.mxu0 %v4500_v24  ;;  %3448 = vmatpush2.msra.mxu1 %v4500_v24 }
 0x190   :  { %1061 = vmatprep.subr.mxu0 %v6286_v23  ;;  %3417 = vmatprep.subr.mxu1 %v6286_v23 }
 0x191   :  { %1062 = vmatpush2.msra.mxu0 %v4512_v28  ;;  %3449 = vmatpush2.msra.mxu1 %v4512_v28 }
 0x192   :  { %1063 = vmatprep.subr.mxu0 %v6286_v23  ;;  %3418 = vmatprep.subr.mxu1 %v6286_v23 }
 0x193   :  { %1064 = vmatpush2.msra.mxu0 %v4524_v2  ;;  %3450 = vmatpush2.msra.mxu1 %v4524_v2 }
 0x194   :  { %1065 = vmatprep.subr.mxu0 %v6286_v23  ;;  %3419 = vmatprep.subr.mxu1 %v6286_v23 }
 0x195   :  { %1066 = vmatpush2.msra.mxu0 %v4536_v0  ;;  %3451 = vmatpush2.msra.mxu1 %v4536_v0 }
 0x196   :  { %1067 = vmatprep.subr.mxu0 %v6286_v23  ;;  %3420 = vmatprep.subr.mxu1 %v6286_v23 }
 0x197   :  { %1068 = vmatpush2.msra.mxu0 %v4548_v41  ;;  %3452 = vmatpush2.msra.mxu1 %v4548_v41 }
 0x198   :  { %1069 = vmatprep.subr.mxu0 %v6286_v23  ;;  %3421 = vmatprep.subr.mxu1 %v6286_v23 }
 0x199   :  { %1070 = vmatpush2.msra.mxu0 %v4560_v26  ;;  %3453 = vmatpush2.msra.mxu1 %v4560_v26 }
 0x19a   :  { %1071 = vmatprep.subr.mxu0 %v6286_v23  ;;  %3422 = vmatprep.subr.mxu1 %v6286_v23 }
 0x19b   :  { %1072 = vmatpush2.msra.mxu0 %v4569_v13  ;;  %3454 = vmatpush2.msra.mxu1 %v4569_v13 }
 0x19c   :  { %1073 = vmatprep.subr.mxu0 %v6286_v23  ;;  %3423 = vmatprep.subr.mxu1 %v6286_v23 }
 0x19d   :  { %1074 = vmatpush2.msra.mxu0 %v4575_v33  ;;  %3455 = vmatpush2.msra.mxu1 %v4575_v33 }
 0x19e   :  { %1075 = vmatprep.subr.mxu0 %v6286_v23  ;;  %3424 = vmatprep.subr.mxu1 %v6286_v23 }
 0x19f   :  { %1076 = vmatpush2.msra.mxu0 %v4581_v4  ;;  %3456 = vmatpush2.msra.mxu1 %v4581_v4 }
 0x1a0   :  { %3156 = vmatmul.mubr.msk.f32.vlgmr.msra.gmra.mxu0 %vm725_vm3, %v6295_v47  ;;  %3301 = vmatprep.subr.msk.mxu1 %vm124_vm0, %v4424_v18  ;;  %vm746_vm3 = vcmp.eq.s32.totalorder %v4185_v36, %v4154_v8 }
 0x1a1   :  { %3168 = vmatmul.mubr.msk.f32.vlgmr.msra.gmra.mxu1 %vm737_vm4, %v6295_v47  ;;  %3157 = vmatprep.mubr.msk.f32.mxu0 %vm728_vm5, %v6295_v47  ;;  %vm965_vm4 = vcmp.eq.s32.totalorder %v4180_v32, %v4118_v53  ;;  %vm733_vm5 = vcmp.eq.s32.totalorder %v4180_v32, %v4114_v51 }
 0x1a2   :  { %3302 = vmatpush3.xpose.msk.msra.mxu1 %vm124_vm0, %v4220_v1  ;;  %3365 = vmatprep.subr.mxu0 %v1239_v43  ;;  %v3139_v1 = vsel %vm965_vm4, 1.0, %v6286_v23  ;;  %vm970_vm4 = vcmp.eq.s32.totalorder %v4180_v32, %v4126_v57  ;;  %v6298_v57 = vld [vmem:[#allocation14_spill] sm:$0xff] }
 0x1a3   :  { %3303 = vmatprep.subr.msk.mxu1 %vm124_vm0, %v4431_v35  ;;  %3366 = vmatpush3.msra.mxu0 %v1239_v43  ;;  %v3144_v53 = vsel %vm970_vm4, 1.0, %v6286_v23  ;;  %vm977_vm4 = vcmp.eq.s32.totalorder %v4180_v32, %v6303_v20 }
 0x1a4   :  { %3158 = vmatmul.mubr.msk.f32.gmra.mxu0 %vm727_vm8, %v6295_v47  ;;  %3367 = vmatprep.subr.mxu0 %v1238_v3  ;;  %vm748_vm8 = vcmp.eq.s32.totalorder %v4185_v36, %v4156_v9 }
 0x1a5   :  { %3159 = vmatprep.mubr.msk.f32.mxu0 %vm730_vm6, %v6295_v47  ;;  %3169 = vmatprep.mubr.msk.f32.mxu1 %vm740_vm7, %v6295_v47  ;;  %vm736_vm6 = vcmp.eq.s32.totalorder %v4185_v36, %v4108_v48  ;;  %vm745_vm7 = vcmp.eq.s32.totalorder %v4180_v32, %v4154_v8  ;;  %v6300_v8 = vld [vmem:[#allocation6_spill] sm:$0xff] }
 0x1a6   :  { %3304 = vmatpush3.xpose.msk.msra.mxu1 %vm124_vm0, %v4229_v29  ;;  %3368 = vmatpush3.msra.mxu0 %v1238_v3  ;;  %v6304_v29 = vld [vmem:[#allocation16_spill] sm:$0xff] }
 0x1a7   :  { %3305 = vmatprep.subr.msk.mxu1 %vm124_vm0, %v4442_v17  ;;  %3170 = vmatmul.mubr.msk.f32.gmra.mxu1 %vm739_vm9, %v6295_v47  ;;  %vm966_vm9 = vcmp.eq.s32.totalorder %v4180_v32, %v4112_v50 }
 0x1a8   :  { %3160 = vmatmul.mubr.msk.f32.gmra.mxu0 %vm729_vm10, %v6295_v47  ;;  %3171 = vmatprep.mubr.msk.f32.mxu1 %vm742_vm11, %v6295_v47  ;;  %vm1240_vm10 = vcmask 130048   ;;  %vm967_vm11 = vcmp.eq.s32.totalorder %v4180_v32, %v4116_v52  ;;  %v3140_v46 = vsel %vm966_vm9, 1.0, %v6286_v23  ;;  %v4734_v52 = vpop.permute.xlu1 %687  ;;  %vm753_vm9 = vcmp.eq.s32.totalorder %v4180_v32, %v4166_v15 }
 0x1a9   :  { %3161 = vmatprep.mubr.msk.f32.mxu0 %vm732_vm12, %v6295_v47  ;;  %vm735_vm12 = vcmp.eq.s32.totalorder %v4180_v32, %v4108_v48  ;;  %v3141_v48 = vsel %vm967_vm11, 1.0, %v6286_v23 }
 0x1aa   :  { %3306 = vmatpush3.xpose.msk.msra.mxu1 %vm124_vm0, %v4240_v27  ;;  %v685_v27 = vpop.permute.xlu0 %684 }
 0x1ab   :  { %3307 = vmatprep.subr.msk.mxu1 %vm124_vm0, %v4453_v42  ;;  %3172 = vmatmul.mubr.msk.f32.gmra.mxu1 %vm741_vm13, %v6295_v47  ;;  %vm747_vm13 = vcmp.eq.s32.totalorder %v4180_v32, %v4156_v9  ;;  %v6301_v9 = vld [vmem:[#allocation15_spill] sm:$0xff] }
 0x1ac   :  { %3162 = vmatmul.mubr.msk.f32.gmra.mxu0 %vm731_vm15, %v6295_v47  ;;  %3173 = vmatprep.mubr.msk.f32.mxu1 %vm744_vm14, %v6295_v47  ;;  %vm750_vm14 = vcmp.eq.s32.totalorder %v4185_v36, %v4160_v11  ;;  %vm968_vm15 = vcmp.eq.s32.totalorder %v4180_v32, %v4122_v55  ;;  %v6296_v55 = vld [vmem:[#allocation5_spill] sm:$0xff]  ;;  %v4754_v5 = vpop.permute.xlu1 %693 }
 0x1ad   :  { %3163 = vmatprep.mubr.msk.f32.mxu0 %vm734_vm1, %v6295_v47  ;;  %vm749_vm1 = vcmp.eq.s32.totalorder %v4180_v32, %v4160_v11  ;;  %v3142_v50 = vsel %vm968_vm15, 1.0, %v6286_v23  ;;  %vm973_vm11 = vcmp.eq.s32.totalorder %v4180_v32, %v6296_v55  ;;  %vm975_vm15 = vcmp.eq.s32.totalorder %v4180_v32, %v6300_v8 }
 0x1ae   :  { %3308 = vmatpush3.xpose.msk.msra.mxu1 %vm124_vm0, %v4253_v39  ;;  %v3147_v6 = vsel %vm973_vm11, 1.0, %v6286_v23 }
 0x1af   :  { %3309 = vmatprep.subr.msk.mxu1 %vm124_vm0, %v4464_v40  ;;  %3174 = vmatmul.mubr.msk.f32.gmra.mxu1 %vm743_vm2, %v6295_v47  ;;  %vm969_vm2 = vcmp.eq.s32.totalorder %v4180_v32, %v4120_v54  ;;  %v6308_v40 = vld [vmem:[#allocation12_spill] sm:$0xff] }
 0x1b0   :  { %3164 = vmatmul.mubr.msk.f32.gmra.mxu0 %vm733_vm5, %v6295_v47  ;;  %3175 = vmatprep.mubr.msk.f32.mxu1 %vm746_vm3, %v6295_v47  ;;  %vm752_vm3 = vcmp.eq.s32.totalorder %v4185_v36, %v4164_v14  ;;  %v3143_v51 = vsel %vm969_vm2, 1.0, %v6286_v23  ;;  %vm751_vm5 = vcmp.eq.s32.totalorder %v4180_v32, %v4164_v14  ;;  %v3149_v14 = vsel %vm975_vm15, 1.0, %v6286_v23  ;;  %v697_v18 = vpop.permute.xlu1 %696 }
 0x1b1   :  { %3165 = vmatprep.mubr.msk.f32.mxu0 %vm736_vm6, %v6295_v47  ;;  %vm971_vm6 = vcmp.eq.s32.totalorder %v4180_v32, %v4124_v56  ;;  %v6297_v56 = vld [vmem:[#allocation13_spill] sm:$0xff]  ;;  %vm980_vm11 = vcmp.eq.s32.totalorder %v4180_v32, %v6308_v40 }
 0x1b2   :  { %3310 = vmatpush3.xpose.msk.msra.mxu1 %vm124_vm0, %v4265_v37  ;;  %v3145_v54 = vsel %vm971_vm6, 1.0, %v6286_v23  ;;  %v3151_v37 = vsel %vm977_vm4, 1.0, %v6286_v23  ;;  %vm769_vm4 = vcmp.eq.s32.totalorder %v4180_v32, %v697_v18 }
 0x1b3   :  { %3311 = vmatprep.subr.msk.mxu1 %vm124_vm0, %v4476_v62  ;;  %3176 = vmatmul.mubr.msk.f32.gmra.mxu1 %vm745_vm7, %v6295_v47  ;;  %vm754_vm7 = vcmp.eq.s32.totalorder %v4185_v36, %v4166_v15  ;;  %v6302_v15 = vld [vmem:[#allocation9_spill] sm:$0xff]  ;;  %v6309_v62 = vld [vmem:[#allocation18_spill] sm:$0xff] }
 0x1b4   :  { %3166 = vmatmul.mubr.msk.f32.gmra.mxu0 %vm735_vm12, %v6295_v47  ;;  %3177 = vmatprep.mubr.msk.f32.mxu1 %vm748_vm8, %v6295_v47  ;;  %vm972_vm8 = vcmp.eq.s32.totalorder %v4180_v32, %v4130_v59  ;;  %vm756_vm12 = vcmp.eq.s32.totalorder %v4185_v36, %v6297_v56  ;;  %vm976_vm2 = vcmp.eq.s32.totalorder %v4180_v32, %v6302_v15  ;;  %v700_v35 = vpop.permute.xlu1 %699 }
 0x1b5   :  { %3369 = vmatprep.mubr.msk.f32.mxu0 %vm1240_vm10, %v3139_v1  ;;  %v3146_v59 = vsel %vm972_vm8, 1.0, %v6286_v23  ;;  %v3150_v39 = vsel %vm976_vm2, 1.0, %v6286_v23  ;;  %vm767_vm2 = vcmp.eq.s32.totalorder %v4180_v32, %v4754_v5 }
 0x1b6   :  { %3312 = vmatpush3.xpose.msk.msra.mxu1 %vm124_vm0, %v4279_v34  ;;  %v6305_v34 = vld [vmem:[#allocation11_spill] sm:$0xff] }
 0x1b7   :  { %3313 = vmatprep.subr.msk.mxu1 %vm124_vm0, %v4488_v31  ;;  %3178 = vmatmul.mubr.msk.f32.gmra.mxu1 %vm747_vm13, %v6295_v47  ;;  %vm974_vm13 = vcmp.eq.s32.totalorder %v4180_v32, %v6299_v7  ;;  %vm978_vm6 = vcmp.eq.s32.totalorder %v4180_v32, %v6305_v34  ;;  %v691_v31 = vpop.permute.xlu0 %690 }
 0x1b8   :  { %3370 = vmatmul.mubr.msk.f32.vlgmr.msra.gmra.mxu0 %vm1240_vm10, %v3140_v46  ;;  %3179 = vmatprep.mubr.msk.f32.mxu1 %vm750_vm14, %v6295_v47  ;;  %vm755_vm14 = vcmp.eq.s32.totalorder %v4180_v32, %v6297_v56  ;;  %v3148_v11 = vsel %vm974_vm13, 1.0, %v6286_v23  ;;  %v3152_v17 = vsel %vm978_vm6, 1.0, %v6286_v23  ;;  %vm764_vm13 = vcmp.eq.s32.totalorder %v4185_v36, %v4734_v52 }
 0x1b9   :  { %3372 = vmatprep.mubr.msk.f32.mxu0 %vm1240_vm10, %v3141_v48  ;;  %vm766_vm15 = vcmp.eq.s32.totalorder %v4185_v36, %v691_v31  ;;  %vm771_vm6 = vcmp.eq.s32.totalorder %v4180_v32, %v700_v35 }
 0x1ba   :  { %3314 = vmatpush3.xpose.msk.msra.mxu1 %vm124_vm0, %v4291_v38  ;;  %v6306_v38 = vld [vmem:[#allocation10_spill] sm:$0xff] }
 0x1bb   :  { %3315 = vmatprep.subr.msk.mxu1 %vm124_vm0, %v4500_v24  ;;  %3180 = vmatmul.mubr.msk.f32.gmra.mxu1 %vm749_vm1, %v6295_v47  ;;  %vm758_vm1 = vcmp.eq.s32.totalorder %v4185_v36, %v4689_v45  ;;  %vm979_vm8 = vcmp.eq.s32.totalorder %v4180_v32, %v6306_v38  ;;  %v3154_v24 = vsel %vm980_vm11, 1.0, %v6286_v23 }
 0x1bc   :  { %3373 = vmatmul.mubr.msk.f32.gmra.mxu0 %vm1240_vm10, %v3142_v50  ;;  %3181 = vmatprep.mubr.msk.f32.mxu1 %vm752_vm3, %v6295_v47  ;;  %vm757_vm3 = vcmp.eq.s32.totalorder %v4180_v32, %v4689_v45  ;;  %v3153_v42 = vsel %vm979_vm8, 1.0, %v6286_v23  ;;  %v6311_v23 = vld [vmem:[#allocation20_spill] sm:$0xff] }
 0x1bd   :  { %3375 = vmatprep.mubr.msk.f32.mxu0 %vm1240_vm10, %v3143_v51 }
 0x1be   :  { %3316 = vmatpush3.xpose.msk.msra.mxu1 %vm124_vm0, %v4305_v19  ;;  %v6307_v19 = vld [vmem:[#allocation17_spill] sm:$0xff] }
 0x1bf   :  { %3317 = vmatprep.subr.msk.mxu1 %vm124_vm0, %v4512_v28  ;;  %3182 = vmatmul.mubr.msk.f32.gmra.mxu1 %vm751_vm5, %v6295_v47  ;;  %vm760_vm5 = vcmp.eq.s32.totalorder %v4185_v36, %v4714_v49  ;;  %v703_v28 = vpop.permute.xlu1 %702 }
 0x1c0   :  { %3376 = vmatmul.mubr.msk.f32.gmra.mxu0 %vm1240_vm10, %v3144_v53  ;;  %3183 = vmatprep.mubr.msk.f32.mxu1 %vm754_vm7, %v6295_v47  ;;  %vm759_vm7 = vcmp.eq.s32.totalorder %v4180_v32, %v4714_v49  ;;  %vm773_vm8 = vcmp.eq.s32.totalorder %v4180_v32, %v703_v28 }
 0x1c1   :  { %3378 = vmatprep.mubr.msk.f32.mxu0 %vm1240_vm10, %v3145_v54 }
 0x1c2   :  { %3318 = vmatpush3.xpose.msk.msra.mxu1 %vm124_vm0, %v6298_v57 }
 0x1c3   :  { %3319 = vmatprep.subr.msk.mxu1 %vm124_vm0, %v4524_v2  ;;  %3184 = vmatmul.mubr.msk.f32.gmra.mxu1 %vm753_vm9, %v6295_v47  ;;  %vm762_vm9 = vcmp.eq.s32.totalorder %v4185_v36, %v685_v27  ;;  %v706_v2 = vpop.permute.xlu1 %705 }
 0x1c4   :  { %3379 = vmatmul.mubr.msk.f32.gmra.mxu0 %vm1240_vm10, %v3146_v59  ;;  %3185 = vmatprep.mubr.msk.f32.mxu1 %vm756_vm12, %v6295_v47  ;;  %vm761_vm12 = vcmp.eq.s32.totalorder %v4180_v32, %v685_v27  ;;  %vm775_vm11 = vcmp.eq.s32.totalorder %v4180_v32, %v706_v2 }
 0x1c5   :  { %3381 = vmatprep.mubr.msk.f32.mxu0 %vm1240_vm10, %v3147_v6 }
 0x1c6   :  { %3320 = vmatpush3.xpose.msk.msra.mxu1 %vm124_vm0, %v6301_v9 }
 0x1c7   :  { %3321 = vmatprep.subr.msk.mxu1 %vm124_vm0, %v4536_v0  ;;  %3186 = vmatmul.mubr.msk.f32.gmra.mxu1 %vm755_vm14, %v6295_v47  ;;  %vm763_vm14 = vcmp.eq.s32.totalorder %v4180_v32, %v4734_v52  ;;  %v709_v12 = vpop.permute.xlu1 %708 }
 0x1c8   :  { %3382 = vmatmul.mubr.msk.f32.gmra.mxu0 %vm1240_vm10, %v3148_v11  ;;  %3187 = vmatprep.mubr.msk.f32.mxu1 %vm758_vm1, %v6295_v47  ;;  %vm768_vm1 = vcmp.eq.s32.totalorder %v4185_v36, %v4754_v5 }
 0x1c9   :  { %3384 = vmatprep.mubr.msk.f32.mxu0 %vm1240_vm10, %v3149_v14 }
 0x1ca   :  { %3322 = vmatpush3.xpose.msk.msra.mxu1 %vm124_vm0, %v6304_v29 }
 0x1cb   :  { %3323 = vmatprep.subr.msk.mxu1 %vm124_vm0, %v4548_v41  ;;  %3188 = vmatmul.mubr.msk.f32.gmra.mxu1 %vm757_vm3, %v6295_v47  ;;  %vm770_vm3 = vcmp.eq.s32.totalorder %v4185_v36, %v697_v18  ;;  %v712_v63 = vpop.permute.xlu1 %711 }
 0x1cc   :  { %3385 = vmatmul.mubr.msk.f32.gmra.mxu0 %vm1240_vm10, %v3150_v39  ;;  %3189 = vmatprep.mubr.msk.f32.mxu1 %vm760_vm5, %v6295_v47  ;;  %vm772_vm5 = vcmp.eq.s32.totalorder %v4185_v36, %v700_v35 }
 0x1cd   :  { %3387 = vmatprep.mubr.msk.f32.mxu0 %vm1240_vm10, %v3151_v37 }
 0x1ce   :  { %3324 = vmatpush3.xpose.msk.msra.mxu1 %vm124_vm0, %v6307_v19 }
 0x1cf   :  { %3325 = vmatprep.subr.msk.mxu1 %vm124_vm0, %v4560_v26  ;;  %3190 = vmatmul.mubr.msk.f32.gmra.mxu1 %vm759_vm7, %v6295_v47  ;;  %vm774_vm7 = vcmp.eq.s32.totalorder %v4185_v36, %v703_v28  ;;  %v715_v0 = vpop.permute.xlu1 %714 }
 0x1d0   :  { %3388 = vmatmul.mubr.msk.f32.gmra.mxu0 %vm1240_vm10, %v3152_v17  ;;  %3191 = vmatprep.mubr.msk.f32.mxu1 %vm762_vm9, %v6295_v47  ;;  %vm776_vm9 = vcmp.eq.s32.totalorder %v4185_v36, %v706_v2 }
 0x1d1   :  { %3390 = vmatprep.mubr.msk.f32.mxu0 %vm1240_vm10, %v3153_v42 }
 0x1d2   :  { %3326 = vmatpush3.xpose.msk.msra.mxu1 %vm124_vm0, %v6309_v62 }
 0x1d3   :  { %3327 = vmatprep.subr.msk.mxu1 %vm124_vm0, %v4569_v13  ;;  %3192 = vmatmul.mubr.msk.f32.gmra.mxu1 %vm761_vm12, %v6295_v47  ;;  %vm778_vm12 = vcmp.eq.s32.totalorder %v4185_v36, %v709_v12  ;;  %v718_v30 = vpop.permute.xlu1 %717 }
 0x1d4   :  { %3391 = vmatmul.mubr.msk.f32.gmra.mxu0 %vm1240_vm10, %v3154_v24  ;;  %3193 = vmatprep.mubr.msk.f32.mxu1 %vm764_vm13, %v6295_v47  ;;  %vm765_vm10 = vcmp.eq.s32.totalorder %v4180_v32, %v691_v31  ;;  %vm777_vm13 = vcmp.eq.s32.totalorder %v4180_v32, %v709_v12 }
 0x1d6   :  { %3328 = vmatpush3.xpose.msk.msra.mxu1 %vm124_vm0, %v6310_v60 }
 0x1d7   :  { %3329 = vmatprep.subr.msk.mxu1 %vm124_vm0, %v4575_v33  ;;  %3194 = vmatmul.mubr.msk.f32.gmra.mxu1 %vm763_vm14, %v6295_v47  ;;  %vm780_vm14 = vcmp.eq.s32.totalorder %v4185_v36, %v712_v63 }
 0x1d8   :  { %3195 = vmatprep.mubr.msk.f32.mxu1 %vm766_vm15, %v6295_v47  ;;  %vm779_vm15 = vcmp.eq.s32.totalorder %v4180_v32, %v712_v63 }
 0x1da   :  { %3330 = vmatpush3.xpose.msk.msra.mxu1 %vm124_vm0, %v6311_v23 }
 0x1db   :  { %3331 = vmatprep.subr.msk.mxu1 %vm124_vm0, %v4581_v4  ;;  %3196 = vmatmul.mubr.msk.f32.gmra.mxu1 %vm765_vm10, %v6295_v47  ;;  %vm782_vm10 = vcmp.eq.s32.totalorder %v4185_v36, %v715_v0 }
 0x1dc   :  { %3197 = vmatprep.mubr.msk.f32.mxu1 %vm768_vm1, %v6295_v47  ;;  %vm781_vm1 = vcmp.eq.s32.totalorder %v4180_v32, %v715_v0  ;;  %v721_v61 = vpop.permute.xlu1 %720 }
 0x1de   :  { %3332 = vmatpush3.xpose.msk.msra.mxu1 %vm124_vm0, %v6312_v10 }
 0x1df   :  { %3198 = vmatmul.mubr.msk.f32.gmra.mxu1 %vm767_vm2, %v6295_v47  ;;  %vm784_vm2 = vcmp.eq.s32.totalorder %v4185_v36, %v718_v30 }
 0x1e0   :  { %3199 = vmatprep.mubr.msk.f32.mxu1 %vm770_vm3, %v6295_v47  ;;  %vm783_vm3 = vcmp.eq.s32.totalorder %v4180_v32, %v718_v30  ;;  %v724_v22 = vpop.permute.xlu1 %723 }
 0x1e3   :  { %3200 = vmatmul.mubr.msk.f32.gmra.mxu1 %vm769_vm4, %v6295_v47  ;;  %vm786_vm4 = vcmp.eq.s32.totalorder %v4185_v36, %v721_v61 }
 0x1e4   :  { %3201 = vmatprep.mubr.msk.f32.mxu1 %vm772_vm5, %v6295_v47  ;;  %vm785_vm5 = vcmp.eq.s32.totalorder %v4180_v32, %v721_v61 }
 0x1e7   :  { %3202 = vmatmul.mubr.msk.f32.gmra.mxu1 %vm771_vm6, %v6295_v47  ;;  %vm788_vm6 = vcmp.eq.s32.totalorder %v4185_v36, %v724_v22 }
 0x1e8   :  { %3203 = vmatprep.mubr.msk.f32.mxu1 %vm774_vm7, %v6295_v47  ;;  %vm787_vm7 = vcmp.eq.s32.totalorder %v4180_v32, %v724_v22 }
 0x1eb   :  { %3204 = vmatmul.mubr.msk.f32.gmra.mxu1 %vm773_vm8, %v6295_v47  ;;  %vm1818_vm8 = vcmask 261120  }
 0x1ec   :  { %3205 = vmatprep.mubr.msk.f32.mxu1 %vm776_vm9, %v6295_v47 }
 0x1ef   :  { %3206 = vmatmul.mubr.msk.f32.gmra.mxu1 %vm775_vm11, %v6295_v47 }
 0x1f0   :  { %3207 = vmatprep.mubr.msk.f32.mxu1 %vm778_vm12, %v6295_v47 }
 0x1f3   :  { %3208 = vmatmul.mubr.msk.f32.gmra.mxu1 %vm777_vm13, %v6295_v47 }
 0x1f4   :  { %3209 = vmatprep.mubr.msk.f32.mxu1 %vm780_vm14, %v6295_v47 }
 0x1f7   :  { %3210 = vmatmul.mubr.msk.f32.gmra.mxu1 %vm779_vm15, %v6295_v47 }
 0x1f8   :  { %3211 = vmatprep.mubr.msk.f32.mxu1 %vm782_vm10, %v6295_v47 }
 0x1fb   :  { %3212 = vmatmul.mubr.msk.f32.gmra.mxu1 %vm781_vm1, %v6295_v47 }
 0x1fc   :  { %3213 = vmatprep.mubr.msk.f32.mxu1 %vm784_vm2, %v6295_v47 }
 0x1ff   :  { %3214 = vmatmul.mubr.msk.f32.gmra.mxu1 %vm783_vm3, %v6295_v47 }
 0x200   :  { %3215 = vmatprep.mubr.msk.f32.mxu1 %vm786_vm4, %v6295_v47 }
 0x203   :  { %3216 = vmatmul.mubr.msk.f32.gmra.mxu1 %vm785_vm5, %v6295_v47 }
 0x204   :  { %3217 = vmatprep.mubr.msk.f32.mxu1 %vm788_vm6, %v6295_v47 }
 0x207   :  { %3218 = vmatmul.mubr.msk.f32.gmra.mxu1 %vm787_vm7, %v6295_v47 }
 0x260   :  { %v4893_v41 = vpop.f32.mrf.mxu0 }
 0x261   :  { %v4895_v25 = vpop.f32.mrf.mxu1 }
 0x262   :  { %v1081_v58 = vpop.f32.mrf.mxu0 }
 0x263   :  { %v1111_v16 = vpop.f32.mrf.mxu1 }
 0x264   :  { %v4897_v26 = vpop.f32.mrf.mxu0 }
 0x266   :  { %v1086_v44 = vpop.f32.mrf.mxu0 }
 0x267   :  { %v4899_v21 = vpop.f32.mrf.mxu1 }
 0x268   :  { %v4901_v36 = vpop.f32.mrf.mxu0 }
 0x269   :  { %v1116_v13 = vpop.f32.mrf.mxu1 }
 0x26a   :  { %v1091_v33 = vpop.f32.mrf.mxu0 }
 0x26b   :  { %v4903_v4 = vpop.f32.mrf.mxu1 }
 0x26c   :  { %v4905_v32 = vpop.f32.mrf.mxu0 }
 0x26d   :  { %v1121_v43 = vpop.f32.mrf.mxu1 }
 0x26e   :  { %v1096_v47 = vpop.f32.mrf.mxu0 }
 0x26f   :  { %v4907_v3 = vpop.f32.mrf.mxu1 }
 0x270   :  { %v4909_v1 = vpop.f32.mrf.mxu0 }
 0x271   :  { %v1126_v45 = vpop.f32.mrf.mxu1 }
 0x272   :  { %v1101_v46 = vpop.f32.mrf.mxu0 }
 0x273   :  { %v4911_v48 = vpop.f32.mrf.mxu1 }
 0x274   :  { %v4913_v49 = vpop.f32.mrf.mxu0 }
 0x275   :  { %v1131_v50 = vpop.f32.mrf.mxu1 }
 0x276   :  { %v1106_v51 = vpop.f32.mrf.mxu0 }
 0x277   :  { %v4915_v52 = vpop.f32.mrf.mxu1 }
 0x278   :  { %v4917_v53 = vpop.f32.mrf.mxu0 }
 0x279   :  { %v1136_v54 = vpop.f32.mrf.mxu1 }
 0x27a   :  { %v4919_v55 = vpop.f32.mrf.mxu0 }
 0x27b   :  { %1610 = vrot.lane.b32.xlu0 %v4919_v55, %s3589_s5  ;;  %v4923_v56 = vpop.f32.mrf.mxu1 }
 0x27c   :  { %v4925_v57 = vpop.f32.mrf.mxu0 }
 0x27d   :  { %v1141_v5 = vpop.f32.mrf.mxu1 }
 0x27e   :  { %v4927_v59 = vpop.f32.mrf.mxu0 }
 0x27f   :  { %1612 = vrot.lane.b32.xlu0 %v4917_v53, %s3589_s5  ;;  %v4931_v6 = vpop.f32.mrf.mxu1 }
 0x280   :  { %v4933_v7 = vpop.f32.mrf.mxu0 }
 0x281   :  { %v1146_v8 = vpop.f32.mrf.mxu1 }
 0x282   :  { %v4935_v9 = vpop.f32.mrf.mxu0 }
 0x283   :  { %1614 = vrot.lane.b32.xlu0 %v4927_v59, %s3589_s5  ;;  %v4939_v11 = vpop.f32.mrf.mxu1 }
 0x284   :  { %v4941_v14 = vpop.f32.mrf.mxu0 }
 0x285   :  { %v1151_v15 = vpop.f32.mrf.mxu1 }
 0x286   :  { %v4943_v18 = vpop.f32.mrf.mxu0 }
 0x287   :  { %1616 = vrot.lane.b32.xlu0 %v4925_v57, %s3589_s5  ;;  %v4947_v20 = vpop.f32.mrf.mxu1 }
 0x288   :  { %v4949_v29 = vpop.f32.mrf.mxu0 }
 0x289   :  { %v1156_v27 = vpop.f32.mrf.mxu1 }
 0x28a   :  { %v4951_v39 = vpop.f32.mrf.mxu0 }
 0x28b   :  { %1618 = vrot.lane.b32.xlu0 %v4935_v9, %s3589_s5  ;;  %v4955_v37 = vpop.f32.mrf.mxu1 }
 0x28c   :  { %v4957_v34 = vpop.f32.mrf.mxu0 }
 0x28d   :  { %1632 = vrot.lane.b32.xlu1 %v4957_v34, %s3589_s5  ;;  %v1161_v38 = vpop.f32.mrf.mxu1 }
 0x28e   :  { %v4965_v35 = vpop.f32.mrf.mxu0  ;;  %v5051_v38 = vmul.f32 %v4919_v55, %v4893_v41 }
 0x28f   :  { %1620 = vrot.lane.b32.xlu0 %v4933_v7, %s3589_s5  ;;  %v4963_v19 = vpop.f32.mrf.mxu1 }
 0x290   :  { %v4973_v40 = vpop.f32.mrf.mxu0 }
 0x291   :  { %1546 = vrot.lane.b32.xlu1 %v4919_v55, %s3590_s12  ;;  %v1166_v17 = vpop.f32.mrf.mxu1 }
 0x292   :  { %v4993_v63 = vpop.f32.mrf.mxu0 }
 0x293   :  { %1622 = vrot.lane.b32.xlu0 %v4943_v18, %s3589_s5  ;;  %v4971_v42 = vpop.f32.mrf.mxu1 }
 0x294   :  { %v4999_v61 = vpop.f32.mrf.mxu0 }
 0x295   :  { %1636 = vrot.lane.b32.xlu1 %v4973_v40, %s3589_s5  ;;  %v1171_v62 = vpop.f32.mrf.mxu1 }
 0x296   :  { %v5005_v16 = vpop.f32.mrf.mxu0 }
 0x297   :  { %1624 = vrot.lane.b32.xlu0 %v4941_v14, %s3589_s5  ;;  %v4979_v31 = vpop.f32.mrf.mxu1 }
 0x298   :  { %6313 = vst [vmem:[#allocation5_spill] sm:$0xff] %v4979_v31 }
 0x299   :  { %v1176_v24 = vpop.f32.mrf.mxu1 }
 0x29b   :  { %1626 = vrot.lane.b32.xlu0 %v4951_v39, %s3589_s5  ;;  %v4983_v28 = vpop.f32.mrf.mxu1 }
 0x29d   :  { %v1181_v60 = vpop.f32.mrf.mxu1 }
 0x29f   :  { %1628 = vrot.lane.b32.xlu0 %v4949_v29, %s3589_s5  ;;  %v4987_v23 = vpop.f32.mrf.mxu1 }
 0x2a0   :  { %6314 = vst [vmem:[#allocation13_spill] sm:$0xff] %v4987_v23 }
 0x2a1   :  { %v1186_v2 = vpop.f32.mrf.mxu1 }
 0x2a3   :  { %1630 = vrot.lane.b32.xlu0 %v4965_v35, %s3589_s5  ;;  %v4991_v10 = vpop.f32.mrf.mxu1 }
 0x2a5   :  { %v1191_v12 = vpop.f32.mrf.mxu1 }
 0x2a7   :  { %1634 = vrot.lane.b32.xlu0 %v4993_v63, %s3589_s5  ;;  %v4997_v0 = vpop.f32.mrf.mxu1 }
 0x2a8   :  { %6315 = vst [vmem:[#allocation14_spill] sm:$0xff] %v4997_v0 }
 0x2a9   :  { %v1196_v30 = vpop.f32.mrf.mxu1 }
 0x2ab   :  { %1640 = vrot.lane.b32.xlu0 %v4999_v61, %s3589_s5  ;;  %v5003_v22 = vpop.f32.mrf.mxu1 }
 0x2ad   :  { %v1201_v58 = vpop.f32.mrf.mxu1 }
 0x2af   :  { %1638 = vrot.lane.b32.xlu0 %v5005_v16, %s3589_s5  ;;  %v5009_v44 = vpop.f32.mrf.mxu1 }
 0x2b0   :  { %6316 = vst [vmem:[#allocation7_spill] sm:$0xff] %v5009_v44  ;;  %v5191_v44 = vmul.f32 %v4901_v36, %v4901_v36 }
 0x2b1   :  { %v1206_v13 = vpop.f32.mrf.mxu1 }
 0x2b2   :  { %6333 = vst [vmem:[#allocation25_spill] sm:$0xff] %v5191_v44 }
 0x2b3   :  { %1548 = vrot.lane.b32.xlu0 %v4917_v53, %s3590_s12  ;;  %v5013_v33 = vpop.f32.mrf.mxu1 }
 0x2b5   :  { %v1211_v43 = vpop.f32.mrf.mxu1 }
 0x2b7   :  { %1550 = vrot.lane.b32.xlu0 %v4927_v59, %s3590_s12  ;;  %v5017_v47 = vpop.f32.mrf.mxu1 }
 0x2b8   :  { %6317 = vst [vmem:[#allocation6_spill] sm:$0xff] %v5017_v47  ;;  %v5173_v47 = vmul.f32 %v5005_v16, %v4939_v11 }
 0x2b9   :  { %v1216_v45 = vpop.f32.mrf.mxu1 }
 0x2ba   :  { %6330 = vst [vmem:[#allocation22_spill] sm:$0xff] %v5173_v47 }
 0x2bb   :  { %1552 = vrot.lane.b32.xlu0 %v4925_v57, %s3590_s12  ;;  %v5021_v46 = vpop.f32.mrf.mxu1 }
 0x2bd   :  { %v1221_v50 = vpop.f32.mrf.mxu1 }
 0x2bf   :  { %1554 = vrot.lane.b32.xlu0 %v4935_v9, %s3590_s12  ;;  %v5025_v51 = vpop.f32.mrf.mxu1 }
 0x2c0   :  { %6318 = vst [vmem:[#allocation15_spill] sm:$0xff] %v5025_v51  ;;  %v5161_v51 = vmul.f32 %v4993_v63, %v4923_v56 }
 0x2c1   :  { %v1226_v54 = vpop.f32.mrf.mxu1 }
 0x2c2   :  { %6328 = vst [vmem:[#allocation20_spill] sm:$0xff] %v5161_v51 }
 0x2c3   :  { %1556 = vrot.lane.b32.xlu0 %v4933_v7, %s3590_s12  ;;  %v5029_v5 = vpop.f32.mrf.mxu1 }
 0x2c5   :  { %v1231_v8 = vpop.f32.mrf.mxu1 }
 0x2c7   :  { %1558 = vrot.lane.b32.xlu0 %v4943_v18, %s3590_s12  ;;  %v5033_v15 = vpop.f32.mrf.mxu1 }
 0x2c8   :  { %6319 = vst [vmem:[#allocation9_spill] sm:$0xff] %v5033_v15 }
 0x2c9   :  { %v1236_v27 = vpop.f32.mrf.mxu1 }
 0x2cb   :  { %1560 = vrot.lane.b32.xlu0 %v4941_v14, %s3590_s12 }
 0x2cf   :  { %1562 = vrot.lane.b32.xlu0 %v4951_v39, %s3590_s12 }
 0x2d3   :  { %1564 = vrot.lane.b32.xlu0 %v4949_v29, %s3590_s12 }
 0x2d7   :  { %1566 = vrot.lane.b32.xlu0 %v4965_v35, %s3590_s12 }
 0x2db   :  { %1568 = vrot.lane.b32.xlu0 %v4957_v34, %s3590_s12 }
 0x2df   :  { %1570 = vrot.lane.b32.xlu0 %v4993_v63, %s3590_s12 }
 0x2e3   :  { %1572 = vrot.lane.b32.xlu0 %v4973_v40, %s3590_s12 }
 0x2e7   :  { %1466 = vrot.lane.b32.xlu0 %v5051_v38, %s3590_s12 }
 0x2eb   :  { %1574 = vrot.lane.b32.xlu0 %v5005_v16, %s3590_s12 }
 0x2ed   :  { %v1611_v17 = vpop.permute.xlu0 %1610 }
 0x2ee   :  { %v1658_v2 = vmul.f32 %v1611_v17, %v4893_v41 }
 0x2f1   :  { %v1613_v62 = vpop.permute.xlu0 %1612 }
 0x2f2   :  { %v1659_v24 = vmul.f32 %v1613_v62, %v4897_v26 }
 0x2f4   :  { %1692 = vrot.lane.b32.xlu1 %v1659_v24, %s3590_s12 }
 0x2f5   :  { %v1615_v60 = vpop.permute.xlu0 %1614 }
 0x2f6   :  { %v1660_v13 = vmul.f32 %v1615_v60, %v4901_v36 }
 0x2f8   :  { %1690 = vrot.lane.b32.xlu1 %v1658_v2, %s3590_s12 }
 0x2f9   :  { %v1617_v12 = vpop.permute.xlu0 %1616 }
 0x2fa   :  { %v1661_v30 = vmul.f32 %v1617_v12, %v4905_v32 }
 0x2fc   :  { %1696 = vrot.lane.b32.xlu1 %v1661_v30, %s3590_s12 }
 0x2fd   :  { %v1619_v58 = vpop.permute.xlu0 %1618 }
 0x2fe   :  { %v1662_v54 = vmul.f32 %v1619_v58, %v4909_v1 }
 0x2ff   :  { %v1633_v2 = vpop.permute.xlu1 %1632 }
 0x300   :  { %1694 = vrot.lane.b32.xlu1 %v1660_v13, %s3590_s12 }
 0x301   :  { %v1621_v43 = vpop.permute.xlu0 %1620 }
 0x302   :  { %v1663_v45 = vmul.f32 %v1621_v43, %v4913_v49  ;;  %v1669_v43 = vmul.f32 %v1633_v2, %v4915_v52 }
 0x303   :  { %v5077_v58 = vpop.permute.xlu1 %1546 }
 0x304   :  { %1700 = vrot.lane.b32.xlu1 %v1663_v45, %s3590_s12  ;;  %v1594_v0 = vmul.f32 %v5077_v58, %v4893_v41 }
 0x305   :  { %v1623_v50 = vpop.permute.xlu0 %1622 }
 0x306   :  { %v1664_v62 = vmul.f32 %v1623_v50, %v4895_v25 }
 0x308   :  { %1698 = vrot.lane.b32.xlu1 %v1662_v54, %s3590_s12 }
 0x309   :  { %v1625_v8 = vpop.permute.xlu0 %1624 }
 0x30a   :  { %v1665_v27 = vmul.f32 %v1625_v8, %v4899_v21  ;;  %v1637_v8 = vpop.permute.xlu1 %1636 }
 0x30c   :  { %1704 = vrot.lane.b32.xlu1 %v1665_v27, %s3590_s12  ;;  %v5087_v27 = vmul.f32 %v4917_v53, %v4897_v26 }
 0x30d   :  { %v1627_v17 = vpop.permute.xlu0 %1626 }
 0x30e   :  { %v1666_v30 = vmul.f32 %v1627_v17, %v4903_v4  ;;  %v1671_v17 = vmul.f32 %v1637_v8, %v4931_v6 }
 0x310   :  { %1702 = vrot.lane.b32.xlu1 %v1664_v62, %s3590_s12  ;;  %v5095_v62 = vmul.f32 %v4927_v59, %v4901_v36 }
 0x311   :  { %v1629_v24 = vpop.permute.xlu0 %1628 }
 0x312   :  { %v1667_v60 = vmul.f32 %v1629_v24, %v4907_v3 }
 0x314   :  { %1708 = vrot.lane.b32.xlu1 %v1667_v60, %s3590_s12  ;;  %v5103_v60 = vmul.f32 %v4925_v57, %v4905_v32 }
 0x315   :  { %v1631_v12 = vpop.permute.xlu0 %1630 }
 0x316   :  { %v1668_v50 = vmul.f32 %v1631_v12, %v4911_v48  ;;  %v5111_v12 = vmul.f32 %v4935_v9, %v4909_v1 }
 0x318   :  { %1706 = vrot.lane.b32.xlu1 %v1666_v30, %s3590_s12  ;;  %6320 = vst [vmem:[#allocation8_spill] sm:$0xff] %v5111_v12 }
 0x319   :  { %v1635_v13 = vpop.permute.xlu0 %1634 }
 0x31a   :  { %v1670_v24 = vmul.f32 %v1635_v13, %v4923_v56  ;;  %v5119_v13 = vmul.f32 %v4933_v7, %v4913_v49 }
 0x31c   :  { %1712 = vrot.lane.b32.xlu1 %v1669_v43, %s3590_s12  ;;  %6321 = vst [vmem:[#allocation16_spill] sm:$0xff] %v5119_v13  ;;  %v5125_v43 = vmul.f32 %v4943_v18, %v4895_v25 }
 0x31d   :  { %v1641_v45 = vpop.permute.xlu0 %1640 }
 0x31e   :  { %v1673_v54 = vmul.f32 %v1641_v45, %v4947_v20  ;;  %6322 = vst [vmem:[#allocation11_spill] sm:$0xff] %v5125_v43  ;;  %v5131_v45 = vmul.f32 %v4941_v14, %v4899_v21 }
 0x320   :  { %1710 = vrot.lane.b32.xlu1 %v1668_v50, %s3590_s12  ;;  %1720 = vrot.lane.b32.xlu0 %v1673_v54, %s3590_s12  ;;  %6323 = vst [vmem:[#allocation10_spill] sm:$0xff] %v5131_v45  ;;  %v5137_v54 = vmul.f32 %v4951_v39, %v4903_v4 }
 0x321   :  { %v1639_v2 = vpop.permute.xlu0 %1638 }
 0x322   :  { %v1672_v30 = vmul.f32 %v1639_v2, %v4939_v11  ;;  %6324 = vst [vmem:[#allocation17_spill] sm:$0xff] %v5137_v54 }
 0x324   :  { %1716 = vrot.lane.b32.xlu1 %v1671_v17, %s3590_s12  ;;  %1468 = vrot.lane.b32.xlu0 %v5087_v27, %s3590_s12  ;;  %v5143_v17 = vmul.f32 %v4949_v29, %v4907_v3 }
 0x325   :  { %v1549_v50 = vpop.permute.xlu0 %1548 }
 0x326   :  { %6325 = vst [vmem:[#allocation12_spill] sm:$0xff] %v5143_v17 }
 0x328   :  { %1714 = vrot.lane.b32.xlu1 %v1670_v24, %s3590_s12  ;;  %1470 = vrot.lane.b32.xlu0 %v5095_v62, %s3590_s12  ;;  %v5149_v24 = vmul.f32 %v4965_v35, %v4911_v48 }
 0x329   :  { %v1551_v8 = vpop.permute.xlu0 %1550 }
 0x32a   :  { %6326 = vst [vmem:[#allocation18_spill] sm:$0xff] %v5149_v24 }
 0x32c   :  { %1576 = vrot.lane.b32.xlu1 %v4999_v61, %s3590_s12  ;;  %1472 = vrot.lane.b32.xlu0 %v5103_v60, %s3590_s12 }
 0x32d   :  { %v1553_v2 = vpop.permute.xlu0 %1552 }
 0x330   :  { %1474 = vrot.lane.b32.xlu0 %v5111_v12, %s3590_s12  ;;  %1718 = vrot.lane.b32.xlu1 %v1672_v30, %s3590_s12  ;;  %v5155_v30 = vmul.f32 %v4957_v34, %v4915_v52  ;;  %v1596_v12 = vmul.f32 %v1551_v8, %v4901_v36 }
 0x331   :  { %v1555_v15 = vpop.permute.xlu0 %1554 }
 0x332   :  { %6327 = vst [vmem:[#allocation19_spill] sm:$0xff] %v5155_v30 }
 0x334   :  { %1476 = vrot.lane.b32.xlu0 %v5119_v13, %s3590_s12 }
 0x338   :  { %1478 = vrot.lane.b32.xlu0 %v5125_v43, %s3590_s12 }
 0x33c   :  { %1480 = vrot.lane.b32.xlu0 %v5131_v45, %s3590_s12  ;;  %v5197_v45 = vmul.f32 %v4909_v1, %v4909_v1 }
 0x33e   :  { %6334 = vst [vmem:[#allocation26_spill] sm:$0xff] %v5197_v45 }
 0x340   :  { %1482 = vrot.lane.b32.xlu0 %v5137_v54, %s3590_s12  ;;  %v5179_v54 = vmul.f32 %v4999_v61, %v4947_v20 }
 0x342   :  { %6331 = vst [vmem:[#allocation23_spill] sm:$0xff] %v5179_v54 }
 0x344   :  { %1484 = vrot.lane.b32.xlu0 %v5143_v17, %s3590_s12  ;;  %v5167_v17 = vmul.f32 %v4973_v40, %v4931_v6 }
 0x346   :  { %6329 = vst [vmem:[#allocation21_spill] sm:$0xff] %v5167_v17 }
 0x348   :  { %1486 = vrot.lane.b32.xlu0 %v5149_v24, %s3590_s12  ;;  %v1557_v24 = vpop.permute.xlu0 %1556 }
 0x34c   :  { %1488 = vrot.lane.b32.xlu0 %v5155_v30, %s3590_s12  ;;  %v1559_v30 = vpop.permute.xlu0 %1558 }
 0x350   :  { %1490 = vrot.lane.b32.xlu0 %v5161_v51, %s3590_s12  ;;  %v5185_v51 = vmul.f32 %v4893_v41, %v4893_v41 }
 0x352   :  { %6332 = vst [vmem:[#allocation24_spill] sm:$0xff] %v5185_v51 }
 0x354   :  { %1492 = vrot.lane.b32.xlu0 %v5167_v17, %s3590_s12  ;;  %v1561_v17 = vpop.permute.xlu0 %1560 }
 0x358   :  { %1494 = vrot.lane.b32.xlu0 %v5173_v47, %s3590_s12  ;;  %v1563_v47 = vpop.permute.xlu0 %1562 }
 0x35c   :  { %1496 = vrot.lane.b32.xlu0 %v5179_v54, %s3590_s12  ;;  %v1565_v43 = vpop.permute.xlu0 %1564 }
 0x360   :  { %2172 = vrot.lane.b32.xlu0 %v5185_v51, %s3590_s12  ;;  %v5205_v51 = vmul.f32 %v4895_v25, %v4895_v25  ;;  %v1567_v58 = vpop.permute.xlu0 %1566 }
 0x364   :  { %2176 = vrot.lane.b32.xlu0 %v5191_v44, %s3590_s12  ;;  %v1595_v44 = vmul.f32 %v1549_v50, %v4897_v26  ;;  %v1597_v50 = vmul.f32 %v1553_v2, %v4905_v32  ;;  %v1569_v36 = vpop.permute.xlu0 %1568 }
 0x366   :  { %v1693_v54 = vpop.permute.xlu1 %1692 }
 0x367   :  { %v1739_v41 = vadd.f32 %v1693_v54, %v1595_v44  ;;  %v5229_v44 = vmul.f32 %v4923_v56, %v4923_v56 }
 0x368   :  { %2180 = vrot.lane.b32.xlu0 %v5197_v45, %s3590_s12  ;;  %v5213_v45 = vmul.f32 %v4903_v4, %v4903_v4 }
 0x36a   :  { %v1691_v23 = vpop.permute.xlu1 %1690 }
 0x36b   :  { %v1738_v13 = vadd.f32 %v1691_v23, %v1594_v0  ;;  %v5221_v23 = vmul.f32 %v4911_v48, %v4911_v48 }
 0x36c   :  { %2184 = vrot.lane.b32.xlu0 %v5205_v51, %s3590_s12 }
 0x36d   :  { %1770 = vrot.lane.b32.xlu1 %v1738_v13, %s3589_s5  ;;  %6335 = vst [vmem:[#allocation27_spill] sm:$0xff] %v5221_v23 }
 0x36e   :  { %v1697_v31 = vpop.permute.xlu1 %1696 }
 0x36f   :  { %v1741_v8 = vadd.f32 %v1697_v31, %v1597_v50  ;;  %v5245_v31 = vmul.f32 %v4919_v55, %v4919_v55  ;;  %v1600_v50 = vmul.f32 %v1559_v30, %v4895_v25  ;;  %v1601_v55 = vmul.f32 %v1561_v17, %v4899_v21 }
 0x370   :  { %2188 = vrot.lane.b32.xlu0 %v5213_v45, %s3590_s12  ;;  %v5271_v17 = vmul.f32 %v4943_v18, %v4943_v18  ;;  %v1604_v18 = vmul.f32 %v1567_v58, %v4911_v48 }
 0x371   :  { %1772 = vrot.lane.b32.xlu1 %v1739_v41, %s3589_s5  ;;  %v1598_v41 = vmul.f32 %v1555_v15, %v4909_v1 }
 0x372   :  { %v1695_v0 = vpop.permute.xlu1 %1694 }
 0x373   :  { %v1740_v13 = vadd.f32 %v1695_v0, %v1596_v12  ;;  %v5237_v12 = vmul.f32 %v4939_v11, %v4939_v11 }
 0x374   :  { %2192 = vrot.lane.b32.xlu0 %v5221_v23, %s3590_s12  ;;  %v1599_v23 = vmul.f32 %v1557_v24, %v4913_v49 }
 0x375   :  { %1774 = vrot.lane.b32.xlu1 %v1740_v13, %s3589_s5  ;;  %v1571_v13 = vpop.permute.xlu0 %1570 }
 0x376   :  { %v1701_v54 = vpop.permute.xlu1 %1700 }
 0x377   :  { %v1743_v15 = vadd.f32 %v1701_v54, %v1599_v23  ;;  %v5261_v23 = vmul.f32 %v4935_v9, %v4935_v9  ;;  %v1603_v9 = vmul.f32 %v1565_v43, %v4907_v3 }
 0x378   :  { %2196 = vrot.lane.b32.xlu0 %v5229_v44, %s3590_s12 }
 0x379   :  { %1776 = vrot.lane.b32.xlu1 %v1741_v8, %s3589_s5  ;;  %v5253_v8 = vmul.f32 %v4927_v59, %v4927_v59  ;;  %v1573_v24 = vpop.permute.xlu0 %1572  ;;  %v1602_v59 = vmul.f32 %v1563_v47, %v4903_v4 }
 0x37a   :  { %v1699_v2 = vpop.permute.xlu1 %1698 }
 0x37b   :  { %v1742_v0 = vadd.f32 %v1699_v2, %v1598_v41 }
 0x37c   :  { %2200 = vrot.lane.b32.xlu0 %v5237_v12, %s3590_s12 }
 0x37d   :  { %1778 = vrot.lane.b32.xlu1 %v1742_v0, %s3589_s5  ;;  %v5263_v54 = vpop.permute.xlu0 %1466 }
 0x37e   :  { %v1705_v1 = vpop.permute.xlu1 %1704 }
 0x37f   :  { %v1745_v30 = vadd.f32 %v1705_v1, %v1601_v55  ;;  %v5279_v1 = vmul.f32 %v4951_v39, %v4951_v39  ;;  %v1605_v39 = vmul.f32 %v1569_v36, %v4915_v52  ;;  %v5305_v36 = vmul.f32 %v5005_v16, %v5005_v16 }
 0x380   :  { %2380 = vrot.lane.b32.xlu0 %v5245_v31, %s3590_s12 }
 0x381   :  { %1780 = vrot.lane.b32.xlu1 %v1743_v15, %s3589_s5  ;;  %v1575_v4 = vpop.permute.xlu0 %1574 }
 0x382   :  { %v1703_v41 = vpop.permute.xlu1 %1702 }
 0x383   :  { %v1744_v2 = vadd.f32 %v1703_v41, %v1600_v50  ;;  %v5287_v41 = vmul.f32 %v4965_v35, %v4965_v35  ;;  %v1606_v35 = vmul.f32 %v1571_v13, %v4923_v56  ;;  %v5315_v56 = vmul.f32 %v4955_v37, %v4955_v37 }
 0x384   :  { %2384 = vrot.lane.b32.xlu0 %v5253_v8, %s3590_s12 }
 0x385   :  { %1782 = vrot.lane.b32.xlu1 %v1744_v2, %s3589_s5 }
 0x386   :  { %v1709_v25 = vpop.permute.xlu1 %1708 }
 0x387   :  { %v1747_v50 = vadd.f32 %v1709_v25, %v1603_v9  ;;  %v5295_v25 = vmul.f32 %v4993_v63, %v4993_v63 }
 0x388   :  { %2388 = vrot.lane.b32.xlu0 %v5261_v23, %s3590_s12 }
 0x389   :  { %1784 = vrot.lane.b32.xlu1 %v1745_v30, %s3589_s5 }
 0x38a   :  { %v1707_v0 = vpop.permute.xlu1 %1706 }
 0x38b   :  { %v1746_v15 = vadd.f32 %v1707_v0, %v1602_v59 }
 0x38c   :  { %2392 = vrot.lane.b32.xlu0 %v5271_v17, %s3590_s12 }
 0x38d   :  { %1786 = vrot.lane.b32.xlu1 %v1746_v15, %s3589_s5  ;;  %v1607_v15 = vmul.f32 %v1573_v24, %v4931_v6  ;;  %v5325_v24 = vmul.f32 %v4971_v42, %v4971_v42  ;;  %v5344_v42 = vmul.f32 %v4991_v10, %v4991_v10  ;;  %v5364_v10 = vmul.f32 %v4905_v32, %v4905_v32 }
 0x38e   :  { %v1713_v47 = vpop.permute.xlu1 %1712  ;;  %v5386_v32 = vmul.f32 %v5021_v46, %v5021_v46  ;;  %v5406_v46 = vmul.f32 %v4907_v3, %v4907_v3  ;;  %v5424_v3 = vmul.f32 %v4931_v6, %v4931_v6 }
 0x38f   :  { %v1749_v30 = vadd.f32 %v1713_v47, %v1605_v39  ;;  %v1608_v47 = vmul.f32 %v1575_v4, %v4939_v11  ;;  %v5335_v11 = vmul.f32 %v4983_v28, %v4983_v28  ;;  %v5358_v28 = vmul.f32 %v5003_v22, %v5003_v22 }
 0x390   :  { %2396 = vrot.lane.b32.xlu0 %v5279_v1, %s3590_s12  ;;  %v5378_v22 = vmul.f32 %v4913_v49, %v4913_v49  ;;  %v5400_v49 = vmul.f32 %v5029_v5, %v5029_v5  ;;  %6338 = vst [vmem:[#allocation30_spill] sm:$0xff] %v5406_v46  ;;  %6340 = vst [vmem:[#allocation32_spill] sm:$0xff] %v5424_v3 }
 0x391   :  { %1788 = vrot.lane.b32.xlu1 %v1747_v50, %s3589_s5 }
 0x392   :  { %v1711_v43 = vpop.permute.xlu1 %1710  ;;  %v1721_v2 = vpop.permute.xlu0 %1720  ;;  %6336 = vst [vmem:[#allocation28_spill] sm:$0xff] %v5378_v22 }
 0x393   :  { %v1748_v55 = vadd.f32 %v1711_v43, %v1604_v18 }
 0x394   :  { %2400 = vrot.lane.b32.xlu0 %v5287_v41, %s3590_s12 }
 0x395   :  { %1790 = vrot.lane.b32.xlu1 %v1748_v55, %s3589_s5 }
 0x396   :  { %v1717_v48 = vpop.permute.xlu1 %1716  ;;  %v5297_v58 = vpop.permute.xlu0 %1468 }
 0x397   :  { %v1751_v16 = vadd.f32 %v1717_v48, %v1607_v15  ;;  %v5350_v48 = vmul.f32 %v4897_v26, %v4897_v26  ;;  %v5372_v26 = vmul.f32 %v5013_v33, %v5013_v33  ;;  %v5392_v33 = vmul.f32 %v4899_v21, %v4899_v21 }
 0x398   :  { %2404 = vrot.lane.b32.xlu0 %v5295_v25, %s3590_s12 }
 0x399   :  { %1792 = vrot.lane.b32.xlu1 %v1749_v30, %s3589_s5  ;;  %6337 = vst [vmem:[#allocation29_spill] sm:$0xff] %v5392_v33 }
 0x39a   :  { %v1715_v59 = vpop.permute.xlu1 %1714  ;;  %v5307_v0 = vpop.permute.xlu0 %1470 }
 0x39b   :  { %v1750_v63 = vadd.f32 %v1715_v59, %v1606_v35 }
 0x39c   :  { %2408 = vrot.lane.b32.xlu0 %v5305_v36, %s3590_s12 }
 0x39d   :  { %1794 = vrot.lane.b32.xlu1 %v1750_v63, %s3589_s5  ;;  %v5416_v63 = vmul.f32 %v4915_v52, %v4915_v52 }
 0x39e   :  { %v1577_v13 = vpop.permute.xlu1 %1576  ;;  %v5317_v9 = vpop.permute.xlu0 %1472 }
 0x39f   :  { %v1609_v37 = vmul.f32 %v1577_v13, %v4947_v20  ;;  %6339 = vst [vmem:[#allocation31_spill] sm:$0xff] %v5416_v63  ;;  %v5432_v13 = vmul.f32 %v4947_v20, %v4947_v20 }
 0x3a0   :  { %2588 = vrot.lane.b32.xlu0 %v5315_v56, %s3590_s12 }
 0x3a1   :  { %1796 = vrot.lane.b32.xlu1 %v1751_v16, %s3589_s5  ;;  %v1753_v55 = vadd.f32 %v1721_v2, %v1609_v37  ;;  %6341 = vst [vmem:[#allocation33_spill] sm:$0xff] %v5432_v13  ;;  %v5440_v16 = vmul.f32 %v4917_v53, %v4917_v53  ;;  %v5464_v37 = vmul.f32 %v4941_v14, %v4941_v14 }
 0x3a2   :  { %v1719_v50 = vpop.permute.xlu1 %1718  ;;  %v5327_v18 = vpop.permute.xlu0 %1474  ;;  %v5482_v14 = vmul.f32 %v4957_v34, %v4957_v34 }
 0x3a3   :  { %v1752_v43 = vadd.f32 %v1719_v50, %v1608_v47  ;;  %v5448_v47 = vmul.f32 %v4925_v57, %v4925_v57  ;;  %v5456_v50 = vmul.f32 %v4933_v7, %v4933_v7  ;;  %v1514_v7 = vsub.f32 %v5051_v38, %v5263_v54 }
 0x3a4   :  { %2592 = vrot.lane.b32.xlu0 %v5325_v24, %s3590_s12  ;;  %v5495_v54 = vmul.f32 %v4973_v40, %v4973_v40 }
 0x3a5   :  { %1798 = vrot.lane.b32.xlu1 %v1752_v43, %s3589_s5  ;;  %v5472_v43 = vmul.f32 %v4949_v29, %v4949_v29  ;;  %v1515_v29 = vsub.f32 %v5087_v27, %v5297_v58  ;;  %v5508_v58 = vmul.f32 %v4999_v61, %v4999_v61 }
 0x3a6   :  { %v5337_v4 = vpop.permute.xlu0 %1476 }
 0x3a8   :  { %2596 = vrot.lane.b32.xlu0 %v5335_v11, %s3590_s12 }
 0x3a9   :  { %1800 = vrot.lane.b32.xlu1 %v1753_v55, %s3589_s5 }
 0x3aa   :  { %v5346_v39 = vpop.permute.xlu0 %1478 }
 0x3ac   :  { %2600 = vrot.lane.b32.xlu0 %v5344_v42, %s3590_s12 }
 0x3ad   :  { %2174 = vrot.lane.b32.xlu1 %v5350_v48, %s3590_s12 }
 0x3ae   :  { %v5360_v2 = vpop.permute.xlu0 %1480 }
 0x3b0   :  { %2604 = vrot.lane.b32.xlu0 %v5358_v28, %s3590_s12 }
 0x3b1   :  { %2178 = vrot.lane.b32.xlu1 %v5364_v10, %s3590_s12 }
 0x3b2   :  { %v5374_v30 = vpop.permute.xlu0 %1482 }
 0x3b4   :  { %2608 = vrot.lane.b32.xlu0 %v5372_v26, %s3590_s12 }
 0x3b5   :  { %2182 = vrot.lane.b32.xlu1 %v5378_v22, %s3590_s12 }
 0x3b6   :  { %v5388_v35 = vpop.permute.xlu0 %1484 }
 0x3b8   :  { %2612 = vrot.lane.b32.xlu0 %v5386_v32, %s3590_s12 }
 0x3b9   :  { %2186 = vrot.lane.b32.xlu1 %v5392_v33, %s3590_s12 }
 0x3ba   :  { %v5402_v59 = vpop.permute.xlu0 %1486 }
 0x3bc   :  { %2616 = vrot.lane.b32.xlu0 %v5400_v49, %s3590_s12 }
 0x3bd   :  { %2190 = vrot.lane.b32.xlu1 %v5406_v46, %s3590_s12 }
 0x3be   :  { %v5412_v21 = vpop.permute.xlu0 %1488 }
 0x3c1   :  { %2194 = vrot.lane.b32.xlu1 %v5416_v63, %s3590_s12 }
 0x3c2   :  { %v5420_v5 = vpop.permute.xlu0 %1490 }
 0x3c5   :  { %2198 = vrot.lane.b32.xlu1 %v5424_v3, %s3590_s12 }
 0x3c6   :  { %v5428_v15 = vpop.permute.xlu0 %1492 }
 0x3c9   :  { %2202 = vrot.lane.b32.xlu1 %v5432_v13, %s3590_s12 }
 0x3ca   :  { %v5436_v52 = vpop.permute.xlu0 %1494 }
 0x3cd   :  { %2382 = vrot.lane.b32.xlu1 %v5440_v16, %s3590_s12 }
 0x3ce   :  { %v5444_v6 = vpop.permute.xlu0 %1496 }
 0x3d1   :  { %2386 = vrot.lane.b32.xlu1 %v5448_v47, %s3590_s12 }
 0x3d2   :  { %v5452_v20 = vpop.permute.xlu0 %2172 }
 0x3d5   :  { %2390 = vrot.lane.b32.xlu1 %v5456_v50, %s3590_s12 }
 0x3d6   :  { %v5460_v53 = vpop.permute.xlu0 %2176 }
 0x3d9   :  { %2394 = vrot.lane.b32.xlu1 %v5464_v37, %s3590_s12 }
 0x3da   :  { %v5468_v57 = vpop.permute.xlu0 %2180 }
 0x3dd   :  { %2398 = vrot.lane.b32.xlu1 %v5472_v43, %s3590_s12 }
 0x3de   :  { %v5478_v55 = vpop.permute.xlu0 %2184 }
 0x3df   :  { %v1771_v13 = vpop.permute.xlu1 %1770 }
 0x3e0   :  { %v1819_v3 = vsel %vm1818_vm8, %v1514_v7, %v1771_v13  ;;  %v1516_v13 = vsub.f32 %v5095_v62, %v5307_v0  ;;  %v1517_v7 = vsub.f32 %v5103_v60, %v5317_v9  ;;  %v5521_v0 = vmul.f32 %v4963_v19, %v4963_v19  ;;  %v6343_v9 = vld [vmem:[#allocation5_spill] sm:$0xff] }
 0x3e1   :  { %3333 = vmatprep.mubr.msk.f32.mxu1 %vm124_vm0, %v1819_v3  ;;  %2402 = vrot.lane.b32.xlu1 %v5482_v14, %s3590_s12 }
 0x3e2   :  { %3334 = vmatmul.mubr.msk.f32.vlgmr.msra.gmra.mxu1 %vm124_vm0, %v1819_v3  ;;  %v5491_v38 = vpop.permute.xlu0 %2188 }
 0x3e3   :  { %v1773_v34 = vpop.permute.xlu1 %1772 }
 0x3e4   :  { %v1820_v63 = vsel %vm1818_vm8, %v1515_v29, %v1773_v34  ;;  %v6342_v29 = vld [vmem:[#allocation8_spill] sm:$0xff] }
 0x3e5   :  { %2406 = vrot.lane.b32.xlu1 %v5495_v54, %s3590_s12  ;;  %3335 = vmatprep.mubr.msk.f32.mxu1 %vm124_vm0, %v1820_v63  ;;  %v1518_v34 = vsub.f32 %v6342_v29, %v5327_v18 }
 0x3e6   :  { %3336 = vmatmul.mubr.msk.f32.gmra.mxu1 %vm124_vm0, %v1820_v63  ;;  %v5504_v27 = vpop.permute.xlu0 %2192 }
 0x3e7   :  { %v1775_v40 = vpop.permute.xlu1 %1774 }
 0x3e8   :  { %v1821_v3 = vsel %vm1818_vm8, %v1516_v13, %v1775_v40  ;;  %v5534_v13 = vmul.f32 %v6343_v9, %v6343_v9 }
 0x3e9   :  { %2410 = vrot.lane.b32.xlu1 %v5508_v58, %s3590_s12  ;;  %3337 = vmatprep.mubr.msk.f32.mxu1 %vm124_vm0, %v1821_v3 }
 0x3ea   :  { %3338 = vmatmul.mubr.msk.f32.gmra.mxu1 %vm124_vm0, %v1821_v3  ;;  %v5517_v62 = vpop.permute.xlu0 %2196  ;;  %v6344_v3 = vld [vmem:[#allocation16_spill] sm:$0xff] }
 0x3eb   :  { %v1777_v61 = vpop.permute.xlu1 %1776 }
 0x3ec   :  { %v1822_v63 = vsel %vm1818_vm8, %v1517_v7, %v1777_v61  ;;  %v1519_v7 = vsub.f32 %v6344_v3, %v5337_v4  ;;  %v6345_v61 = vld [vmem:[#allocation13_spill] sm:$0xff]  ;;  %v6346_v4 = vld [vmem:[#allocation11_spill] sm:$0xff]  ;;  %v6347_v3 = vld [vmem:[#allocation14_spill] sm:$0xff] }
 0x3ed   :  { %2590 = vrot.lane.b32.xlu1 %v5521_v0, %s3590_s12  ;;  %3339 = vmatprep.mubr.msk.f32.mxu1 %vm124_vm0, %v1822_v63 }
 0x3ee   :  { %3340 = vmatmul.mubr.msk.f32.gmra.mxu1 %vm124_vm0, %v1822_v63  ;;  %v5530_v60 = vpop.permute.xlu0 %2200  ;;  %v5545_v63 = vmul.f32 %v6345_v61, %v6345_v61  ;;  %v5557_v61 = vmul.f32 %v6347_v3, %v6347_v3 }
 0x3ef   :  { %v1779_v19 = vpop.permute.xlu1 %1778 }
 0x3f0   :  { %v1823_v40 = vsel %vm1818_vm8, %v1518_v34, %v1779_v19  ;;  %v1520_v19 = vsub.f32 %v6346_v4, %v5346_v39  ;;  %v6348_v39 = vld [vmem:[#allocation10_spill] sm:$0xff]  ;;  %v6349_v4 = vld [vmem:[#allocation7_spill] sm:$0xff] }
 0x3f1   :  { %2594 = vrot.lane.b32.xlu1 %v5534_v13, %s3590_s12  ;;  %3341 = vmatprep.mubr.msk.f32.mxu1 %vm124_vm0, %v1823_v40 }
 0x3f2   :  { %3342 = vmatmul.mubr.msk.f32.gmra.mxu1 %vm124_vm0, %v1823_v40  ;;  %v2381_v18 = vpop.permute.xlu0 %2380 }
 0x3f3   :  { %v2428_v29 = vadd.f32 %v2381_v18, %v5245_v31  ;;  %v1781_v9 = vpop.permute.xlu1 %1780 }
 0x3f4   :  { %v1824_v34 = vsel %vm1818_vm8, %v1519_v7, %v1781_v9  ;;  %v1521_v9 = vsub.f32 %v6348_v39, %v5360_v2  ;;  %v6350_v2 = vld [vmem:[#allocation17_spill] sm:$0xff]  ;;  %v6351_v39 = vld [vmem:[#allocation6_spill] sm:$0xff] }
 0x3f5   :  { %3473 = vrsqrt.f32 %v2428_v29  ;;  %2598 = vrot.lane.b32.xlu1 %v5545_v63, %s3590_s12  ;;  %3343 = vmatprep.mubr.msk.f32.mxu1 %vm124_vm0, %v1824_v34  ;;  %vm2446_vm9 = vcmp.eq.f32.partialorder %v2428_v29, inf  ;;  %v2449_v33 = vand.u32 2147483648, %v2428_v29  ;;  %vm2448_vm11 = vcmp.eq.f32.partialorder %v2428_v29, 0.0 }
 0x3f6   :  { %3344 = vmatmul.mubr.msk.f32.gmra.mxu1 %vm124_vm0, %v1824_v34  ;;  %v2385_v40 = vpop.permute.xlu0 %2384 }
 0x3f7   :  { %v5560_v31 = vadd.f32 %v2385_v40, %v5253_v8  ;;  %v1783_v7 = vpop.permute.xlu1 %1782  ;;  %v5572_v8 = vmul.f32 %v6349_v4, %v6349_v4 }
 0x3f8   :  { %v1825_v18 = vsel %vm1818_vm8, %v1520_v19, %v1783_v7  ;;  %v1522_v7 = vsub.f32 %v6350_v2, %v5374_v30 }
 0x3f9   :  { %3475 = vrsqrt.f32 %v5560_v31  ;;  %2602 = vrot.lane.b32.xlu1 %v5557_v61, %s3590_s12  ;;  %3345 = vmatprep.mubr.msk.f32.mxu1 %vm124_vm0, %v1825_v18  ;;  %vm2460_vm12 = vcmp.eq.f32.partialorder %v5560_v31, inf  ;;  %vm2462_vm13 = vcmp.eq.f32.partialorder %v5560_v31, 0.0 }
 0x3fa   :  { %3346 = vmatmul.mubr.msk.f32.gmra.mxu1 %vm124_vm0, %v1825_v18  ;;  %v2389_v34 = vpop.permute.xlu0 %2388 }
 0x3fb   :  { %v5575_v40 = vadd.f32 %v2389_v34, %v5261_v23  ;;  %v1785_v19 = vpop.permute.xlu1 %1784  ;;  %v5587_v23 = vmul.f32 %v6351_v39, %v6351_v39  ;;  %v6353_v39 = vld [vmem:[#allocation15_spill] sm:$0xff] }
 0x3fc   :  { %v1826_v3 = vsel %vm1818_vm8, %v1521_v9, %v1785_v19  ;;  %v6352_v19 = vld [vmem:[#allocation12_spill] sm:$0xff] }
 0x3fd   :  { %3477 = vrsqrt.f32 %v5575_v40  ;;  %2606 = vrot.lane.b32.xlu1 %v5572_v8, %s3590_s12  ;;  %3347 = vmatprep.mubr.msk.f32.mxu1 %vm124_vm0, %v1826_v3  ;;  %vm2474_vm14 = vcmp.eq.f32.partialorder %v5575_v40, inf  ;;  %vm2476_vm15 = vcmp.eq.f32.partialorder %v5575_v40, 0.0 }
 0x3fe   :  { %3348 = vmatmul.mubr.msk.f32.gmra.mxu1 %vm124_vm0, %v1826_v3  ;;  %v2393_v18 = vpop.permute.xlu0 %2392  ;;  %v1523_v3 = vsub.f32 %v6352_v19, %v5388_v35  ;;  %v6354_v19 = vld [vmem:[#allocation18_spill] sm:$0xff] }
 0x3ff   :  { %v5590_v34 = vadd.f32 %v2393_v18, %v5271_v17  ;;  %v1787_v9 = vpop.permute.xlu1 %1786  ;;  %v5602_v17 = vmul.f32 %v6353_v39, %v6353_v39 }
 0x400   :  { %v1827_v4 = vsel %vm1818_vm8, %v1522_v7, %v1787_v9 }
 0x401   :  { %3479 = vrsqrt.f32 %v5590_v34  ;;  %2610 = vrot.lane.b32.xlu1 %v5587_v23, %s3590_s12  ;;  %3349 = vmatprep.mubr.msk.f32.mxu1 %vm124_vm0, %v1827_v4  ;;  %vm2488_vm10 = vcmp.eq.f32.partialorder %v5590_v34, inf  ;;  %vm2490_vm1 = vcmp.eq.f32.partialorder %v5590_v34, 0.0 }
 0x402   :  { %v3474_v30 = vpop.eup %3473  ;;  %3350 = vmatmul.mubr.msk.f32.gmra.mxu1 %vm124_vm0, %v1827_v4  ;;  %v2397_v2 = vpop.permute.xlu0 %2396 }
 0x403   :  { %v5605_v7 = vadd.f32 %v2397_v2, %v5279_v1  ;;  %v1789_v18 = vpop.permute.xlu1 %1788  ;;  %v2445_v9 = vmul.f32 %v3474_v30, %v2428_v29  ;;  %v1524_v1 = vsub.f32 %v6354_v19, %v5402_v59  ;;  %v2463_v59 = vand.u32 2147483648, %v5560_v31 }
 0x404   :  { %v1828_v46 = vsel %vm1818_vm8, %v1523_v3, %v1789_v18  ;;  %v6355_v3 = vld [vmem:[#allocation9_spill] sm:$0xff] }
 0x405   :  { %3481 = vrsqrt.f32 %v5605_v7  ;;  %2614 = vrot.lane.b32.xlu1 %v5602_v17, %s3590_s12  ;;  %3351 = vmatprep.mubr.msk.f32.mxu1 %vm124_vm0, %v1828_v46  ;;  %v2447_v35 = vsel %vm2446_vm9, %v2428_v29, %v2445_v9  ;;  %v5617_v39 = vmul.f32 %v6355_v3, %v6355_v3  ;;  %v6357_v3 = vld [vmem:[#allocation20_spill] sm:$0xff]  ;;  %vm2502_vm2 = vcmp.eq.f32.partialorder %v5605_v7, inf }
 0x406   :  { %v3476_v4 = vpop.eup %3475  ;;  %3352 = vmatmul.mubr.msk.f32.gmra.mxu1 %vm124_vm0, %v1828_v46  ;;  %v2401_v30 = vpop.permute.xlu0 %2400  ;;  %v2450_v2 = vsel %vm2448_vm11, %v2449_v33, %v2447_v35  ;;  %v6356_v46 = vld [vmem:[#allocation19_spill] sm:$0xff]  ;;  %vm2504_vm3 = vcmp.eq.f32.partialorder %v5605_v7, 0.0 }
 0x407   :  { %v5620_v18 = vadd.f32 %v2401_v30, %v5287_v41  ;;  %v1791_v22 = vpop.permute.xlu1 %1790  ;;  %2812 = vrot.lane.b32.xlu0 %v2450_v2, %s3589_s5  ;;  %v2459_v29 = vmul.f32 %v3476_v4, %v5560_v31  ;;  %v1525_v35 = vsub.f32 %v6356_v46, %v5412_v21 }
 0x408   :  { %v1829_v9 = vsel %vm1818_vm8, %v1524_v1, %v1791_v22 }
 0x409   :  { %3483 = vrsqrt.f32 %v5620_v18  ;;  %2618 = vrot.lane.b32.xlu1 %v5617_v39, %s3590_s12  ;;  %3353 = vmatprep.mubr.msk.f32.mxu1 %vm124_vm0, %v1829_v9  ;;  %v2461_v41 = vsel %vm2460_vm12, %v5560_v31, %v2459_v29  ;;  %v2477_v31 = vand.u32 2147483648, %v5575_v40  ;;  %v1526_v29 = vsub.f32 %v6357_v3, %v5420_v5  ;;  %v6359_v3 = vld [vmem:[#allocation22_spill] sm:$0xff] }
 0x40a   :  { %v3478_v33 = vpop.eup %3477  ;;  %3354 = vmatmul.mubr.msk.f32.gmra.mxu1 %vm124_vm0, %v1829_v9  ;;  %v2405_v22 = vpop.permute.xlu0 %2404  ;;  %v2464_v4 = vsel %vm2462_vm13, %v2463_v59, %v2461_v41  ;;  %vm2516_vm4 = vcmp.eq.f32.partialorder %v5620_v18, inf  ;;  %vm2518_vm5 = vcmp.eq.f32.partialorder %v5620_v18, 0.0 }
 0x40b   :  { %v5637_v19 = vadd.f32 %v2405_v22, %v5295_v25  ;;  %v1793_v1 = vpop.permute.xlu1 %1792  ;;  %2816 = vrot.lane.b32.xlu0 %v2464_v4, %s3589_s5  ;;  %v2473_v30 = vmul.f32 %v3478_v33, %v5575_v40  ;;  %v6358_v22 = vld [vmem:[#allocation21_spill] sm:$0xff] }
 0x40c   :  { %v1830_v2 = vsel %vm1818_vm8, %v1525_v35, %v1793_v1  ;;  %v1527_v4 = vsub.f32 %v6358_v22, %v5428_v15 }
 0x40d   :  { %3485 = vrsqrt.f32 %v5637_v19  ;;  %3355 = vmatprep.mubr.msk.f32.mxu1 %vm124_vm0, %v1830_v2  ;;  %v2475_v21 = vsel %vm2474_vm14, %v5575_v40, %v2473_v30  ;;  %v2491_v40 = vand.u32 2147483648, %v5590_v34  ;;  %vm2530_vm6 = vcmp.eq.f32.partialorder %v5637_v19, inf }
 0x40e   :  { %v3480_v25 = vpop.eup %3479  ;;  %3356 = vmatmul.mubr.msk.f32.gmra.mxu1 %vm124_vm0, %v1830_v2  ;;  %v2409_v9 = vpop.permute.xlu0 %2408  ;;  %v2478_v59 = vsel %vm2476_vm15, %v2477_v31, %v2475_v21  ;;  %vm2532_vm7 = vcmp.eq.f32.partialorder %v5637_v19, 0.0 }
 0x40f   :  { %v5652_v41 = vadd.f32 %v2409_v9, %v5305_v36  ;;  %v1795_v33 = vpop.permute.xlu1 %1794  ;;  %2820 = vrot.lane.b32.xlu0 %v2478_v59, %s3589_s5  ;;  %v2487_v46 = vmul.f32 %v3480_v25, %v5590_v34 }
 0x410   :  { %v1831_v35 = vsel %vm1818_vm8, %v1526_v29, %v1795_v33  ;;  %v1528_v29 = vsub.f32 %v6359_v3, %v5436_v52 }
 0x411   :  { %3487 = vrsqrt.f32 %v5652_v41  ;;  %3357 = vmatprep.mubr.msk.f32.mxu1 %vm124_vm0, %v1831_v35  ;;  %v2489_v5 = vsel %vm2488_vm10, %v5590_v34, %v2487_v46  ;;  %v2505_v34 = vand.u32 2147483648, %v5605_v7  ;;  %vm2544_vm9 = vcmp.eq.f32.partialorder %v5652_v41, inf }
 0x412   :  { %v3482_v36 = vpop.eup %3481  ;;  %3358 = vmatmul.mubr.msk.f32.gmra.mxu1 %vm124_vm0, %v1831_v35  ;;  %v2589_v1 = vpop.permute.xlu0 %2588  ;;  %v2492_v30 = vsel %vm2490_vm1, %v2491_v40, %v2489_v5  ;;  %v6360_v5 = vld [vmem:[#allocation23_spill] sm:$0xff]  ;;  %vm2546_vm11 = vcmp.eq.f32.partialorder %v5652_v41, 0.0 }
 0x413   :  { %v5667_v2 = vadd.f32 %v2589_v1, %v5315_v56  ;;  %v1797_v31 = vpop.permute.xlu1 %1796  ;;  %2824 = vrot.lane.b32.xlu0 %v2492_v30, %s3589_s5  ;;  %v2501_v21 = vmul.f32 %v3482_v36, %v5605_v7  ;;  %v1529_v36 = vsub.f32 %v6360_v5, %v5444_v6 }
 0x414   :  { %v1832_v25 = vsel %vm1818_vm8, %v1527_v4, %v1797_v31 }
 0x415   :  { %3489 = vrsqrt.f32 %v5667_v2  ;;  %3359 = vmatprep.mubr.msk.f32.mxu1 %vm124_vm0, %v1832_v25  ;;  %v2503_v15 = vsel %vm2502_vm2, %v5605_v7, %v2501_v21  ;;  %v2519_v7 = vand.u32 2147483648, %v5620_v18  ;;  %vm2654_vm12 = vcmp.eq.f32.partialorder %v5667_v2, inf }
 0x416   :  { %v3484_v56 = vpop.eup %3483  ;;  %3360 = vmatmul.mubr.msk.f32.gmra.mxu1 %vm124_vm0, %v1832_v25  ;;  %v2593_v9 = vpop.permute.xlu0 %2592  ;;  %v2506_v59 = vsel %vm2504_vm3, %v2505_v34, %v2503_v15  ;;  %vm2656_vm13 = vcmp.eq.f32.partialorder %v5667_v2, 0.0 }
 0x417   :  { %v5682_v33 = vadd.f32 %v2593_v9, %v5325_v24  ;;  %v1799_v46 = vpop.permute.xlu1 %1798  ;;  %2828 = vrot.lane.b32.xlu0 %v2506_v59, %s3589_s5  ;;  %v2515_v35 = vmul.f32 %v3484_v56, %v5620_v18 }
 0x418   :  { %v1833_v40 = vsel %vm1818_vm8, %v1528_v29, %v1799_v46  ;;  %v2547_v29 = vand.u32 2147483648, %v5652_v41 }
 0x419   :  { %3491 = vrsqrt.f32 %v5682_v33  ;;  %3361 = vmatprep.mubr.msk.f32.mxu1 %vm124_vm0, %v1833_v40  ;;  %v2517_v52 = vsel %vm2516_vm4, %v5620_v18, %v2515_v35  ;;  %v2533_v18 = vand.u32 2147483648, %v5637_v19  ;;  %vm2668_vm14 = vcmp.eq.f32.partialorder %v5682_v33, inf }
 0x41a   :  { %v3486_v24 = vpop.eup %3485  ;;  %3362 = vmatmul.mubr.msk.f32.gmra.mxu1 %vm124_vm0, %v1833_v40  ;;  %v2597_v22 = vpop.permute.xlu0 %2596  ;;  %v2520_v4 = vsel %vm2518_vm5, %v2519_v7, %v2517_v52  ;;  %v2657_v7 = vand.u32 2147483648, %v5667_v2  ;;  %vm2670_vm15 = vcmp.eq.f32.partialorder %v5682_v33, 0.0 }
 0x41b   :  { %v5697_v1 = vadd.f32 %v2597_v22, %v5335_v11  ;;  %v1801_v30 = vpop.permute.xlu1 %1800  ;;  %2832 = vrot.lane.b32.xlu0 %v2520_v4, %s3589_s5  ;;  %v2529_v31 = vmul.f32 %v3486_v24, %v5637_v19  ;;  %v2671_v4 = vand.u32 2147483648, %v5682_v33 }
 0x41c   :  { %v1834_v21 = vsel %vm1818_vm8, %v1529_v36, %v1801_v30 }
 0x41d   :  { %3493 = vrsqrt.f32 %v5697_v1  ;;  %3363 = vmatprep.mubr.msk.f32.mxu1 %vm124_vm0, %v1834_v21  ;;  %v2531_v6 = vsel %vm2530_vm6, %v5637_v19, %v2529_v31  ;;  %vm2682_vm10 = vcmp.eq.f32.partialorder %v5697_v1, inf  ;;  %vm2684_vm1 = vcmp.eq.f32.partialorder %v5697_v1, 0.0 }
 0x41e   :  { %v3488_v11 = vpop.eup %3487  ;;  %3364 = vmatmul.mubr.msk.f32.gmra.mxu1 %vm124_vm0, %v1834_v21  ;;  %v2601_v25 = vpop.permute.xlu0 %2600  ;;  %v2534_v34 = vsel %vm2532_vm7, %v2533_v18, %v2531_v6 }
 0x41f   :  { %v2642_v15 = vadd.f32 %v2601_v25, %v5344_v42  ;;  %v5710_v56 = vpop.permute.xlu1 %2174  ;;  %2836 = vrot.lane.b32.xlu0 %v2534_v34, %s3589_s5  ;;  %v2543_v3 = vmul.f32 %v3488_v11, %v5652_v41  ;;  %v2685_v11 = vand.u32 2147483648, %v5697_v1 }
 0x421   :  { %3495 = vrsqrt.f32 %v2642_v15  ;;  %v2545_v19 = vsel %vm2544_vm9, %v5652_v41, %v2543_v3  ;;  %vm2696_vm2 = vcmp.eq.f32.partialorder %v2642_v15, inf  ;;  %vm2698_vm3 = vcmp.eq.f32.partialorder %v2642_v15, 0.0 }
 0x422   :  { %v3490_v9 = vpop.eup %3489  ;;  %v2605_v59 = vpop.permute.xlu0 %2604  ;;  %v2548_v46 = vsel %vm2546_vm11, %v2547_v29, %v2545_v19 }
 0x423   :  { %v2644_v42 = vadd.f32 %v2605_v59, %v5358_v28  ;;  %v5719_v35 = vpop.permute.xlu1 %2178  ;;  %2840 = vrot.lane.b32.xlu0 %v2548_v46, %s3589_s5  ;;  %v2653_v40 = vmul.f32 %v3490_v9, %v5667_v2  ;;  %v2699_v9 = vand.u32 2147483648, %v2642_v15 }
 0x425   :  { %3497 = vrsqrt.f32 %v2644_v42  ;;  %v2655_v52 = vsel %vm2654_vm12, %v5667_v2, %v2653_v40  ;;  %vm2710_vm4 = vcmp.eq.f32.partialorder %v2644_v42, inf  ;;  %vm2712_vm5 = vcmp.eq.f32.partialorder %v2644_v42, 0.0 }
 0x426   :  { %v3492_v41 = vpop.eup %3491  ;;  %v2609_v24 = vpop.permute.xlu0 %2608  ;;  %v5727_v5 = vsel %vm2656_vm13, %v2657_v7, %v2655_v52  ;;  %v2713_v52 = vand.u32 2147483648, %v2644_v42 }
 0x427   :  { %v2646_v28 = vadd.f32 %v2609_v24, %v5372_v26  ;;  %v5730_v36 = vpop.permute.xlu1 %2182  ;;  %2876 = vrot.lane.b32.xlu0 %v5727_v5, %s3591_s13  ;;  %v2667_v22 = vmul.f32 %v3492_v41, %v5682_v33 }
 0x429   :  { %3499 = vrsqrt.f32 %v2646_v28  ;;  %v2669_v2 = vsel %vm2668_vm14, %v5682_v33, %v2667_v22  ;;  %vm2724_vm6 = vcmp.eq.f32.partialorder %v2646_v28, inf  ;;  %vm2726_vm7 = vcmp.eq.f32.partialorder %v2646_v28, 0.0 }
 0x42a   :  { %v3494_v30 = vpop.eup %3493  ;;  %v2613_v31 = vpop.permute.xlu0 %2612  ;;  %v5739_v26 = vsel %vm2670_vm15, %v2671_v4, %v2669_v2  ;;  %v2727_v4 = vand.u32 2147483648, %v2646_v28 }
 0x42b   :  { %v2648_v21 = vadd.f32 %v2613_v31, %v5386_v32  ;;  %v5742_v18 = vpop.permute.xlu1 %2186  ;;  %2880 = vrot.lane.b32.xlu0 %v5739_v26, %s3591_s13  ;;  %v2681_v6 = vmul.f32 %v3494_v30, %v5697_v1 }
 0x42d   :  { %3501 = vrsqrt.f32 %v2648_v21  ;;  %v2683_v33 = vsel %vm2682_vm10, %v5697_v1, %v2681_v6  ;;  %vm2738_vm9 = vcmp.eq.f32.partialorder %v2648_v21, inf  ;;  %vm2740_vm11 = vcmp.eq.f32.partialorder %v2648_v21, 0.0 }
 0x42e   :  { %v3496_v25 = vpop.eup %3495  ;;  %v2617_v34 = vpop.permute.xlu0 %2616  ;;  %v2686_v3 = vsel %vm2684_vm1, %v2685_v11, %v2683_v33  ;;  %v2741_v11 = vand.u32 2147483648, %v2648_v21 }
 0x42f   :  { %v2650_v32 = vadd.f32 %v2617_v34, %v5400_v49  ;;  %v5752_v29 = vpop.permute.xlu1 %2190  ;;  %2884 = vrot.lane.b32.xlu0 %v2686_v3, %s3591_s13  ;;  %v2695_v19 = vmul.f32 %v3496_v25, %v2642_v15 }
 0x431   :  { %3503 = vrsqrt.f32 %v2650_v32  ;;  %v2697_v59 = vsel %vm2696_vm2, %v2642_v15, %v2695_v19  ;;  %vm2752_vm12 = vcmp.eq.f32.partialorder %v2650_v32, inf  ;;  %vm2754_vm13 = vcmp.eq.f32.partialorder %v2650_v32, 0.0 }
 0x432   :  { %v3498_v46 = vpop.eup %3497  ;;  %v2700_v40 = vsel %vm2698_vm3, %v2699_v9, %v2697_v59  ;;  %v2755_v59 = vand.u32 2147483648, %v2650_v32 }
 0x433   :  { %v5755_v7 = vpop.permute.xlu1 %2194  ;;  %2888 = vrot.lane.b32.xlu0 %v2700_v40, %s3591_s13  ;;  %v2709_v1 = vmul.f32 %v3498_v46, %v2644_v42 }
 0x435   :  { %v2711_v49 = vsel %vm2710_vm4, %v2644_v42, %v2709_v1 }
 0x436   :  { %v3500_v41 = vpop.eup %3499  ;;  %v5758_v24 = vsel %vm2712_vm5, %v2713_v52, %v2711_v49 }
 0x437   :  { %v5760_v22 = vpop.permute.xlu1 %2198  ;;  %2892 = vrot.lane.b32.xlu0 %v5758_v24, %s3591_s13  ;;  %v2723_v15 = vmul.f32 %v3500_v41, %v2646_v28 }
 0x439   :  { %v2725_v2 = vsel %vm2724_vm6, %v2646_v28, %v2723_v15 }
 0x43a   :  { %v3502_v30 = vpop.eup %3501  ;;  %v5764_v31 = vsel %vm2726_vm7, %v2727_v4, %v2725_v2 }
 0x43b   :  { %v5766_v6 = vpop.permute.xlu1 %2202  ;;  %2896 = vrot.lane.b32.xlu0 %v5764_v31, %s3591_s13  ;;  %v2737_v42 = vmul.f32 %v3502_v30, %v2648_v21 }
 0x43d   :  { %v2739_v33 = vsel %vm2738_vm9, %v2648_v21, %v2737_v42 }
 0x43e   :  { %v3504_v25 = vpop.eup %3503  ;;  %v5770_v34 = vsel %vm2740_vm11, %v2741_v11, %v2739_v33 }
 0x43f   :  { %v2383_v19 = vpop.permute.xlu1 %2382  ;;  %2900 = vrot.lane.b32.xlu0 %v5770_v34, %s3591_s13  ;;  %v2751_v28 = vmul.f32 %v3504_v25, %v2650_v32 }
 0x440   :  { %v2429_v9 = vadd.f32 %v2383_v19, %v5440_v16 }
 0x441   :  { %v2753_v46 = vsel %vm2752_vm12, %v2650_v32, %v2751_v28 }
 0x442   :  { %3505 = vrsqrt.f32 %v2429_v9  ;;  %v5775_v1 = vsel %vm2754_vm13, %v2755_v59, %v2753_v46  ;;  %vm2453_vm14 = vcmp.eq.f32.partialorder %v2429_v9, inf  ;;  %v2456_v30 = vand.u32 2147483648, %v2429_v9 }
 0x443   :  { %v2387_v52 = vpop.permute.xlu1 %2386  ;;  %2904 = vrot.lane.b32.xlu0 %v5775_v1, %s3591_s13  ;;  %vm2455_vm15 = vcmp.eq.f32.partialorder %v2429_v9, 0.0 }
 0x444   :  { %v2431_v21 = vadd.f32 %v2387_v52, %v5448_v47 }
 0x446   :  { %3507 = vrsqrt.f32 %v2431_v21  ;;  %vm2467_vm10 = vcmp.eq.f32.partialorder %v2431_v21, inf  ;;  %vm2469_vm1 = vcmp.eq.f32.partialorder %v2431_v21, 0.0 }
 0x447   :  { %v2391_v49 = vpop.permute.xlu1 %2390  ;;  %2924 = vrot.lane.b32.xlu0 %v5727_v5, %s3590_s12 }
 0x448   :  { %v2433_v16 = vadd.f32 %v2391_v49, %v5456_v50 }
 0x44a   :  { %3509 = vrsqrt.f32 %v2433_v16  ;;  %vm2481_vm2 = vcmp.eq.f32.partialorder %v2433_v16, inf  ;;  %vm2483_vm3 = vcmp.eq.f32.partialorder %v2433_v16, 0.0 }
 0x44b   :  { %v2395_v41 = vpop.permute.xlu1 %2394  ;;  %2928 = vrot.lane.b32.xlu0 %v5739_v26, %s3590_s12 }
 0x44c   :  { %v2435_v32 = vadd.f32 %v2395_v41, %v5464_v37 }
 0x44e   :  { %3511 = vrsqrt.f32 %v2435_v32  ;;  %vm2495_vm4 = vcmp.eq.f32.partialorder %v2435_v32, inf  ;;  %vm2497_vm5 = vcmp.eq.f32.partialorder %v2435_v32, 0.0 }
 0x44f   :  { %v3506_v15 = vpop.eup %3505  ;;  %v2399_v4 = vpop.permute.xlu1 %2398  ;;  %2932 = vrot.lane.b32.xlu0 %v2686_v3, %s3590_s12  ;;  %v2470_v3 = vand.u32 2147483648, %v2431_v21 }
 0x450   :  { %v2437_v47 = vadd.f32 %v2399_v4, %v5472_v43  ;;  %v2452_v2 = vmul.f32 %v3506_v15, %v2429_v9 }
 0x452   :  { %3513 = vrsqrt.f32 %v2437_v47  ;;  %v2454_v5 = vsel %vm2453_vm14, %v2429_v9, %v2452_v2  ;;  %vm2509_vm6 = vcmp.eq.f32.partialorder %v2437_v47, inf  ;;  %vm2511_vm7 = vcmp.eq.f32.partialorder %v2437_v47, 0.0 }
 0x453   :  { %v3508_v50 = vpop.eup %3507  ;;  %v2403_v42 = vpop.permute.xlu1 %2402  ;;  %2936 = vrot.lane.b32.xlu0 %v2700_v40, %s3590_s12  ;;  %v2457_v26 = vsel %vm2455_vm15, %v2456_v30, %v2454_v5 }
 0x454   :  { %v2439_v37 = vadd.f32 %v2403_v42, %v5482_v14  ;;  %2814 = vrot.lane.b32.xlu1 %v2457_v26, %s3589_s5  ;;  %v2466_v11 = vmul.f32 %v3508_v50, %v2431_v21  ;;  %v2484_v14 = vand.u32 2147483648, %v2433_v16 }
 0x456   :  { %3515 = vrsqrt.f32 %v2439_v37  ;;  %v2468_v43 = vsel %vm2467_vm10, %v2431_v21, %v2466_v11  ;;  %vm2523_vm9 = vcmp.eq.f32.partialorder %v2439_v37, inf  ;;  %vm2525_vm11 = vcmp.eq.f32.partialorder %v2439_v37, 0.0 }
 0x457   :  { %v3510_v33 = vpop.eup %3509  ;;  %v2407_v25 = vpop.permute.xlu1 %2406  ;;  %2940 = vrot.lane.b32.xlu0 %v5758_v24, %s3590_s12  ;;  %v2471_v19 = vsel %vm2469_vm1, %v2470_v3, %v2468_v43 }
 0x458   :  { %v2441_v28 = vadd.f32 %v2407_v25, %v5495_v54  ;;  %2818 = vrot.lane.b32.xlu1 %v2471_v19, %s3589_s5  ;;  %v2480_v40 = vmul.f32 %v3510_v33, %v2433_v16  ;;  %v2498_v54 = vand.u32 2147483648, %v2435_v32 }
 0x45a   :  { %3517 = vrsqrt.f32 %v2441_v28  ;;  %v2482_v9 = vsel %vm2481_vm2, %v2433_v16, %v2480_v40  ;;  %vm2537_vm12 = vcmp.eq.f32.partialorder %v2441_v28, inf  ;;  %vm2539_vm13 = vcmp.eq.f32.partialorder %v2441_v28, 0.0 }
 0x45b   :  { %v3512_v59 = vpop.eup %3511  ;;  %v2411_v46 = vpop.permute.xlu1 %2410  ;;  %2944 = vrot.lane.b32.xlu0 %v5764_v31, %s3590_s12  ;;  %v2485_v52 = vsel %vm2483_vm3, %v2484_v14, %v2482_v9 }
 0x45c   :  { %v2443_v21 = vadd.f32 %v2411_v46, %v5508_v58  ;;  %2822 = vrot.lane.b32.xlu1 %v2485_v52, %s3589_s5  ;;  %v2494_v24 = vmul.f32 %v3512_v59, %v2435_v32  ;;  %v2512_v58 = vand.u32 2147483648, %v2437_v47 }
 0x45e   :  { %3519 = vrsqrt.f32 %v2443_v21  ;;  %v2496_v49 = vsel %vm2495_vm4, %v2435_v32, %v2494_v24  ;;  %vm2551_vm14 = vcmp.eq.f32.partialorder %v2443_v21, inf  ;;  %v2554_v14 = vand.u32 2147483648, %v2443_v21 }
 0x45f   :  { %v3514_v41 = vpop.eup %3513  ;;  %v2591_v15 = vpop.permute.xlu1 %2590  ;;  %2948 = vrot.lane.b32.xlu0 %v5770_v34, %s3590_s12  ;;  %v2499_v16 = vsel %vm2497_vm5, %v2498_v54, %v2496_v49  ;;  %vm2553_vm15 = vcmp.eq.f32.partialorder %v2443_v21, 0.0 }
 0x460   :  { %v2637_v4 = vadd.f32 %v2591_v15, %v5521_v0  ;;  %2826 = vrot.lane.b32.xlu1 %v2499_v16, %s3589_s5  ;;  %v2508_v31 = vmul.f32 %v3514_v41, %v2437_v47  ;;  %v2526_v0 = vand.u32 2147483648, %v2439_v37 }
 0x462   :  { %3521 = vrsqrt.f32 %v2637_v4  ;;  %v2510_v2 = vsel %vm2509_vm6, %v2437_v47, %v2508_v31  ;;  %vm2661_vm10 = vcmp.eq.f32.partialorder %v2637_v4, inf  ;;  %v2664_v24 = vand.u32 2147483648, %v2637_v4 }
 0x463   :  { %v3516_v30 = vpop.eup %3515  ;;  %v2595_v5 = vpop.permute.xlu1 %2594  ;;  %2952 = vrot.lane.b32.xlu0 %v5775_v1, %s3590_s12  ;;  %v2513_v32 = vsel %vm2511_vm7, %v2512_v58, %v2510_v2  ;;  %v2540_v1 = vand.u32 2147483648, %v2441_v28  ;;  %vm2663_vm1 = vcmp.eq.f32.partialorder %v2637_v4, 0.0 }
 0x464   :  { %v2639_v50 = vadd.f32 %v2595_v5, %v5534_v13  ;;  %2830 = vrot.lane.b32.xlu1 %v2513_v32, %s3589_s5  ;;  %v2522_v34 = vmul.f32 %v3516_v30, %v2439_v37 }
 0x466   :  { %3523 = vrsqrt.f32 %v2639_v50  ;;  %v2524_v42 = vsel %vm2523_vm9, %v2439_v37, %v2522_v34  ;;  %vm2675_vm2 = vcmp.eq.f32.partialorder %v2639_v50, inf  ;;  %vm2677_vm3 = vcmp.eq.f32.partialorder %v2639_v50, 0.0 }
 0x467   :  { %v3518_v26 = vpop.eup %3517  ;;  %v2599_v11 = vpop.permute.xlu1 %2598  ;;  %v2527_v3 = vsel %vm2525_vm11, %v2526_v0, %v2524_v42 }
 0x468   :  { %v2641_v47 = vadd.f32 %v2599_v11, %v5545_v63  ;;  %2834 = vrot.lane.b32.xlu1 %v2527_v3, %s3589_s5  ;;  %v2536_v43 = vmul.f32 %v3518_v26, %v2441_v28 }
 0x46a   :  { %3525 = vrsqrt.f32 %v2641_v47  ;;  %v2538_v13 = vsel %vm2537_vm12, %v2441_v28, %v2536_v43  ;;  %vm2689_vm4 = vcmp.eq.f32.partialorder %v2641_v47, inf  ;;  %vm2691_vm5 = vcmp.eq.f32.partialorder %v2641_v47, 0.0 }
 0x46b   :  { %v3520_v33 = vpop.eup %3519  ;;  %v2603_v25 = vpop.permute.xlu1 %2602  ;;  %v2541_v19 = vsel %vm2539_vm13, %v2540_v1, %v2538_v13 }
 0x46c   :  { %v2643_v40 = vadd.f32 %v2603_v25, %v5557_v61  ;;  %2838 = vrot.lane.b32.xlu1 %v2541_v19, %s3589_s5  ;;  %v2550_v37 = vmul.f32 %v3520_v33, %v2443_v21 }
 0x46e   :  { %3527 = vrsqrt.f32 %v2643_v40  ;;  %v2552_v63 = vsel %vm2551_vm14, %v2443_v21, %v2550_v37  ;;  %vm2703_vm6 = vcmp.eq.f32.partialorder %v2643_v40, inf  ;;  %vm2705_vm7 = vcmp.eq.f32.partialorder %v2643_v40, 0.0 }
 0x46f   :  { %v3522_v9 = vpop.eup %3521  ;;  %v2607_v59 = vpop.permute.xlu1 %2606  ;;  %v2555_v46 = vsel %vm2553_vm15, %v2554_v14, %v2552_v63 }
 0x470   :  { %v2645_v52 = vadd.f32 %v2607_v59, %v5572_v8  ;;  %2842 = vrot.lane.b32.xlu1 %v2555_v46, %s3589_s5  ;;  %v2660_v28 = vmul.f32 %v3522_v9, %v2637_v4  ;;  %v2678_v8 = vand.u32 2147483648, %v2639_v50 }
 0x472   :  { %3529 = vrsqrt.f32 %v2645_v52  ;;  %v2662_v61 = vsel %vm2661_vm10, %v2637_v4, %v2660_v28  ;;  %vm2717_vm9 = vcmp.eq.f32.partialorder %v2645_v52, inf  ;;  %v2720_v33 = vand.u32 2147483648, %v2645_v52 }
 0x473   :  { %v3524_v54 = vpop.eup %3523  ;;  %v2611_v49 = vpop.permute.xlu1 %2610  ;;  %v5813_v41 = vsel %vm2663_vm1, %v2664_v24, %v2662_v61  ;;  %vm2719_vm11 = vcmp.eq.f32.partialorder %v2645_v52, 0.0 }
 0x474   :  { %v2647_v15 = vadd.f32 %v2611_v49, %v5587_v23  ;;  %2878 = vrot.lane.b32.xlu1 %v5813_v41, %s3591_s13  ;;  %v2674_v21 = vmul.f32 %v3524_v54, %v2639_v50  ;;  %v2692_v23 = vand.u32 2147483648, %v2641_v47 }
 0x476   :  { %3531 = vrsqrt.f32 %v2647_v15  ;;  %v2676_v16 = vsel %vm2675_vm2, %v2639_v50, %v2674_v21  ;;  %vm2731_vm12 = vcmp.eq.f32.partialorder %v2647_v15, inf  ;;  %vm2733_vm13 = vcmp.eq.f32.partialorder %v2647_v15, 0.0 }
 0x477   :  { %v3526_v31 = vpop.eup %3525  ;;  %v2615_v58 = vpop.permute.xlu1 %2614  ;;  %v2679_v2 = vsel %vm2677_vm3, %v2678_v8, %v2676_v16 }
 0x478   :  { %v2649_v4 = vadd.f32 %v2615_v58, %v5602_v17  ;;  %2882 = vrot.lane.b32.xlu1 %v2679_v2, %s3591_s13  ;;  %v2688_v30 = vmul.f32 %v3526_v31, %v2641_v47  ;;  %v2706_v17 = vand.u32 2147483648, %v2643_v40 }
 0x479   :  { %v5820_v5 = vpop.permute.xlu0 %2812 }
 0x47a   :  { %3533 = vrsqrt.f32 %v2649_v4  ;;  %v2690_v32 = vsel %vm2689_vm4, %v2641_v47, %v2688_v30  ;;  %vm2745_vm14 = vcmp.eq.f32.partialorder %v2649_v4, inf  ;;  %vm2747_vm15 = vcmp.eq.f32.partialorder %v2649_v4, 0.0  ;;  %v6361_v30 = vld [vmem:[#allocation24_spill] sm:$0xff] }
 0x47b   :  { %v3528_v34 = vpop.eup %3527  ;;  %v2619_v0 = vpop.permute.xlu1 %2618  ;;  %v2693_v42 = vsel %vm2691_vm5, %v2692_v23, %v2690_v32  ;;  %v2220_v23 = vadd.f32 %v5452_v20, %v6361_v30  ;;  %v6363_v20 = vld [vmem:[#allocation26_spill] sm:$0xff]  ;;  %vm3004_vm5 = vcmask 785408  }
 0x47c   :  { %v2651_v50 = vadd.f32 %v2619_v0, %v5617_v39  ;;  %2886 = vrot.lane.b32.xlu1 %v2693_v42, %s3591_s13  ;;  %v2702_v26 = vmul.f32 %v3528_v34, %v2643_v40  ;;  %v6362_v34 = vld [vmem:[#allocation25_spill] sm:$0xff] }
 0x47d   :  { %v5824_v11 = vpop.permute.xlu0 %2816  ;;  %v5855_v0 = vadd.f32 %v5460_v53, %v6362_v34  ;;  %vm2238_vm2 = vcmp.eq.f32.partialorder %v2220_v23, inf  ;;  %vm2240_vm3 = vcmp.eq.f32.partialorder %v2220_v23, 0.0 }
 0x47e   :  { %3535 = vrsqrt.f32 %v2651_v50  ;;  %v2704_v3 = vsel %vm2703_vm6, %v2643_v40, %v2702_v26  ;;  %v2734_v40 = vand.u32 2147483648, %v2647_v15  ;;  %vm2759_vm10 = vcmp.eq.f32.partialorder %v2651_v50, inf }
 0x47f   :  { %v3530_v43 = vpop.eup %3529  ;;  %v2707_v1 = vsel %vm2705_vm7, %v2706_v17, %v2704_v3  ;;  %vm2761_vm1 = vcmp.eq.f32.partialorder %v2651_v50, 0.0  ;;  %3537 = vrsqrt.f32 %v2220_v23  ;;  %vm2252_vm4 = vcmp.eq.f32.partialorder %v5855_v0, inf }
 0x480   :  { %2890 = vrot.lane.b32.xlu1 %v2707_v1, %s3591_s13  ;;  %v2716_v47 = vmul.f32 %v3530_v43, %v2645_v52  ;;  %3539 = vrsqrt.f32 %v5855_v0  ;;  %v2255_v30 = vand.u32 2147483648, %v5855_v0  ;;  %vm2254_vm6 = vcmp.eq.f32.partialorder %v5855_v0, 0.0 }
 0x481   :  { %v5827_v13 = vpop.permute.xlu0 %2820 }
 0x482   :  { %v2718_v39 = vsel %vm2717_vm9, %v2645_v52, %v2716_v47  ;;  %v2748_v52 = vand.u32 2147483648, %v2649_v4 }
 0x483   :  { %v3532_v25 = vpop.eup %3531  ;;  %v2721_v19 = vsel %vm2719_vm11, %v2720_v33, %v2718_v39 }
 0x484   :  { %2894 = vrot.lane.b32.xlu1 %v2721_v19, %s3591_s13  ;;  %v2730_v37 = vmul.f32 %v3532_v25, %v2647_v15 }
 0x485   :  { %v5830_v14 = vpop.permute.xlu0 %2824 }
 0x486   :  { %v2732_v63 = vsel %vm2731_vm12, %v2647_v15, %v2730_v37  ;;  %v2762_v15 = vand.u32 2147483648, %v2651_v50 }
 0x487   :  { %v3534_v9 = vpop.eup %3533  ;;  %v2735_v59 = vsel %vm2733_vm13, %v2734_v40, %v2732_v63 }
 0x488   :  { %2898 = vrot.lane.b32.xlu1 %v2735_v59, %s3591_s13  ;;  %v2744_v46 = vmul.f32 %v3534_v9, %v2649_v4 }
 0x489   :  { %v5833_v28 = vpop.permute.xlu0 %2828 }
 0x48a   :  { %v2746_v24 = vsel %vm2745_vm14, %v2649_v4, %v2744_v46 }
 0x48b   :  { %v3536_v61 = vpop.eup %3535  ;;  %v2749_v54 = vsel %vm2747_vm15, %v2748_v52, %v2746_v24  ;;  %v2241_v52 = vand.u32 2147483648, %v2220_v23 }
 0x48c   :  { %2902 = vrot.lane.b32.xlu1 %v2749_v54, %s3591_s13  ;;  %v2758_v49 = vmul.f32 %v3536_v61, %v2651_v50 }
 0x48d   :  { %v5836_v21 = vpop.permute.xlu0 %2832 }
 0x48e   :  { %v2760_v8 = vsel %vm2759_vm10, %v2651_v50, %v2758_v49 }
 0x48f   :  { %v2763_v16 = vsel %vm2761_vm1, %v2762_v15, %v2760_v8 }
 0x490   :  { %2906 = vrot.lane.b32.xlu1 %v2763_v16, %s3591_s13 }
 0x491   :  { %v5839_v31 = vpop.permute.xlu0 %2836 }
 0x494   :  { %2926 = vrot.lane.b32.xlu1 %v5813_v41, %s3590_s12 }
 0x495   :  { %v5843_v58 = vpop.permute.xlu0 %2840 }
 0x498   :  { %2930 = vrot.lane.b32.xlu1 %v2679_v2, %s3590_s12  ;;  %v5866_v2 = vadd.f32 %v5468_v57, %v6363_v20  ;;  %v5880_v57 = vadd.f32 %v5478_v55, %v5205_v51  ;;  %v5894_v51 = vadd.f32 %v5491_v38, %v5213_v45  ;;  %v6364_v45 = vld [vmem:[#allocation27_spill] sm:$0xff] }
 0x499   :  { %v5846_v4 = vpop.permute.xlu0 %2876  ;;  %v5908_v38 = vadd.f32 %v5504_v27, %v6364_v45  ;;  %v5923_v27 = vadd.f32 %v5517_v62, %v5229_v44  ;;  %v5938_v44 = vadd.f32 %v5530_v60, %v5237_v12 }
 0x49a   :  { %3541 = vrsqrt.f32 %v5866_v2  ;;  %vm2266_vm7 = vcmp.eq.f32.partialorder %v5866_v2, inf  ;;  %vm2268_vm9 = vcmp.eq.f32.partialorder %v5866_v2, 0.0  ;;  %vm2280_vm11 = vcmp.eq.f32.partialorder %v5880_v57, inf }
 0x49b   :  { %3543 = vrsqrt.f32 %v5880_v57  ;;  %vm2282_vm12 = vcmp.eq.f32.partialorder %v5880_v57, 0.0  ;;  %vm2294_vm13 = vcmp.eq.f32.partialorder %v5894_v51, inf  ;;  %vm2296_vm14 = vcmp.eq.f32.partialorder %v5894_v51, 0.0 }
 0x49c   :  { %2934 = vrot.lane.b32.xlu1 %v2693_v42, %s3590_s12  ;;  %3545 = vrsqrt.f32 %v5894_v51  ;;  %vm2308_vm15 = vcmp.eq.f32.partialorder %v5908_v38, inf  ;;  %vm2310_vm10 = vcmp.eq.f32.partialorder %v5908_v38, 0.0  ;;  %vm2322_vm1 = vcmp.eq.f32.partialorder %v5923_v27, inf }
 0x49d   :  { %v5851_v32 = vpop.permute.xlu0 %2880  ;;  %3547 = vrsqrt.f32 %v5908_v38 }
 0x49e   :  { %3549 = vrsqrt.f32 %v5923_v27 }
 0x49f   :  { %3551 = vrsqrt.f32 %v5938_v44 }
 0x4a0   :  { %2938 = vrot.lane.b32.xlu1 %v2707_v1, %s3590_s12  ;;  %v3538_v1 = vpop.eup %3537 }
 0x4a1   :  { %v5858_v41 = vpop.permute.xlu0 %2884  ;;  %v3540_v39 = vpop.eup %3539  ;;  %v2237_v25 = vmul.f32 %v3538_v1, %v2220_v23 }
 0x4a2   :  { %v2045_v50 = vpop.f32.mrf.mxu1  ;;  %v2251_v63 = vmul.f32 %v3540_v39, %v5855_v0 }
 0x4a3   :  { %2764 = vst [vmem:[%s6241_s6] sm:$0xff] %v2045_v50  ;;  %v2239_v9 = vsel %vm2238_vm2, %v2220_v23, %v2237_v25  ;;  %v2283_v25 = vand.u32 2147483648, %v5880_v57  ;;  %vm2324_vm2 = vcmp.eq.f32.partialorder %v5923_v27, 0.0 }
 0x4a4   :  { %v2047_v42 = vpop.f32.mrf.mxu1  ;;  %2942 = vrot.lane.b32.xlu1 %v2721_v19, %s3590_s12  ;;  %v2253_v49 = vsel %vm2252_vm4, %v5855_v0, %v2251_v63  ;;  %vm2338_vm4 = vcmp.eq.f32.partialorder %v5938_v44, 0.0 }
 0x4a5   :  { %2765 = vst [vmem:[%s6241_s6 + $0x8] sm:$0xff] %v2047_v42  ;;  %v5872_v53 = vpop.permute.xlu0 %2888 }
 0x4a6   :  { %v2051_v26 = vpop.f32.mrf.mxu1 }
 0x4a7   :  { %2766 = vst [vmem:[%s6241_s6 + $0x18] sm:$0xff] %v2051_v26  ;;  %v3542_v46 = vpop.eup %3541  ;;  %v2269_v26 = vand.u32 2147483648, %v5866_v2 }
 0x4a8   :  { %2946 = vrot.lane.b32.xlu1 %v2735_v59, %s3590_s12  ;;  %v2053_v17 = vpop.f32.mrf.mxu1  ;;  %v2265_v15 = vmul.f32 %v3542_v46, %v5866_v2 }
 0x4a9   :  { %2767 = vst [vmem:[%s6241_s6 + $0x20] sm:$0xff] %v2053_v17  ;;  %v5886_v3 = vpop.permute.xlu0 %2892 }
 0x4aa   :  { %v2057_v43 = vpop.f32.mrf.mxu1  ;;  %v2267_v0 = vsel %vm2266_vm7, %v5866_v2, %v2265_v15 }
 0x4ab   :  { %2768 = vst [vmem:[%s6241_s6 + $0x30] sm:$0xff] %v2057_v43  ;;  %v2270_v1 = vsel %vm2268_vm9, %v2269_v26, %v2267_v0 }
 0x4ac   :  { %2950 = vrot.lane.b32.xlu1 %v2749_v54, %s3590_s12  ;;  %v2059_v55 = vpop.f32.mrf.mxu1  ;;  %v2242_v54 = vsel %vm2240_vm3, %v2241_v52, %v2239_v9  ;;  %vm2336_vm3 = vcmp.eq.f32.partialorder %v5938_v44, inf }
 0x4ad   :  { %2769 = vst [vmem:[%s6241_s6 + $0x38] sm:$0xff] %v2059_v55  ;;  %v5900_v47 = vpop.permute.xlu0 %2896  ;;  %v2972_v62 = vsel %vm1818_vm8, %v2242_v54, %v5820_v5  ;;  %v2256_v5 = vsel %vm2254_vm6, %v2255_v30, %v2253_v49 }
 0x4ae   :  { %v2063_v33 = vpop.f32.mrf.mxu1  ;;  %v2988_v23 = vsel %vm124_vm0, %v2972_v62, %v5846_v4  ;;  %v2974_v4 = vsel %vm1818_vm8, %v2256_v5, %v5824_v11 }
 0x4af   :  { %2770 = vst [vmem:[%s6241_s6 + $0x48] sm:$0xff] %v2063_v33  ;;  %v2990_v17 = vsel %vm124_vm0, %v2974_v4, %v5851_v32  ;;  %v2976_v32 = vsel %vm1818_vm8, %v2270_v1, %v5827_v13 }
 0x4b0   :  { %2954 = vrot.lane.b32.xlu1 %v2763_v16, %s3590_s12  ;;  %v2065_v19 = vpop.f32.mrf.mxu1  ;;  %v3544_v16 = vpop.eup %3543 }
 0x4b1   :  { %2771 = vst [vmem:[%s6241_s6 + $0x50] sm:$0xff] %v2065_v19  ;;  %v5914_v37 = vpop.permute.xlu0 %2900  ;;  %v2279_v50 = vmul.f32 %v3544_v16, %v5880_v57  ;;  %v3546_v42 = vpop.eup %3545  ;;  %v2992_v19 = vsel %vm124_vm0, %v2976_v32, %v5858_v41  ;;  %v2339_v32 = vand.u32 2147483648, %v5938_v44 }
 0x4b2   :  { %v2069_v40 = vpop.f32.mrf.mxu1  ;;  %v2293_v2 = vmul.f32 %v3546_v42, %v5894_v51  ;;  %v3548_v45 = vpop.eup %3547  ;;  %v2325_v42 = vand.u32 2147483648, %v5923_v27 }
 0x4b3   :  { %2772 = vst [vmem:[%s6241_s6 + $0x60] sm:$0xff] %v2069_v40  ;;  %v2281_v33 = vsel %vm2280_vm11, %v5880_v57, %v2279_v50  ;;  %v2307_v57 = vmul.f32 %v3548_v45, %v5908_v38  ;;  %v3550_v52 = vpop.eup %3549 }
 0x4b4   :  { %v2071_v59 = vpop.f32.mrf.mxu1  ;;  %v2284_v9 = vsel %vm2282_vm12, %v2283_v25, %v2281_v33  ;;  %v2321_v16 = vmul.f32 %v3550_v52, %v5923_v27 }
 0x4b5   :  { %2773 = vst [vmem:[%s6241_s6 + $0x68] sm:$0xff] %v2071_v59  ;;  %v5928_v24 = vpop.permute.xlu0 %2904  ;;  %v2978_v41 = vsel %vm1818_vm8, %v2284_v9, %v5830_v14  ;;  %v2295_v59 = vsel %vm2294_vm13, %v5894_v51, %v2293_v2 }
 0x4b6   :  { %v2075_v61 = vpop.f32.mrf.mxu1  ;;  %v2994_v54 = vsel %vm124_vm0, %v2978_v41, %v5872_v53 }
 0x4b7   :  { %2774 = vst [vmem:[%s6241_s6 + $0x78] sm:$0xff] %v2075_v61  ;;  %v2297_v61 = vand.u32 2147483648, %v5894_v51  ;;  %v2309_v51 = vsel %vm2308_vm15, %v5908_v38, %v2307_v57 }
 0x4b8   :  { %v2077_v8 = vpop.f32.mrf.mxu1 }
 0x4b9   :  { %2775 = vst [vmem:[%s6241_s6 + $0x80] sm:$0xff] %v2077_v8  ;;  %v2925_v34 = vpop.permute.xlu0 %2924  ;;  %v2298_v8 = vsel %vm2296_vm14, %v2297_v61, %v2295_v59 }
 0x4ba   :  { %v3005_v12 = vsel %vm3004_vm5, %v2988_v23, %v2925_v34  ;;  %v2081_v60 = vpop.f32.mrf.mxu1  ;;  %v2980_v53 = vsel %vm1818_vm8, %v2298_v8, %v5833_v28  ;;  %v3552_v23 = vpop.eup %3551  ;;  %v2311_v34 = vand.u32 2147483648, %v5908_v38  ;;  %v2323_v38 = vsel %vm2322_vm1, %v5923_v27, %v2321_v16 }
 0x4bb   :  { %3021 = vst [vmem:[%s6241_s6 + $0x10] sm:$0xff] %v3005_v12  ;;  %2776 = vst [vmem:[%s6241_s6 + $0x90] sm:$0xff] %v2081_v60  ;;  %v2996_v12 = vsel %vm124_vm0, %v2980_v53, %v5886_v3  ;;  %v2335_v50 = vmul.f32 %v3552_v23, %v5938_v44  ;;  %v6365_v53 = vld [vmem:[#allocation28_spill] sm:$0xff] }
 0x4bc   :  { %v2083_v20 = vpop.f32.mrf.mxu1  ;;  %v2312_v0 = vsel %vm2310_vm10, %v2311_v34, %v2309_v51  ;;  %v2225_v51 = vadd.f32 %v5730_v36, %v6365_v53  ;;  %v6368_v36 = vld [vmem:[#allocation31_spill] sm:$0xff] }
 0x4bd   :  { %2777 = vst [vmem:[%s6241_s6 + $0x98] sm:$0xff] %v2083_v20  ;;  %v2929_v43 = vpop.permute.xlu0 %2928  ;;  %v2982_v3 = vsel %vm1818_vm8, %v2312_v0, %v5836_v21  ;;  %v2337_v27 = vsel %vm2336_vm3, %v5938_v44, %v2335_v50  ;;  %v6369_v0 = vld [vmem:[#allocation32_spill] sm:$0xff] }
 0x4be   :  { %v3007_v11 = vsel %vm3004_vm5, %v2990_v17, %v2929_v43  ;;  %v2087_v55 = vpop.f32.mrf.mxu1  ;;  %v2998_v26 = vsel %vm124_vm0, %v2982_v3, %v5900_v47  ;;  %v2340_v25 = vsel %vm2338_vm4, %v2339_v32, %v2337_v27  ;;  %vm2273_vm12 = vcmp.eq.f32.partialorder %v2225_v51, inf }
 0x4bf   :  { %3023 = vst [vmem:[%s6241_s6 + $0x40] sm:$0xff] %v3007_v11  ;;  %2778 = vst [vmem:[%s6241_s6 + $0xa8] sm:$0xff] %v2087_v55  ;;  %v2326_v55 = vsel %vm2324_vm2, %v2325_v42, %v2323_v38  ;;  %vm2275_vm13 = vcmp.eq.f32.partialorder %v2225_v51, 0.0 }
 0x4c0   :  { %v2089_v39 = vpop.f32.mrf.mxu1  ;;  %v2984_v47 = vsel %vm1818_vm8, %v2326_v55, %v5839_v31 }
 0x4c1   :  { %2779 = vst [vmem:[%s6241_s6 + $0xb0] sm:$0xff] %v2089_v39  ;;  %v2933_v40 = vpop.permute.xlu0 %2932  ;;  %v3000_v33 = vsel %vm124_vm0, %v2984_v47, %v5914_v37  ;;  %v2986_v37 = vsel %vm1818_vm8, %v2340_v25, %v5843_v58 }
 0x4c2   :  { %v3009_v13 = vsel %vm3004_vm5, %v2992_v19, %v2933_v40  ;;  %v2093_v63 = vpop.f32.mrf.mxu1  ;;  %v3002_v44 = vsel %vm124_vm0, %v2986_v37, %v5928_v24 }
 0x4c3   :  { %3025 = vst [vmem:[%s6241_s6 + $0x70] sm:$0xff] %v3009_v13  ;;  %2780 = vst [vmem:[%s6241_s6 + $0xc0] sm:$0xff] %v2093_v63 }
 0x4c4   :  { %v2095_v46 = vpop.f32.mrf.mxu1 }
 0x4c5   :  { %2781 = vst [vmem:[%s6241_s6 + $0xc8] sm:$0xff] %v2095_v46  ;;  %v2937_v49 = vpop.permute.xlu0 %2936 }
 0x4c6   :  { %v3011_v14 = vsel %vm3004_vm5, %v2994_v54, %v2937_v49  ;;  %v6009_v62 = vpop.permute.xlu1 %2814  ;;  %v2099_v15 = vpop.f32.mrf.mxu1  ;;  %v2221_v49 = vadd.f32 %v5710_v56, %v5350_v48  ;;  %v6367_v48 = vld [vmem:[#allocation30_spill] sm:$0xff] }
 0x4c7   :  { %3027 = vst [vmem:[%s6241_s6 + $0xa0] sm:$0xff] %v3011_v14  ;;  %2782 = vst [vmem:[%s6241_s6 + $0xd8] sm:$0xff] %v2099_v15  ;;  %v2223_v15 = vadd.f32 %v5719_v35, %v5364_v10  ;;  %v6130_v56 = vadd.f32 %v5752_v29, %v6367_v48  ;;  %v6144_v29 = vadd.f32 %v5760_v22, %v6369_v0 }
 0x4c8   :  { %v2101_v30 = vpop.f32.mrf.mxu1  ;;  %3553 = vrsqrt.f32 %v2221_v49  ;;  %vm2245_vm6 = vcmp.eq.f32.partialorder %v2221_v49, inf  ;;  %v2248_v50 = vand.u32 2147483648, %v2221_v49  ;;  %vm2247_vm7 = vcmp.eq.f32.partialorder %v2221_v49, 0.0 }
 0x4c9   :  { %2783 = vst [vmem:[%s6241_s6 + $0xe0] sm:$0xff] %v2101_v30  ;;  %v2941_v60 = vpop.permute.xlu0 %2940  ;;  %3555 = vrsqrt.f32 %v2223_v15  ;;  %v6366_v30 = vld [vmem:[#allocation29_spill] sm:$0xff]  ;;  %vm2259_vm9 = vcmp.eq.f32.partialorder %v2223_v15, inf  ;;  %v2262_v55 = vand.u32 2147483648, %v2223_v15  ;;  %vm2261_vm11 = vcmp.eq.f32.partialorder %v2223_v15, 0.0 }
 0x4ca   :  { %v3013_v28 = vsel %vm3004_vm5, %v2996_v12, %v2941_v60  ;;  %v6030_v5 = vpop.permute.xlu1 %2818  ;;  %v2105_v4 = vpop.f32.mrf.mxu1  ;;  %3557 = vrsqrt.f32 %v2225_v51  ;;  %v2227_v23 = vadd.f32 %v5742_v18, %v6366_v30  ;;  %v6137_v60 = vadd.f32 %v5755_v7, %v6368_v36 }
 0x4cb   :  { %3029 = vst [vmem:[%s6241_s6 + $0xd0] sm:$0xff] %v3013_v28  ;;  %2784 = vst [vmem:[%s6241_s6 + $0xf0] sm:$0xff] %v2105_v4  ;;  %vm2301_vm10 = vcmp.eq.f32.partialorder %v6130_v56, inf  ;;  %vm2303_vm1 = vcmp.eq.f32.partialorder %v6130_v56, 0.0  ;;  %vm2329_vm4 = vcmp.eq.f32.partialorder %v6144_v29, inf }
 0x4cc   :  { %v2107_v20 = vpop.f32.mrf.mxu1  ;;  %3559 = vrsqrt.f32 %v2227_v23  ;;  %vm2287_vm14 = vcmp.eq.f32.partialorder %v2227_v23, inf  ;;  %vm2289_vm15 = vcmp.eq.f32.partialorder %v2227_v23, 0.0  ;;  %vm2315_vm2 = vcmp.eq.f32.partialorder %v6137_v60, inf }
 0x4cd   :  { %2785 = vst [vmem:[%s6241_s6 + $0xf8] sm:$0xff] %v2107_v20  ;;  %v2945_v17 = vpop.permute.xlu0 %2944  ;;  %3561 = vrsqrt.f32 %v6130_v56  ;;  %v2318_v48 = vand.u32 2147483648, %v6137_v60  ;;  %vm2317_vm3 = vcmp.eq.f32.partialorder %v6137_v60, 0.0 }
 0x4ce   :  { %v3015_v43 = vsel %vm3004_vm5, %v2998_v26, %v2945_v17  ;;  %v6051_v21 = vpop.permute.xlu1 %2822  ;;  %v2111_v11 = vpop.f32.mrf.mxu1  ;;  %3563 = vrsqrt.f32 %v6137_v60  ;;  %v6370_v26 = vld [vmem:[#allocation33_spill] sm:$0xff] }
 0x4cf   :  { %3031 = vst [vmem:[%s6241_s6 + $0x100] sm:$0xff] %v3015_v43  ;;  %2786 = vst [vmem:[%s6241_s6 + $0x108] sm:$0xff] %v2111_v11  ;;  %3565 = vrsqrt.f32 %v6144_v29  ;;  %v6151_v17 = vadd.f32 %v5766_v6, %v6370_v26 }
 0x4d0   :  { %v2113_v1 = vpop.f32.mrf.mxu1 }
 0x4d1   :  { %2787 = vst [vmem:[%s6241_s6 + $0x110] sm:$0xff] %v2113_v1  ;;  %v2949_v2 = vpop.permute.xlu0 %2948  ;;  %3567 = vrsqrt.f32 %v6151_v17 }
 0x4d2   :  { %v3017_v39 = vsel %vm3004_vm5, %v3000_v33, %v2949_v2  ;;  %v6071_v45 = vpop.permute.xlu1 %2826  ;;  %v2117_v31 = vpop.f32.mrf.mxu1 }
 0x4d3   :  { %3033 = vst [vmem:[%s6241_s6 + $0x130] sm:$0xff] %v3017_v39  ;;  %2788 = vst [vmem:[%s6241_s6 + $0x120] sm:$0xff] %v2117_v31  ;;  %v2276_v39 = vand.u32 2147483648, %v2225_v51 }
 0x4d4   :  { %v2119_v19 = vpop.f32.mrf.mxu1 }
 0x4d5   :  { %2789 = vst [vmem:[%s6241_s6 + $0x128] sm:$0xff] %v2119_v19  ;;  %v2953_v40 = vpop.permute.xlu0 %2952  ;;  %v3554_v10 = vpop.eup %3553 }
 0x4d6   :  { %v3019_v13 = vsel %vm3004_vm5, %v3002_v44, %v2953_v40  ;;  %v6087_v63 = vpop.permute.xlu1 %2830  ;;  %v2123_v9 = vpop.f32.mrf.mxu1  ;;  %v2244_v28 = vmul.f32 %v3554_v10, %v2221_v49 }
 0x4d7   :  { %3035 = vst [vmem:[%s6241_s6 + $0x160] sm:$0xff] %v3019_v13  ;;  %2790 = vst [vmem:[%s6241_s6 + $0x138] sm:$0xff] %v2123_v9  ;;  %v3556_v12 = vpop.eup %3555  ;;  %v2290_v9 = vand.u32 2147483648, %v2227_v23 }
 0x4d8   :  { %v2125_v58 = vpop.f32.mrf.mxu1  ;;  %v2258_v18 = vmul.f32 %v3556_v12, %v2223_v15  ;;  %v2246_v3 = vsel %vm2245_vm6, %v2221_v49, %v2244_v28  ;;  %v3558_v38 = vpop.eup %3557  ;;  %vm2331_vm6 = vcmp.eq.f32.partialorder %v6144_v29, 0.0 }
 0x4d9   :  { %2791 = vst [vmem:[%s6241_s6 + $0x140] sm:$0xff] %v2125_v58  ;;  %v2249_v7 = vsel %vm2247_vm7, %v2248_v50, %v2246_v3  ;;  %v2272_v22 = vmul.f32 %v3558_v38, %v2225_v51  ;;  %v3560_v11 = vpop.eup %3559  ;;  %vm2343_vm7 = vcmp.eq.f32.partialorder %v6151_v17, inf }
 0x4da   :  { %v6098_v24 = vpop.permute.xlu1 %2834  ;;  %v2129_v41 = vpop.f32.mrf.mxu1  ;;  %v2260_v42 = vsel %vm2259_vm9, %v2223_v15, %v2258_v18  ;;  %v2973_v43 = vsel %vm1818_vm8, %v2249_v7, %v6009_v62  ;;  %v2286_v33 = vmul.f32 %v3560_v11, %v2227_v23  ;;  %v2346_v7 = vand.u32 2147483648, %v6151_v17 }
 0x4db   :  { %2792 = vst [vmem:[%s6241_s6 + $0x150] sm:$0xff] %v2129_v41  ;;  %v2263_v32 = vsel %vm2261_vm11, %v2262_v55, %v2260_v42  ;;  %v2274_v62 = vsel %vm2273_vm12, %v2225_v51, %v2272_v22  ;;  %v3562_v2 = vpop.eup %3561  ;;  %vm2345_vm9 = vcmp.eq.f32.partialorder %v6151_v17, 0.0 }
 0x4dc   :  { %v2131_v59 = vpop.f32.mrf.mxu1  ;;  %v2975_v6 = vsel %vm1818_vm8, %v2263_v32, %v6030_v5  ;;  %v2277_v19 = vsel %vm2275_vm13, %v2276_v39, %v2274_v62  ;;  %v2288_v5 = vsel %vm2287_vm14, %v2227_v23, %v2286_v33  ;;  %v2300_v40 = vmul.f32 %v3562_v2, %v6130_v56  ;;  %v3564_v13 = vpop.eup %3563 }
 0x4dd   :  { %2793 = vst [vmem:[%s6241_s6 + $0x158] sm:$0xff] %v2131_v59  ;;  %v2977_v44 = vsel %vm1818_vm8, %v2277_v19, %v6051_v21  ;;  %v3566_v49 = vpop.eup %3565 }
 0x4de   :  { %v6106_v57 = vpop.permute.xlu1 %2838  ;;  %v2135_v46 = vpop.f32.mrf.mxu1  ;;  %v2328_v23 = vmul.f32 %v3566_v49, %v6144_v29 }
 0x4df   :  { %2794 = vst [vmem:[%s6241_s6 + $0x168] sm:$0xff] %v2135_v46  ;;  %v2291_v46 = vsel %vm2289_vm15, %v2290_v9, %v2288_v5 }
 0x4e0   :  { %v2137_v52 = vpop.f32.mrf.mxu1  ;;  %v2979_v21 = vsel %vm1818_vm8, %v2291_v46, %v6071_v45  ;;  %v2330_v28 = vsel %vm2329_vm4, %v6144_v29, %v2328_v23 }
 0x4e1   :  { %2795 = vst [vmem:[%s6241_s6 + $0x170] sm:$0xff] %v2137_v52  ;;  %v2302_v52 = vsel %vm2301_vm10, %v6130_v56, %v2300_v40 }
 0x4e2   :  { %v6114_v61 = vpop.permute.xlu1 %2842 }
 0x4e6   :  { %v2879_v54 = vpop.permute.xlu1 %2878 }
 0x4e7   :  { %v2989_v47 = vsel %vm124_vm0, %v2973_v43, %v2879_v54  ;;  %v2314_v54 = vmul.f32 %v3564_v13, %v6137_v60 }
 0x4e9   :  { %v2316_v30 = vsel %vm2315_vm2, %v6137_v60, %v2314_v54 }
 0x4ea   :  { %v2883_v14 = vpop.permute.xlu1 %2882  ;;  %v2319_v36 = vsel %vm2317_vm3, %v2318_v48, %v2316_v30 }
 0x4eb   :  { %v2991_v31 = vsel %vm124_vm0, %v2975_v6, %v2883_v14  ;;  %v2304_v14 = vand.u32 2147483648, %v6130_v56 }
 0x4ed   :  { %v2305_v51 = vsel %vm2303_vm1, %v2304_v14, %v2302_v52 }
 0x4ee   :  { %v2887_v8 = vpop.permute.xlu1 %2886  ;;  %v2981_v45 = vsel %vm1818_vm8, %v2305_v51, %v6087_v63  ;;  %v2983_v63 = vsel %vm1818_vm8, %v2319_v36, %v6098_v24 }
 0x4ef   :  { %v2993_v58 = vsel %vm124_vm0, %v2977_v44, %v2887_v8 }
 0x4f2   :  { %v6122_v16 = vpop.permute.xlu1 %2890 }
 0x4f3   :  { %v2995_v15 = vsel %vm124_vm0, %v2979_v21, %v6122_v16  ;;  %v3568_v16 = vpop.eup %3567 }
 0x4f4   :  { %v2342_v18 = vmul.f32 %v3568_v16, %v6151_v17 }
 0x4f6   :  { %v6126_v34 = vpop.permute.xlu1 %2894  ;;  %v2344_v50 = vsel %vm2343_vm7, %v6151_v17, %v2342_v18 }
 0x4f7   :  { %v2997_v56 = vsel %vm124_vm0, %v2981_v45, %v6126_v34  ;;  %v2332_v34 = vand.u32 2147483648, %v6144_v29  ;;  %v2347_v26 = vsel %vm2345_vm9, %v2346_v7, %v2344_v50 }
 0x4f9   :  { %v2333_v38 = vsel %vm2331_vm6, %v2332_v34, %v2330_v28 }
 0x4fa   :  { %v6132_v35 = vpop.permute.xlu1 %2898  ;;  %v2985_v24 = vsel %vm1818_vm8, %v2333_v38, %v6106_v57  ;;  %v2987_v57 = vsel %vm1818_vm8, %v2347_v26, %v6114_v61 }
 0x4fb   :  { %v2999_v60 = vsel %vm124_vm0, %v2983_v63, %v6132_v35 }
 0x4fe   :  { %v6139_v4 = vpop.permute.xlu1 %2902 }
 0x4ff   :  { %v3001_v35 = vsel %vm124_vm0, %v2985_v24, %v6139_v4 }
 0x502   :  { %v6146_v20 = vpop.permute.xlu1 %2906 }
 0x503   :  { %v3003_v43 = vsel %vm124_vm0, %v2987_v57, %v6146_v20 }
 0x506   :  { %v2927_v27 = vpop.permute.xlu1 %2926 }
 0x507   :  { %v3006_v1 = vsel %vm3004_vm5, %v2989_v47, %v2927_v27 }
 0x508   :  { %3022 = vst [vmem:[%s6241_s6 + $0x28] sm:$0xff] %v3006_v1 }
 0x50a   :  { %v2931_v25 = vpop.permute.xlu1 %2930 }
 0x50b   :  { %v3008_v37 = vsel %vm3004_vm5, %v2991_v31, %v2931_v25 }
 0x50c   :  { %3024 = vst [vmem:[%s6241_s6 + $0x58] sm:$0xff] %v3008_v37 }
 0x50e   :  { %v2935_v41 = vpop.permute.xlu1 %2934 }
 0x50f   :  { %v3010_v59 = vsel %vm3004_vm5, %v2993_v58, %v2935_v41 }
 0x510   :  { %3026 = vst [vmem:[%s6241_s6 + $0x88] sm:$0xff] %v3010_v59 }
 0x512   :  { %v2939_v8 = vpop.permute.xlu1 %2938 }
 0x513   :  { %v3012_v53 = vsel %vm3004_vm5, %v2995_v15, %v2939_v8 }
 0x514   :  { %3028 = vst [vmem:[%s6241_s6 + $0xb8] sm:$0xff] %v3012_v53 }
 0x516   :  { %v2943_v10 = vpop.permute.xlu1 %2942 }
 0x517   :  { %v3014_v12 = vsel %vm3004_vm5, %v2997_v56, %v2943_v10 }
 0x518   :  { %3030 = vst [vmem:[%s6241_s6 + $0xe8] sm:$0xff] %v3014_v12 }
 0x51a   :  { %v2947_v0 = vpop.permute.xlu1 %2946 }
 0x51b   :  { %v3016_v3 = vsel %vm3004_vm5, %v2999_v60, %v2947_v0 }
 0x51c   :  { %3032 = vst [vmem:[%s6241_s6 + $0x118] sm:$0xff] %v3016_v3 }
 0x51e   :  { %v2951_v29 = vpop.permute.xlu1 %2950 }
 0x51f   :  { %v3018_v42 = vsel %vm3004_vm5, %v3001_v35, %v2951_v29 }
 0x520   :  { %3034 = vst [vmem:[%s6241_s6 + $0x148] sm:$0xff] %v3018_v42 }
 0x522   :  { %v2955_v22 = vpop.permute.xlu1 %2954 }
 0x523   :  { %v3020_v11 = vsel %vm3004_vm5, %v3003_v43, %v2955_v22 }
 0x524   :  { %3036 = vst [vmem:[%s6241_s6 + $0x178] sm:$0xff] %v3020_v11 }
 0x525   :  { %3041 = vsyncpa [#allocation3], 1 }

</bundles_post_ra>
